<compile_context>
chip_gen: v7x
topology: tpu7x:2x2x1
jax: 0.10.0
libtpu: 0.0.40
codegen_flags: <defaults>
</compile_context>

<pallas_src>
import math
import functools

import jax
import jax.numpy as jnp
from jax.experimental import pallas as pl


# ----------------------------------------------------------------------------
# Pallas kernels (single block, everything resident in VMEM)
# ----------------------------------------------------------------------------

def _full_spec(shape):
    """Whole-array block (no grid)."""
    return pl.BlockSpec(shape, lambda *_: (0,) * len(shape))


def _layernorm(h, gamma, beta, eps):
    mean = jnp.mean(h, axis=-1, keepdims=True)
    c = h - mean
    var = jnp.mean(c * c, axis=-1, keepdims=True)
    return c * jax.lax.rsqrt(var + eps) * gamma + beta


def _mha_addln_kernel(xq_ref, xkv_ref,
                      wq_ref, wk_ref, wv_ref, bq_ref, bk_ref, bv_ref,
                      wo_ref, bo_ref, g_ref, bln_ref, o_ref,
                      *, batch, nhead, scale, eps):
    """out = LayerNorm(xq + MHA(xq, xkv)), fully fused.

    xq: (Mq, D) f32, xkv: (Mk, D) f32 (flattened batch*seq rows)
    w{q,k,v}: (nhead, D, Dh) bf16 (pre-transposed, per head)
    b{q,k,v}: (nhead, 1, Dh) f32;  wo: (nhead, Dh, D) bf16;  bo/g/bln: (1, D) f32
    """
    Mq, D = xq_ref.shape
    Mk = xkv_ref.shape[0]
    Sq = Mq // batch
    Sk = Mk // batch

    xq = xq_ref[...]
    xq16 = xq.astype(jnp.bfloat16)
    xkv16 = xkv_ref[...].astype(jnp.bfloat16)

    # Per-head projections over all rows (MXU, bf16 operands, f32 accumulate).
    q_heads, k_heads, v_heads = [], [], []
    for h in range(nhead):
        q_heads.append(jnp.dot(xq16, wq_ref[h],
                               preferred_element_type=jnp.float32) + bq_ref[h])
        k_heads.append(jnp.dot(xkv16, wk_ref[h],
                               preferred_element_type=jnp.float32) + bk_ref[h])
        v_heads.append(jnp.dot(xkv16, wv_ref[h],
                               preferred_element_type=jnp.float32) + bv_ref[h])

    gamma = g_ref[...]
    beta = bln_ref[...]
    bo = bo_ref[...]

    # Attention per (batch, head) on small (S, Dh) tiles; the output projection
    # is accumulated per head: concat_h(o_h) @ Wo  ==  sum_h o_h @ Wo_h.
    for b in range(batch):
        q0, k0 = b * Sq, b * Sk
        acc = jnp.zeros((Sq, D), jnp.float32)
        for h in range(nhead):
            qb = q_heads[h][q0:q0 + Sq, :] * scale                # (Sq, Dh) f32
            kb = k_heads[h][k0:k0 + Sk, :]                        # (Sk, Dh) f32
            vb = v_heads[h][k0:k0 + Sk, :]                        # (Sk, Dh) f32
            # contract the head dim of both operands — no materialized K^T
            s = jax.lax.dot_general(
                qb, kb, dimension_numbers=(((1,), (1,)), ((), ())),
                preferred_element_type=jnp.float32)               # (Sq, Sk)
            s = s - jnp.max(s, axis=-1, keepdims=True)
            p = jnp.exp(s)
            p = p / jnp.sum(p, axis=-1, keepdims=True)
            oh = jnp.dot(p, vb, preferred_element_type=jnp.float32)  # (Sq, Dh)
            acc = acc + jnp.dot(oh.astype(jnp.bfloat16), wo_ref[h],
                                preferred_element_type=jnp.float32)  # (Sq, D)
        attn_b = acc + bo
        o_ref[q0:q0 + Sq, :] = _layernorm(attn_b + xq[q0:q0 + Sq, :],
                                          gamma, beta, eps)


def mha_addln_pallas(xq2d, xkv2d, attn, ln_g, ln_b, *, batch, nhead, eps=1e-5):
    Mq, D = xq2d.shape
    Mk = xkv2d.shape[0]
    Dh = D // nhead
    Sq, Sk = Mq // batch, Mk // batch
    scale = 1.0 / math.sqrt(Dh)
    kernel = functools.partial(_mha_addln_kernel, batch=batch, nhead=nhead,
                               scale=scale, eps=eps)
    flops = (2 * Mq * D * D + 4 * Mk * D * D + 2 * Mq * D * D
             + 4 * batch * nhead * Sq * Sk * Dh)
    cost = pl.CostEstimate(
        flops=flops,
        transcendentals=batch * nhead * Sq * Sk,
        bytes_accessed=4 * (2 * Mq * D + Mk * D) + 2 * 4 * D * D + 4 * 6 * D)
    return pl.pallas_call(
        kernel,
        out_shape=jax.ShapeDtypeStruct((Mq, D), jnp.float32),
        in_specs=[
            _full_spec((Mq, D)), _full_spec((Mk, D)),
            _full_spec((nhead, D, Dh)), _full_spec((nhead, D, Dh)),
            _full_spec((nhead, D, Dh)),
            _full_spec((nhead, 1, Dh)), _full_spec((nhead, 1, Dh)),
            _full_spec((nhead, 1, Dh)),
            _full_spec((nhead, Dh, D)), _full_spec((1, D)),
            _full_spec((1, D)), _full_spec((1, D)),
        ],
        out_specs=_full_spec((Mq, D)),
        cost_estimate=cost,
    )(xq2d, xkv2d, attn["wq"], attn["wk"], attn["wv"],
      attn["bq"], attn["bk"], attn["bv"], attn["wo"], attn["bo"], ln_g, ln_b)


def _ffn_addln_kernel(x_ref, w1_ref, b1_ref, w2_ref, b2_ref, g_ref, bln_ref,
                      o_ref, *, eps):
    """out = LayerNorm(x + W2·relu(W1·x + b1) + b2); (M, FF) stays in VMEM."""
    x = x_ref[...]
    h = jnp.dot(x.astype(jnp.bfloat16), w1_ref[...],
                preferred_element_type=jnp.float32) + b1_ref[...]
    h = jnp.maximum(h, 0.0)
    y = jnp.dot(h.astype(jnp.bfloat16), w2_ref[...],
                preferred_element_type=jnp.float32) + b2_ref[...]
    o_ref[...] = _layernorm(y + x, g_ref[...], bln_ref[...], eps)


def ffn_addln_pallas(x2d, w1t, b1, w2t, b2, ln_g, ln_b, *, eps=1e-5):
    M, D = x2d.shape
    FF = w1t.shape[1]
    cost = pl.CostEstimate(
        flops=4 * M * D * FF, transcendentals=0,
        bytes_accessed=2 * 2 * D * FF + 4 * (2 * M * D + FF + 3 * D))
    return pl.pallas_call(
        functools.partial(_ffn_addln_kernel, eps=eps),
        out_shape=jax.ShapeDtypeStruct((M, D), jnp.float32),
        in_specs=[_full_spec((M, D)),
                  _full_spec((D, FF)), _full_spec((1, FF)),
                  _full_spec((FF, D)), _full_spec((1, D)),
                  _full_spec((1, D)), _full_spec((1, D))],
        out_specs=_full_spec((M, D)),
        cost_estimate=cost,
    )(x2d, w1t, b1, w2t, b2, ln_g, ln_b)


def _ln_kernel(x_ref, g_ref, b_ref, o_ref, *, eps):
    o_ref[...] = _layernorm(x_ref[...], g_ref[...], b_ref[...], eps)


def layernorm_pallas(x2d, g, b, *, eps=1e-5):
    M, D = x2d.shape
    return pl.pallas_call(
        functools.partial(_ln_kernel, eps=eps),
        out_shape=jax.ShapeDtypeStruct((M, D), jnp.float32),
        in_specs=[_full_spec((M, D)), _full_spec((1, D)), _full_spec((1, D))],
        out_specs=_full_spec((M, D)),
    )(x2d, g, b)


def _ln_fc_kernel(x_ref, g_ref, b_ref, w_ref, bias_ref, o_ref, *, eps):
    xn = _layernorm(x_ref[...], g_ref[...], b_ref[...], eps)
    o_ref[...] = jnp.dot(xn.astype(jnp.bfloat16), w_ref[...],
                         preferred_element_type=jnp.float32) + bias_ref[...]


def layernorm_fc_pallas(x2d, g, b, wt, bias, *, eps=1e-5):
    M, D = x2d.shape
    N = wt.shape[1]
    return pl.pallas_call(
        functools.partial(_ln_fc_kernel, eps=eps),
        out_shape=jax.ShapeDtypeStruct((M, N), jnp.float32),
        in_specs=[_full_spec((M, D)), _full_spec((1, D)), _full_spec((1, D)),
                  _full_spec((D, N)), _full_spec((1, N))],
        out_specs=_full_spec((M, N)),
        cost_estimate=pl.CostEstimate(flops=2 * M * D * N, transcendentals=0,
                                      bytes_accessed=2 * D * N + 4 * 2 * M * D),
    )(x2d, g, b, wt, bias)


# ----------------------------------------------------------------------------
# Model glue (activations stay flattened (B*S, D); no transposes in the fwd)
# ----------------------------------------------------------------------------

def encoder_layer(x2d, p, batch, nhead):
    x2d = mha_addln_pallas(x2d, x2d, p["self_attn"], p["norm1_w"], p["norm1_b"],
                           batch=batch, nhead=nhead)
    x2d = ffn_addln_pallas(x2d, p["linear1_wt"], p["linear1_b"],
                           p["linear2_wt"], p["linear2_b"],
                           p["norm2_w"], p["norm2_b"])
    return x2d


def decoder_layer(x2d, mem2d, p, batch, nhead):
    x2d = mha_addln_pallas(x2d, x2d, p["self_attn"], p["norm1_w"], p["norm1_b"],
                           batch=batch, nhead=nhead)
    x2d = mha_addln_pallas(x2d, mem2d, p["cross_attn"], p["norm2_w"], p["norm2_b"],
                           batch=batch, nhead=nhead)
    x2d = ffn_addln_pallas(x2d, p["linear1_wt"], p["linear1_b"],
                           p["linear2_wt"], p["linear2_b"],
                           p["norm3_w"], p["norm3_b"])
    return x2d


def simple_transformer_forward(params, x, nhead):
    B, S, D = x.shape
    # position_embedding(arange(S)) == first S rows of the table (tiny XLA add)
    x = x + params["pos_emb"][None, :S, :]
    x2d = x.reshape(B * S, D)                       # free, contiguous reshape

    mem = x2d
    for lp in params["enc_layers"]:
        mem = encoder_layer(mem, lp, B, nhead)
    mem = layernorm_pallas(mem, params["enc_norm_w"], params["enc_norm_b"])

    out = x2d                                       # transformer(x, x): tgt = src
    for lp in params["dec_layers"]:
        out = decoder_layer(out, mem, lp, B, nhead)
    out = layernorm_fc_pallas(out, params["dec_norm_w"], params["dec_norm_b"],
                              params["fc_wt"], params["fc_b"])
    return out.reshape(B, S, D)


# ----------------------------------------------------------------------------
# Deterministic parameter init: draw PyTorch-layout params, then pre-arrange
# them ONCE (pre-transpose, per-head pack, bf16) for the kernels.
# ----------------------------------------------------------------------------

def _normal(key, shape, scale=0.05):
    return scale * jax.random.normal(key, shape, dtype=jnp.float32)


def init_mha(key, D, nhead):
    Dh = D // nhead
    ks = jax.random.split(key, 4)
    in_proj_w = _normal(ks[0], (3 * D, D))       # torch layout (out, in)
    in_proj_b = _normal(ks[1], (3 * D,))
    out_proj_w = _normal(ks[2], (D, D))
    out_proj_b = _normal(ks[3], (D,))

    wq, wk, wv = jnp.split(in_proj_w, 3, axis=0)
    bq, bk, bv = jnp.split(in_proj_b, 3)

    def per_head_wt(w):    # (D, D) out x in -> (nhead, D, Dh), transposed per head
        return jnp.transpose(w.reshape(nhead, Dh, D), (0, 2, 1)).astype(jnp.bfloat16)

    def per_head_b(b):
        return b.reshape(nhead, 1, Dh)

    return dict(
        wq=per_head_wt(wq), wk=per_head_wt(wk), wv=per_head_wt(wv),
        bq=per_head_b(bq), bk=per_head_b(bk), bv=per_head_b(bv),
        # y = concat_h(o_h) @ Wo^T == sum_h o_h @ Wo[:, h*Dh:(h+1)*Dh]^T
        wo=jnp.transpose(out_proj_w.reshape(D, nhead, Dh), (1, 2, 0)).astype(jnp.bfloat16),
        bo=out_proj_b.reshape(1, D),
    )


def init_encoder_layer(key, D, FF, nhead):
    ks = jax.random.split(key, 5)
    return dict(
        self_attn=init_mha(ks[0], D, nhead),
        linear1_wt=jnp.transpose(_normal(ks[1], (FF, D))).astype(jnp.bfloat16),  # (D, FF)
        linear1_b=_normal(ks[2], (FF,)).reshape(1, FF),
        linear2_wt=jnp.transpose(_normal(ks[3], (D, FF))).astype(jnp.bfloat16),  # (FF, D)
        linear2_b=_normal(ks[4], (D,)).reshape(1, D),
        norm1_w=jnp.ones((1, D), jnp.float32), norm1_b=jnp.zeros((1, D), jnp.float32),
        norm2_w=jnp.ones((1, D), jnp.float32), norm2_b=jnp.zeros((1, D), jnp.float32),
    )


def init_decoder_layer(key, D, FF, nhead):
    ks = jax.random.split(key, 6)
    return dict(
        self_attn=init_mha(ks[0], D, nhead),
        cross_attn=init_mha(ks[1], D, nhead),
        linear1_wt=jnp.transpose(_normal(ks[2], (FF, D))).astype(jnp.bfloat16),
        linear1_b=_normal(ks[3], (FF,)).reshape(1, FF),
        linear2_wt=jnp.transpose(_normal(ks[4], (D, FF))).astype(jnp.bfloat16),
        linear2_b=_normal(ks[5], (D,)).reshape(1, D),
        norm1_w=jnp.ones((1, D), jnp.float32), norm1_b=jnp.zeros((1, D), jnp.float32),
        norm2_w=jnp.ones((1, D), jnp.float32), norm2_b=jnp.zeros((1, D), jnp.float32),
        norm3_w=jnp.ones((1, D), jnp.float32), norm3_b=jnp.zeros((1, D), jnp.float32),
    )


def init_params(key, input_dim, nhead, n_enc, n_dec, seq_len, dim_ff):
    D = input_dim
    keys = jax.random.split(key, 3 + n_enc + n_dec)
    pos_key, fc_key, fcb_key = keys[0], keys[1], keys[2]
    enc_keys = keys[3:3 + n_enc]
    dec_keys = keys[3 + n_enc:]
    fc_w = _normal(fc_key, (D, D))               # torch layout (out, in)
    return dict(
        pos_emb=_normal(pos_key, (seq_len, D)),
        enc_layers=[init_encoder_layer(k, D, dim_ff, nhead) for k in enc_keys],
        enc_norm_w=jnp.ones((1, D), jnp.float32),
        enc_norm_b=jnp.zeros((1, D), jnp.float32),
        dec_layers=[init_decoder_layer(k, D, dim_ff, nhead) for k in dec_keys],
        dec_norm_w=jnp.ones((1, D), jnp.float32),
        dec_norm_b=jnp.zeros((1, D), jnp.float32),
        fc_wt=jnp.transpose(fc_w).astype(jnp.bfloat16),   # pre-transposed (D, D)
        fc_b=_normal(fcb_key, (D,)).reshape(1, D),
    )


# ----------------------------------------------------------------------------
# Pure-jnp reference (mirrors the module and the kernels' bf16 operand casts);
# used only as a numerical self-check in __main__.
# ----------------------------------------------------------------------------

def _bf16_round(x):
    return x.astype(jnp.bfloat16).astype(jnp.float32)


def reference_forward(params, x, nhead, eps=1e-5):
    B, S, D = x.shape
    Dh = D // nhead
    scale = 1.0 / math.sqrt(Dh)

    def ln(h, g, b):
        m = jnp.mean(h, axis=-1, keepdims=True)
        c = h - m
        v = jnp.mean(c * c, axis=-1, keepdims=True)
        return c * jax.lax.rsqrt(v + eps) * g + b

    def mha(xq, xkv, a):
        Mq, Mk = xq.shape[0], xkv.shape[0]
        Sq, Sk = Mq // B, Mk // B
        f32 = lambda w: w.astype(jnp.float32)
        wq = jnp.concatenate([f32(a["wq"][h]) for h in range(nhead)], axis=1)
        wk = jnp.concatenate([f32(a["wk"][h]) for h in range(nhead)], axis=1)
        wv = jnp.concatenate([f32(a["wv"][h]) for h in range(nhead)], axis=1)
        wo = jnp.concatenate([f32(a["wo"][h]) for h in range(nhead)], axis=0)
        q = _bf16_round(xq) @ wq + a["bq"].reshape(1, D)
        k = _bf16_round(xkv) @ wk + a["bk"].reshape(1, D)
        v = _bf16_round(xkv) @ wv + a["bv"].reshape(1, D)
        qh = q.reshape(B, Sq, nhead, Dh).transpose(0, 2, 1, 3) * scale
        kh = k.reshape(B, Sk, nhead, Dh).transpose(0, 2, 1, 3)
        vh = v.reshape(B, Sk, nhead, Dh).transpose(0, 2, 1, 3)
        s = jnp.einsum("bhqd,bhkd->bhqk", qh, kh)
        p = jax.nn.softmax(s, axis=-1)
        o = jnp.einsum("bhqk,bhkd->bhqd", p, vh)
        o = o.transpose(0, 2, 1, 3).reshape(Mq, D)
        return _bf16_round(o) @ wo + a["bo"]

    def ffn(h, lp):
        y = jnp.maximum(_bf16_round(h) @ lp["linear1_wt"].astype(jnp.float32)
                        + lp["linear1_b"], 0.0)
        return _bf16_round(y) @ lp["linear2_wt"].astype(jnp.float32) + lp["linear2_b"]

    x = x + params["pos_emb"][None, :S, :]
    x2 = x.reshape(B * S, D)

    mem = x2
    for lp in params["enc_layers"]:
        mem = ln(mem + mha(mem, mem, lp["self_attn"]), lp["norm1_w"], lp["norm1_b"])
        mem = ln(mem + ffn(mem, lp), lp["norm2_w"], lp["norm2_b"])
    mem = ln(mem, params["enc_norm_w"], params["enc_norm_b"])

    out = x2
    for lp in params["dec_layers"]:
        out = ln(out + mha(out, out, lp["self_attn"]), lp["norm1_w"], lp["norm1_b"])
        out = ln(out + mha(out, mem, lp["cross_attn"]), lp["norm2_w"], lp["norm2_b"])
        out = ln(out + ffn(out, lp), lp["norm3_w"], lp["norm3_b"])
    out = ln(out, params["dec_norm_w"], params["dec_norm_b"])
    out = _bf16_round(out) @ params["fc_wt"].astype(jnp.float32) + params["fc_b"]
    return out.reshape(B, S, D)


# ----------------------------------------------------------------------------

if __name__ == "__main__":
    B, S, D = 2, 8, 32          # batch, sequence, d_model (input_dim)
    NHEAD = 4
    NUM_ENC, NUM_DEC = 2, 2
    SEQ_LEN = S                 # position_embedding table size
    DIM_FF = 2048               # nn.Transformer default dim_feedforward

    root = jax.random.PRNGKey(0)
    kx, kp = jax.random.split(root)
    x = jax.random.normal(kx, (B, S, D), dtype=jnp.float32)
    params = init_params(kp, D, NHEAD, NUM_ENC, NUM_DEC, SEQ_LEN, DIM_FF)

    fwd = jax.jit(functools.partial(simple_transformer_forward, nhead=NHEAD))
    out = jax.block_until_ready(fwd(params, x))

    assert out.shape == (B, S, D), out.shape
    assert bool(jnp.all(jnp.isfinite(out)))

    # Numerical self-check vs a pure-jnp reference using the same parameters
    # (and the same bf16 matmul-operand casts); f32 softmax/LayerNorm.
    ref = reference_forward(params, x, NHEAD)
    err = float(jnp.max(jnp.abs(out - ref)))
    assert err < 2e-2, f"kernel/reference mismatch: max abs err = {err}"

    print("KERNEL_OK")
</pallas_src>

<mosaic_0001>
module attributes {stable_mosaic.version = 11 : i64} {
  func.func @_mha_addln_kernel(%arg0: memref<16x32xf32, #tpu.memory_space<vmem>>, %arg1: memref<16x32xf32, #tpu.memory_space<vmem>>, %arg2: memref<4x32x8xbf16, #tpu.memory_space<vmem>>, %arg3: memref<4x32x8xbf16, #tpu.memory_space<vmem>>, %arg4: memref<4x32x8xbf16, #tpu.memory_space<vmem>>, %arg5: memref<4x1x8xf32, #tpu.memory_space<vmem>>, %arg6: memref<4x1x8xf32, #tpu.memory_space<vmem>>, %arg7: memref<4x1x8xf32, #tpu.memory_space<vmem>>, %arg8: memref<4x8x32xbf16, #tpu.memory_space<vmem>>, %arg9: memref<1x32xf32, #tpu.memory_space<vmem>>, %arg10: memref<1x32xf32, #tpu.memory_space<vmem>>, %arg11: memref<1x32xf32, #tpu.memory_space<vmem>>, %arg12: memref<16x32xf32, #tpu.memory_space<vmem>>) attributes {dimension_semantics = [], scalar_prefetch = 0 : i64, scratch_operands = 0 : i64, tpu.core_type = #tpu.core_type<tc>} {
    %c0 = arith.constant 0 : index
    %c0_0 = arith.constant 0 : index
    %0 = vector.load %arg0[%c0, %c0_0] : memref<16x32xf32, #tpu.memory_space<vmem>>, vector<16x32xf32>
    %1 = arith.truncf %0 : vector<16x32xf32> to vector<16x32xbf16>
    %c0_1 = arith.constant 0 : index
    %c0_2 = arith.constant 0 : index
    %2 = vector.load %arg1[%c0_1, %c0_2] : memref<16x32xf32, #tpu.memory_space<vmem>>, vector<16x32xf32>
    %3 = arith.truncf %2 : vector<16x32xf32> to vector<16x32xbf16>
    %c0_3 = arith.constant 0 : index
    %c0_4 = arith.constant 0 : index
    %c0_5 = arith.constant 0 : index
    %4 = vector.load %arg2[%c0_3, %c0_4, %c0_5] : memref<4x32x8xbf16, #tpu.memory_space<vmem>>, vector<1x32x8xbf16>
    %5 = vector.shape_cast %4 : vector<1x32x8xbf16> to vector<32x8xbf16>
    %cst = arith.constant dense<0.000000e+00> : vector<16x8xf32>
    %6 = tpu.matmul %1, %5, %cst {dimension_numbers = #tpu.dot_dimension_numbers<[1], [0], [0], [1], [0, 0, 1, 1], [], []>} : vector<16x32xbf16>, vector<32x8xbf16>, vector<16x8xf32> -> vector<16x8xf32>
    %c0_6 = arith.constant 0 : index
    %c0_7 = arith.constant 0 : index
    %c0_8 = arith.constant 0 : index
    %7 = vector.load %arg5[%c0_6, %c0_7, %c0_8] : memref<4x1x8xf32, #tpu.memory_space<vmem>>, vector<1x1x8xf32>
    %8 = vector.shape_cast %7 : vector<1x1x8xf32> to vector<1x8xf32>
    %9 = vector.broadcast %8 : vector<1x8xf32> to vector<16x8xf32>
    %10 = arith.addf %6, %9 : vector<16x8xf32>
    %c0_9 = arith.constant 0 : index
    %c0_10 = arith.constant 0 : index
    %c0_11 = arith.constant 0 : index
    %11 = vector.load %arg3[%c0_9, %c0_10, %c0_11] : memref<4x32x8xbf16, #tpu.memory_space<vmem>>, vector<1x32x8xbf16>
    %12 = vector.shape_cast %11 : vector<1x32x8xbf16> to vector<32x8xbf16>
    %cst_12 = arith.constant dense<0.000000e+00> : vector<16x8xf32>
    %13 = tpu.matmul %3, %12, %cst_12 {dimension_numbers = #tpu.dot_dimension_numbers<[1], [0], [0], [1], [0, 0, 1, 1], [], []>} : vector<16x32xbf16>, vector<32x8xbf16>, vector<16x8xf32> -> vector<16x8xf32>
    %c0_13 = arith.constant 0 : index
    %c0_14 = arith.constant 0 : index
    %c0_15 = arith.constant 0 : index
    %14 = vector.load %arg6[%c0_13, %c0_14, %c0_15] : memref<4x1x8xf32, #tpu.memory_space<vmem>>, vector<1x1x8xf32>
    %15 = vector.shape_cast %14 : vector<1x1x8xf32> to vector<1x8xf32>
    %16 = vector.broadcast %15 : vector<1x8xf32> to vector<16x8xf32>
    %17 = arith.addf %13, %16 : vector<16x8xf32>
    %c0_16 = arith.constant 0 : index
    %c0_17 = arith.constant 0 : index
    %c0_18 = arith.constant 0 : index
    %18 = vector.load %arg4[%c0_16, %c0_17, %c0_18] : memref<4x32x8xbf16, #tpu.memory_space<vmem>>, vector<1x32x8xbf16>
    %19 = vector.shape_cast %18 : vector<1x32x8xbf16> to vector<32x8xbf16>
    %cst_19 = arith.constant dense<0.000000e+00> : vector<16x8xf32>
    %20 = tpu.matmul %3, %19, %cst_19 {dimension_numbers = #tpu.dot_dimension_numbers<[1], [0], [0], [1], [0, 0, 1, 1], [], []>} : vector<16x32xbf16>, vector<32x8xbf16>, vector<16x8xf32> -> vector<16x8xf32>
    %c0_20 = arith.constant 0 : index
    %c0_21 = arith.constant 0 : index
    %c0_22 = arith.constant 0 : index
    %21 = vector.load %arg7[%c0_20, %c0_21, %c0_22] : memref<4x1x8xf32, #tpu.memory_space<vmem>>, vector<1x1x8xf32>
    %22 = vector.shape_cast %21 : vector<1x1x8xf32> to vector<1x8xf32>
    %23 = vector.broadcast %22 : vector<1x8xf32> to vector<16x8xf32>
    %24 = arith.addf %20, %23 : vector<16x8xf32>
    %c1 = arith.constant 1 : index
    %c0_23 = arith.constant 0 : index
    %c0_24 = arith.constant 0 : index
    %25 = vector.load %arg2[%c1, %c0_23, %c0_24] : memref<4x32x8xbf16, #tpu.memory_space<vmem>>, vector<1x32x8xbf16>
    %26 = vector.shape_cast %25 : vector<1x32x8xbf16> to vector<32x8xbf16>
    %cst_25 = arith.constant dense<0.000000e+00> : vector<16x8xf32>
    %27 = tpu.matmul %1, %26, %cst_25 {dimension_numbers = #tpu.dot_dimension_numbers<[1], [0], [0], [1], [0, 0, 1, 1], [], []>} : vector<16x32xbf16>, vector<32x8xbf16>, vector<16x8xf32> -> vector<16x8xf32>
    %c1_26 = arith.constant 1 : index
    %c0_27 = arith.constant 0 : index
    %c0_28 = arith.constant 0 : index
    %28 = vector.load %arg5[%c1_26, %c0_27, %c0_28] : memref<4x1x8xf32, #tpu.memory_space<vmem>>, vector<1x1x8xf32>
    %29 = vector.shape_cast %28 : vector<1x1x8xf32> to vector<1x8xf32>
    %30 = vector.broadcast %29 : vector<1x8xf32> to vector<16x8xf32>
    %31 = arith.addf %27, %30 : vector<16x8xf32>
    %c1_29 = arith.constant 1 : index
    %c0_30 = arith.constant 0 : index
    %c0_31 = arith.constant 0 : index
    %32 = vector.load %arg3[%c1_29, %c0_30, %c0_31] : memref<4x32x8xbf16, #tpu.memory_space<vmem>>, vector<1x32x8xbf16>
    %33 = vector.shape_cast %32 : vector<1x32x8xbf16> to vector<32x8xbf16>
    %cst_32 = arith.constant dense<0.000000e+00> : vector<16x8xf32>
    %34 = tpu.matmul %3, %33, %cst_32 {dimension_numbers = #tpu.dot_dimension_numbers<[1], [0], [0], [1], [0, 0, 1, 1], [], []>} : vector<16x32xbf16>, vector<32x8xbf16>, vector<16x8xf32> -> vector<16x8xf32>
    %c1_33 = arith.constant 1 : index
    %c0_34 = arith.constant 0 : index
    %c0_35 = arith.constant 0 : index
    %35 = vector.load %arg6[%c1_33, %c0_34, %c0_35] : memref<4x1x8xf32, #tpu.memory_space<vmem>>, vector<1x1x8xf32>
    %36 = vector.shape_cast %35 : vector<1x1x8xf32> to vector<1x8xf32>
    %37 = vector.broadcast %36 : vector<1x8xf32> to vector<16x8xf32>
    %38 = arith.addf %34, %37 : vector<16x8xf32>
    %c1_36 = arith.constant 1 : index
    %c0_37 = arith.constant 0 : index
    %c0_38 = arith.constant 0 : index
    %39 = vector.load %arg4[%c1_36, %c0_37, %c0_38] : memref<4x32x8xbf16, #tpu.memory_space<vmem>>, vector<1x32x8xbf16>
    %40 = vector.shape_cast %39 : vector<1x32x8xbf16> to vector<32x8xbf16>
    %cst_39 = arith.constant dense<0.000000e+00> : vector<16x8xf32>
    %41 = tpu.matmul %3, %40, %cst_39 {dimension_numbers = #tpu.dot_dimension_numbers<[1], [0], [0], [1], [0, 0, 1, 1], [], []>} : vector<16x32xbf16>, vector<32x8xbf16>, vector<16x8xf32> -> vector<16x8xf32>
    %c1_40 = arith.constant 1 : index
    %c0_41 = arith.constant 0 : index
    %c0_42 = arith.constant 0 : index
    %42 = vector.load %arg7[%c1_40, %c0_41, %c0_42] : memref<4x1x8xf32, #tpu.memory_space<vmem>>, vector<1x1x8xf32>
    %43 = vector.shape_cast %42 : vector<1x1x8xf32> to vector<1x8xf32>
    %44 = vector.broadcast %43 : vector<1x8xf32> to vector<16x8xf32>
    %45 = arith.addf %41, %44 : vector<16x8xf32>
    %c2 = arith.constant 2 : index
    %c0_43 = arith.constant 0 : index
    %c0_44 = arith.constant 0 : index
    %46 = vector.load %arg2[%c2, %c0_43, %c0_44] : memref<4x32x8xbf16, #tpu.memory_space<vmem>>, vector<1x32x8xbf16>
    %47 = vector.shape_cast %46 : vector<1x32x8xbf16> to vector<32x8xbf16>
    %cst_45 = arith.constant dense<0.000000e+00> : vector<16x8xf32>
    %48 = tpu.matmul %1, %47, %cst_45 {dimension_numbers = #tpu.dot_dimension_numbers<[1], [0], [0], [1], [0, 0, 1, 1], [], []>} : vector<16x32xbf16>, vector<32x8xbf16>, vector<16x8xf32> -> vector<16x8xf32>
    %c2_46 = arith.constant 2 : index
    %c0_47 = arith.constant 0 : index
    %c0_48 = arith.constant 0 : index
    %49 = vector.load %arg5[%c2_46, %c0_47, %c0_48] : memref<4x1x8xf32, #tpu.memory_space<vmem>>, vector<1x1x8xf32>
    %50 = vector.shape_cast %49 : vector<1x1x8xf32> to vector<1x8xf32>
    %51 = vector.broadcast %50 : vector<1x8xf32> to vector<16x8xf32>
    %52 = arith.addf %48, %51 : vector<16x8xf32>
    %c2_49 = arith.constant 2 : index
    %c0_50 = arith.constant 0 : index
    %c0_51 = arith.constant 0 : index
    %53 = vector.load %arg3[%c2_49, %c0_50, %c0_51] : memref<4x32x8xbf16, #tpu.memory_space<vmem>>, vector<1x32x8xbf16>
    %54 = vector.shape_cast %53 : vector<1x32x8xbf16> to vector<32x8xbf16>
    %cst_52 = arith.constant dense<0.000000e+00> : vector<16x8xf32>
    %55 = tpu.matmul %3, %54, %cst_52 {dimension_numbers = #tpu.dot_dimension_numbers<[1], [0], [0], [1], [0, 0, 1, 1], [], []>} : vector<16x32xbf16>, vector<32x8xbf16>, vector<16x8xf32> -> vector<16x8xf32>
    %c2_53 = arith.constant 2 : index
    %c0_54 = arith.constant 0 : index
    %c0_55 = arith.constant 0 : index
    %56 = vector.load %arg6[%c2_53, %c0_54, %c0_55] : memref<4x1x8xf32, #tpu.memory_space<vmem>>, vector<1x1x8xf32>
    %57 = vector.shape_cast %56 : vector<1x1x8xf32> to vector<1x8xf32>
    %58 = vector.broadcast %57 : vector<1x8xf32> to vector<16x8xf32>
    %59 = arith.addf %55, %58 : vector<16x8xf32>
    %c2_56 = arith.constant 2 : index
    %c0_57 = arith.constant 0 : index
    %c0_58 = arith.constant 0 : index
    %60 = vector.load %arg4[%c2_56, %c0_57, %c0_58] : memref<4x32x8xbf16, #tpu.memory_space<vmem>>, vector<1x32x8xbf16>
    %61 = vector.shape_cast %60 : vector<1x32x8xbf16> to vector<32x8xbf16>
    %cst_59 = arith.constant dense<0.000000e+00> : vector<16x8xf32>
    %62 = tpu.matmul %3, %61, %cst_59 {dimension_numbers = #tpu.dot_dimension_numbers<[1], [0], [0], [1], [0, 0, 1, 1], [], []>} : vector<16x32xbf16>, vector<32x8xbf16>, vector<16x8xf32> -> vector<16x8xf32>
    %c2_60 = arith.constant 2 : index
    %c0_61 = arith.constant 0 : index
    %c0_62 = arith.constant 0 : index
    %63 = vector.load %arg7[%c2_60, %c0_61, %c0_62] : memref<4x1x8xf32, #tpu.memory_space<vmem>>, vector<1x1x8xf32>
    %64 = vector.shape_cast %63 : vector<1x1x8xf32> to vector<1x8xf32>
    %65 = vector.broadcast %64 : vector<1x8xf32> to vector<16x8xf32>
    %66 = arith.addf %62, %65 : vector<16x8xf32>
    %c3 = arith.constant 3 : index
    %c0_63 = arith.constant 0 : index
    %c0_64 = arith.constant 0 : index
    %67 = vector.load %arg2[%c3, %c0_63, %c0_64] : memref<4x32x8xbf16, #tpu.memory_space<vmem>>, vector<1x32x8xbf16>
    %68 = vector.shape_cast %67 : vector<1x32x8xbf16> to vector<32x8xbf16>
    %cst_65 = arith.constant dense<0.000000e+00> : vector<16x8xf32>
    %69 = tpu.matmul %1, %68, %cst_65 {dimension_numbers = #tpu.dot_dimension_numbers<[1], [0], [0], [1], [0, 0, 1, 1], [], []>} : vector<16x32xbf16>, vector<32x8xbf16>, vector<16x8xf32> -> vector<16x8xf32>
    %c3_66 = arith.constant 3 : index
    %c0_67 = arith.constant 0 : index
    %c0_68 = arith.constant 0 : index
    %70 = vector.load %arg5[%c3_66, %c0_67, %c0_68] : memref<4x1x8xf32, #tpu.memory_space<vmem>>, vector<1x1x8xf32>
    %71 = vector.shape_cast %70 : vector<1x1x8xf32> to vector<1x8xf32>
    %72 = vector.broadcast %71 : vector<1x8xf32> to vector<16x8xf32>
    %73 = arith.addf %69, %72 : vector<16x8xf32>
    %c3_69 = arith.constant 3 : index
    %c0_70 = arith.constant 0 : index
    %c0_71 = arith.constant 0 : index
    %74 = vector.load %arg3[%c3_69, %c0_70, %c0_71] : memref<4x32x8xbf16, #tpu.memory_space<vmem>>, vector<1x32x8xbf16>
    %75 = vector.shape_cast %74 : vector<1x32x8xbf16> to vector<32x8xbf16>
    %cst_72 = arith.constant dense<0.000000e+00> : vector<16x8xf32>
    %76 = tpu.matmul %3, %75, %cst_72 {dimension_numbers = #tpu.dot_dimension_numbers<[1], [0], [0], [1], [0, 0, 1, 1], [], []>} : vector<16x32xbf16>, vector<32x8xbf16>, vector<16x8xf32> -> vector<16x8xf32>
    %c3_73 = arith.constant 3 : index
    %c0_74 = arith.constant 0 : index
    %c0_75 = arith.constant 0 : index
    %77 = vector.load %arg6[%c3_73, %c0_74, %c0_75] : memref<4x1x8xf32, #tpu.memory_space<vmem>>, vector<1x1x8xf32>
    %78 = vector.shape_cast %77 : vector<1x1x8xf32> to vector<1x8xf32>
    %79 = vector.broadcast %78 : vector<1x8xf32> to vector<16x8xf32>
    %80 = arith.addf %76, %79 : vector<16x8xf32>
    %c3_76 = arith.constant 3 : index
    %c0_77 = arith.constant 0 : index
    %c0_78 = arith.constant 0 : index
    %81 = vector.load %arg4[%c3_76, %c0_77, %c0_78] : memref<4x32x8xbf16, #tpu.memory_space<vmem>>, vector<1x32x8xbf16>
    %82 = vector.shape_cast %81 : vector<1x32x8xbf16> to vector<32x8xbf16>
    %cst_79 = arith.constant dense<0.000000e+00> : vector<16x8xf32>
    %83 = tpu.matmul %3, %82, %cst_79 {dimension_numbers = #tpu.dot_dimension_numbers<[1], [0], [0], [1], [0, 0, 1, 1], [], []>} : vector<16x32xbf16>, vector<32x8xbf16>, vector<16x8xf32> -> vector<16x8xf32>
    %c3_80 = arith.constant 3 : index
    %c0_81 = arith.constant 0 : index
    %c0_82 = arith.constant 0 : index
    %84 = vector.load %arg7[%c3_80, %c0_81, %c0_82] : memref<4x1x8xf32, #tpu.memory_space<vmem>>, vector<1x1x8xf32>
    %85 = vector.shape_cast %84 : vector<1x1x8xf32> to vector<1x8xf32>
    %86 = vector.broadcast %85 : vector<1x8xf32> to vector<16x8xf32>
    %87 = arith.addf %83, %86 : vector<16x8xf32>
    %c0_83 = arith.constant 0 : index
    %c0_84 = arith.constant 0 : index
    %88 = vector.load %arg10[%c0_83, %c0_84] : memref<1x32xf32, #tpu.memory_space<vmem>>, vector<1x32xf32>
    %c0_85 = arith.constant 0 : index
    %c0_86 = arith.constant 0 : index
    %89 = vector.load %arg11[%c0_85, %c0_86] : memref<1x32xf32, #tpu.memory_space<vmem>>, vector<1x32xf32>
    %c0_87 = arith.constant 0 : index
    %c0_88 = arith.constant 0 : index
    %90 = vector.load %arg9[%c0_87, %c0_88] : memref<1x32xf32, #tpu.memory_space<vmem>>, vector<1x32xf32>
    %cst_89 = arith.constant 0.000000e+00 : f32
    %91 = vector.broadcast %cst_89 : f32 to vector<8x32xf32>
    %92 = vector.extract_strided_slice %10 {offsets = [0, 0], sizes = [8, 8], strides = [1, 1]} : vector<16x8xf32> to vector<8x8xf32>
    %cst_90 = arith.constant 0.353553385 : f32
    %93 = vector.broadcast %cst_90 : f32 to vector<8x8xf32>
    %94 = arith.mulf %92, %93 : vector<8x8xf32>
    %95 = vector.extract_strided_slice %17 {offsets = [0, 0], sizes = [8, 8], strides = [1, 1]} : vector<16x8xf32> to vector<8x8xf32>
    %96 = vector.extract_strided_slice %24 {offsets = [0, 0], sizes = [8, 8], strides = [1, 1]} : vector<16x8xf32> to vector<8x8xf32>
    %cst_91 = arith.constant dense<0.000000e+00> : vector<8x8xf32>
    %97 = tpu.matmul %94, %95, %cst_91 {dimension_numbers = #tpu.dot_dimension_numbers<[1], [1], [0], [0], [0, 0, 1, 0], [], []>} : vector<8x8xf32>, vector<8x8xf32>, vector<8x8xf32> -> vector<8x8xf32>
    %cst_92 = arith.constant dense<0xFF800000> : vector<8xf32>
    %98 = vector.multi_reduction <maximumf>, %97, %cst_92 [1] : vector<8x8xf32> to vector<8xf32>
    %99 = vector.shape_cast %98 : vector<8xf32> to vector<8x1xf32>
    %100 = vector.broadcast %99 : vector<8x1xf32> to vector<8x8xf32>
    %101 = arith.subf %97, %100 : vector<8x8xf32>
    %102 = math.exp %101 : vector<8x8xf32>
    %cst_93 = arith.constant dense<0.000000e+00> : vector<8xf32>
    %103 = vector.multi_reduction <add>, %102, %cst_93 [1] : vector<8x8xf32> to vector<8xf32>
    %104 = vector.shape_cast %103 : vector<8xf32> to vector<8x1xf32>
    %105 = vector.broadcast %104 : vector<8x1xf32> to vector<8x8xf32>
    %106 = arith.divf %102, %105 : vector<8x8xf32>
    %cst_94 = arith.constant dense<0.000000e+00> : vector<8x8xf32>
    %107 = tpu.matmul %106, %96, %cst_94 {dimension_numbers = #tpu.dot_dimension_numbers<[1], [0], [0], [1], [0, 0, 1, 1], [], []>} : vector<8x8xf32>, vector<8x8xf32>, vector<8x8xf32> -> vector<8x8xf32>
    %108 = arith.truncf %107 : vector<8x8xf32> to vector<8x8xbf16>
    %c0_95 = arith.constant 0 : index
    %c0_96 = arith.constant 0 : index
    %c0_97 = arith.constant 0 : index
    %109 = vector.load %arg8[%c0_95, %c0_96, %c0_97] : memref<4x8x32xbf16, #tpu.memory_space<vmem>>, vector<1x8x32xbf16>
    %110 = vector.shape_cast %109 : vector<1x8x32xbf16> to vector<8x32xbf16>
    %cst_98 = arith.constant dense<0.000000e+00> : vector<8x32xf32>
    %111 = tpu.matmul %108, %110, %cst_98 {dimension_numbers = #tpu.dot_dimension_numbers<[1], [0], [0], [1], [0, 0, 1, 1], [], []>} : vector<8x8xbf16>, vector<8x32xbf16>, vector<8x32xf32> -> vector<8x32xf32>
    %112 = arith.addf %91, %111 : vector<8x32xf32>
    %113 = vector.extract_strided_slice %31 {offsets = [0, 0], sizes = [8, 8], strides = [1, 1]} : vector<16x8xf32> to vector<8x8xf32>
    %cst_99 = arith.constant 0.353553385 : f32
    %114 = vector.broadcast %cst_99 : f32 to vector<8x8xf32>
    %115 = arith.mulf %113, %114 : vector<8x8xf32>
    %116 = vector.extract_strided_slice %38 {offsets = [0, 0], sizes = [8, 8], strides = [1, 1]} : vector<16x8xf32> to vector<8x8xf32>
    %117 = vector.extract_strided_slice %45 {offsets = [0, 0], sizes = [8, 8], strides = [1, 1]} : vector<16x8xf32> to vector<8x8xf32>
    %cst_100 = arith.constant dense<0.000000e+00> : vector<8x8xf32>
    %118 = tpu.matmul %115, %116, %cst_100 {dimension_numbers = #tpu.dot_dimension_numbers<[1], [1], [0], [0], [0, 0, 1, 0], [], []>} : vector<8x8xf32>, vector<8x8xf32>, vector<8x8xf32> -> vector<8x8xf32>
    %cst_101 = arith.constant dense<0xFF800000> : vector<8xf32>
    %119 = vector.multi_reduction <maximumf>, %118, %cst_101 [1] : vector<8x8xf32> to vector<8xf32>
    %120 = vector.shape_cast %119 : vector<8xf32> to vector<8x1xf32>
    %121 = vector.broadcast %120 : vector<8x1xf32> to vector<8x8xf32>
    %122 = arith.subf %118, %121 : vector<8x8xf32>
    %123 = math.exp %122 : vector<8x8xf32>
    %cst_102 = arith.constant dense<0.000000e+00> : vector<8xf32>
    %124 = vector.multi_reduction <add>, %123, %cst_102 [1] : vector<8x8xf32> to vector<8xf32>
    %125 = vector.shape_cast %124 : vector<8xf32> to vector<8x1xf32>
    %126 = vector.broadcast %125 : vector<8x1xf32> to vector<8x8xf32>
    %127 = arith.divf %123, %126 : vector<8x8xf32>
    %cst_103 = arith.constant dense<0.000000e+00> : vector<8x8xf32>
    %128 = tpu.matmul %127, %117, %cst_103 {dimension_numbers = #tpu.dot_dimension_numbers<[1], [0], [0], [1], [0, 0, 1, 1], [], []>} : vector<8x8xf32>, vector<8x8xf32>, vector<8x8xf32> -> vector<8x8xf32>
    %129 = arith.truncf %128 : vector<8x8xf32> to vector<8x8xbf16>
    %c1_104 = arith.constant 1 : index
    %c0_105 = arith.constant 0 : index
    %c0_106 = arith.constant 0 : index
    %130 = vector.load %arg8[%c1_104, %c0_105, %c0_106] : memref<4x8x32xbf16, #tpu.memory_space<vmem>>, vector<1x8x32xbf16>
    %131 = vector.shape_cast %130 : vector<1x8x32xbf16> to vector<8x32xbf16>
    %cst_107 = arith.constant dense<0.000000e+00> : vector<8x32xf32>
    %132 = tpu.matmul %129, %131, %cst_107 {dimension_numbers = #tpu.dot_dimension_numbers<[1], [0], [0], [1], [0, 0, 1, 1], [], []>} : vector<8x8xbf16>, vector<8x32xbf16>, vector<8x32xf32> -> vector<8x32xf32>
    %133 = arith.addf %112, %132 : vector<8x32xf32>
    %134 = vector.extract_strided_slice %52 {offsets = [0, 0], sizes = [8, 8], strides = [1, 1]} : vector<16x8xf32> to vector<8x8xf32>
    %cst_108 = arith.constant 0.353553385 : f32
    %135 = vector.broadcast %cst_108 : f32 to vector<8x8xf32>
    %136 = arith.mulf %134, %135 : vector<8x8xf32>
    %137 = vector.extract_strided_slice %59 {offsets = [0, 0], sizes = [8, 8], strides = [1, 1]} : vector<16x8xf32> to vector<8x8xf32>
    %138 = vector.extract_strided_slice %66 {offsets = [0, 0], sizes = [8, 8], strides = [1, 1]} : vector<16x8xf32> to vector<8x8xf32>
    %cst_109 = arith.constant dense<0.000000e+00> : vector<8x8xf32>
    %139 = tpu.matmul %136, %137, %cst_109 {dimension_numbers = #tpu.dot_dimension_numbers<[1], [1], [0], [0], [0, 0, 1, 0], [], []>} : vector<8x8xf32>, vector<8x8xf32>, vector<8x8xf32> -> vector<8x8xf32>
    %cst_110 = arith.constant dense<0xFF800000> : vector<8xf32>
    %140 = vector.multi_reduction <maximumf>, %139, %cst_110 [1] : vector<8x8xf32> to vector<8xf32>
    %141 = vector.shape_cast %140 : vector<8xf32> to vector<8x1xf32>
    %142 = vector.broadcast %141 : vector<8x1xf32> to vector<8x8xf32>
    %143 = arith.subf %139, %142 : vector<8x8xf32>
    %144 = math.exp %143 : vector<8x8xf32>
    %cst_111 = arith.constant dense<0.000000e+00> : vector<8xf32>
    %145 = vector.multi_reduction <add>, %144, %cst_111 [1] : vector<8x8xf32> to vector<8xf32>
    %146 = vector.shape_cast %145 : vector<8xf32> to vector<8x1xf32>
    %147 = vector.broadcast %146 : vector<8x1xf32> to vector<8x8xf32>
    %148 = arith.divf %144, %147 : vector<8x8xf32>
    %cst_112 = arith.constant dense<0.000000e+00> : vector<8x8xf32>
    %149 = tpu.matmul %148, %138, %cst_112 {dimension_numbers = #tpu.dot_dimension_numbers<[1], [0], [0], [1], [0, 0, 1, 1], [], []>} : vector<8x8xf32>, vector<8x8xf32>, vector<8x8xf32> -> vector<8x8xf32>
    %150 = arith.truncf %149 : vector<8x8xf32> to vector<8x8xbf16>
    %c2_113 = arith.constant 2 : index
    %c0_114 = arith.constant 0 : index
    %c0_115 = arith.constant 0 : index
    %151 = vector.load %arg8[%c2_113, %c0_114, %c0_115] : memref<4x8x32xbf16, #tpu.memory_space<vmem>>, vector<1x8x32xbf16>
    %152 = vector.shape_cast %151 : vector<1x8x32xbf16> to vector<8x32xbf16>
    %cst_116 = arith.constant dense<0.000000e+00> : vector<8x32xf32>
    %153 = tpu.matmul %150, %152, %cst_116 {dimension_numbers = #tpu.dot_dimension_numbers<[1], [0], [0], [1], [0, 0, 1, 1], [], []>} : vector<8x8xbf16>, vector<8x32xbf16>, vector<8x32xf32> -> vector<8x32xf32>
    %154 = arith.addf %133, %153 : vector<8x32xf32>
    %155 = vector.extract_strided_slice %73 {offsets = [0, 0], sizes = [8, 8], strides = [1, 1]} : vector<16x8xf32> to vector<8x8xf32>
    %cst_117 = arith.constant 0.353553385 : f32
    %156 = vector.broadcast %cst_117 : f32 to vector<8x8xf32>
    %157 = arith.mulf %155, %156 : vector<8x8xf32>
    %158 = vector.extract_strided_slice %80 {offsets = [0, 0], sizes = [8, 8], strides = [1, 1]} : vector<16x8xf32> to vector<8x8xf32>
    %159 = vector.extract_strided_slice %87 {offsets = [0, 0], sizes = [8, 8], strides = [1, 1]} : vector<16x8xf32> to vector<8x8xf32>
    %cst_118 = arith.constant dense<0.000000e+00> : vector<8x8xf32>
    %160 = tpu.matmul %157, %158, %cst_118 {dimension_numbers = #tpu.dot_dimension_numbers<[1], [1], [0], [0], [0, 0, 1, 0], [], []>} : vector<8x8xf32>, vector<8x8xf32>, vector<8x8xf32> -> vector<8x8xf32>
    %cst_119 = arith.constant dense<0xFF800000> : vector<8xf32>
    %161 = vector.multi_reduction <maximumf>, %160, %cst_119 [1] : vector<8x8xf32> to vector<8xf32>
    %162 = vector.shape_cast %161 : vector<8xf32> to vector<8x1xf32>
    %163 = vector.broadcast %162 : vector<8x1xf32> to vector<8x8xf32>
    %164 = arith.subf %160, %163 : vector<8x8xf32>
    %165 = math.exp %164 : vector<8x8xf32>
    %cst_120 = arith.constant dense<0.000000e+00> : vector<8xf32>
    %166 = vector.multi_reduction <add>, %165, %cst_120 [1] : vector<8x8xf32> to vector<8xf32>
    %167 = vector.shape_cast %166 : vector<8xf32> to vector<8x1xf32>
    %168 = vector.broadcast %167 : vector<8x1xf32> to vector<8x8xf32>
    %169 = arith.divf %165, %168 : vector<8x8xf32>
    %cst_121 = arith.constant dense<0.000000e+00> : vector<8x8xf32>
    %170 = tpu.matmul %169, %159, %cst_121 {dimension_numbers = #tpu.dot_dimension_numbers<[1], [0], [0], [1], [0, 0, 1, 1], [], []>} : vector<8x8xf32>, vector<8x8xf32>, vector<8x8xf32> -> vector<8x8xf32>
    %171 = arith.truncf %170 : vector<8x8xf32> to vector<8x8xbf16>
    %c3_122 = arith.constant 3 : index
    %c0_123 = arith.constant 0 : index
    %c0_124 = arith.constant 0 : index
    %172 = vector.load %arg8[%c3_122, %c0_123, %c0_124] : memref<4x8x32xbf16, #tpu.memory_space<vmem>>, vector<1x8x32xbf16>
    %173 = vector.shape_cast %172 : vector<1x8x32xbf16> to vector<8x32xbf16>
    %cst_125 = arith.constant dense<0.000000e+00> : vector<8x32xf32>
    %174 = tpu.matmul %171, %173, %cst_125 {dimension_numbers = #tpu.dot_dimension_numbers<[1], [0], [0], [1], [0, 0, 1, 1], [], []>} : vector<8x8xbf16>, vector<8x32xbf16>, vector<8x32xf32> -> vector<8x32xf32>
    %175 = arith.addf %154, %174 : vector<8x32xf32>
    %176 = vector.broadcast %90 : vector<1x32xf32> to vector<8x32xf32>
    %177 = arith.addf %175, %176 : vector<8x32xf32>
    %178 = vector.extract_strided_slice %0 {offsets = [0, 0], sizes = [8, 32], strides = [1, 1]} : vector<16x32xf32> to vector<8x32xf32>
    %179 = arith.addf %177, %178 : vector<8x32xf32>
    %cst_126 = arith.constant dense<0.000000e+00> : vector<8xf32>
    %180 = vector.multi_reduction <add>, %179, %cst_126 [1] : vector<8x32xf32> to vector<8xf32>
    %181 = vector.shape_cast %180 : vector<8xf32> to vector<8x1xf32>
    %cst_127 = arith.constant 3.200000e+01 : f32
    %182 = vector.broadcast %cst_127 : f32 to vector<8x1xf32>
    %183 = arith.divf %181, %182 : vector<8x1xf32>
    %184 = vector.broadcast %183 : vector<8x1xf32> to vector<8x32xf32>
    %185 = arith.subf %179, %184 : vector<8x32xf32>
    %186 = arith.mulf %185, %185 : vector<8x32xf32>
    %cst_128 = arith.constant dense<0.000000e+00> : vector<8xf32>
    %187 = vector.multi_reduction <add>, %186, %cst_128 [1] : vector<8x32xf32> to vector<8xf32>
    %188 = vector.shape_cast %187 : vector<8xf32> to vector<8x1xf32>
    %cst_129 = arith.constant 3.200000e+01 : f32
    %189 = vector.broadcast %cst_129 : f32 to vector<8x1xf32>
    %190 = arith.divf %188, %189 : vector<8x1xf32>
    %cst_130 = arith.constant 9.99999974E-6 : f32
    %191 = vector.broadcast %cst_130 : f32 to vector<8x1xf32>
    %192 = arith.addf %190, %191 : vector<8x1xf32>
    %193 = math.rsqrt %192 : vector<8x1xf32>
    %194 = vector.broadcast %193 : vector<8x1xf32> to vector<8x32xf32>
    %195 = arith.mulf %185, %194 : vector<8x32xf32>
    %196 = vector.broadcast %88 : vector<1x32xf32> to vector<8x32xf32>
    %197 = arith.mulf %195, %196 : vector<8x32xf32>
    %198 = vector.broadcast %89 : vector<1x32xf32> to vector<8x32xf32>
    %199 = arith.addf %197, %198 : vector<8x32xf32>
    %c0_131 = arith.constant 0 : index
    %c0_132 = arith.constant 0 : index
    %200 = vector.load %arg12[%c0_131, %c0_132] : memref<16x32xf32, #tpu.memory_space<vmem>>, vector<8x32xf32>
    tpu.vector_store %arg12[%c0_131, %c0_132], %199 {strides = array<i32>} : memref<16x32xf32, #tpu.memory_space<vmem>>, vector<8x32xf32>,
    %cst_133 = arith.constant 0.000000e+00 : f32
    %201 = vector.broadcast %cst_133 : f32 to vector<8x32xf32>
    %202 = vector.extract_strided_slice %10 {offsets = [8, 0], sizes = [8, 8], strides = [1, 1]} : vector<16x8xf32> to vector<8x8xf32>
    %cst_134 = arith.constant 0.353553385 : f32
    %203 = vector.broadcast %cst_134 : f32 to vector<8x8xf32>
    %204 = arith.mulf %202, %203 : vector<8x8xf32>
    %205 = vector.extract_strided_slice %17 {offsets = [8, 0], sizes = [8, 8], strides = [1, 1]} : vector<16x8xf32> to vector<8x8xf32>
    %206 = vector.extract_strided_slice %24 {offsets = [8, 0], sizes = [8, 8], strides = [1, 1]} : vector<16x8xf32> to vector<8x8xf32>
    %cst_135 = arith.constant dense<0.000000e+00> : vector<8x8xf32>
    %207 = tpu.matmul %204, %205, %cst_135 {dimension_numbers = #tpu.dot_dimension_numbers<[1], [1], [0], [0], [0, 0, 1, 0], [], []>} : vector<8x8xf32>, vector<8x8xf32>, vector<8x8xf32> -> vector<8x8xf32>
    %cst_136 = arith.constant dense<0xFF800000> : vector<8xf32>
    %208 = vector.multi_reduction <maximumf>, %207, %cst_136 [1] : vector<8x8xf32> to vector<8xf32>
    %209 = vector.shape_cast %208 : vector<8xf32> to vector<8x1xf32>
    %210 = vector.broadcast %209 : vector<8x1xf32> to vector<8x8xf32>
    %211 = arith.subf %207, %210 : vector<8x8xf32>
    %212 = math.exp %211 : vector<8x8xf32>
    %cst_137 = arith.constant dense<0.000000e+00> : vector<8xf32>
    %213 = vector.multi_reduction <add>, %212, %cst_137 [1] : vector<8x8xf32> to vector<8xf32>
    %214 = vector.shape_cast %213 : vector<8xf32> to vector<8x1xf32>
    %215 = vector.broadcast %214 : vector<8x1xf32> to vector<8x8xf32>
    %216 = arith.divf %212, %215 : vector<8x8xf32>
    %cst_138 = arith.constant dense<0.000000e+00> : vector<8x8xf32>
    %217 = tpu.matmul %216, %206, %cst_138 {dimension_numbers = #tpu.dot_dimension_numbers<[1], [0], [0], [1], [0, 0, 1, 1], [], []>} : vector<8x8xf32>, vector<8x8xf32>, vector<8x8xf32> -> vector<8x8xf32>
    %218 = arith.truncf %217 : vector<8x8xf32> to vector<8x8xbf16>
    %c0_139 = arith.constant 0 : index
    %c0_140 = arith.constant 0 : index
    %c0_141 = arith.constant 0 : index
    %219 = vector.load %arg8[%c0_139, %c0_140, %c0_141] : memref<4x8x32xbf16, #tpu.memory_space<vmem>>, vector<1x8x32xbf16>
    %220 = vector.shape_cast %219 : vector<1x8x32xbf16> to vector<8x32xbf16>
    %cst_142 = arith.constant dense<0.000000e+00> : vector<8x32xf32>
    %221 = tpu.matmul %218, %220, %cst_142 {dimension_numbers = #tpu.dot_dimension_numbers<[1], [0], [0], [1], [0, 0, 1, 1], [], []>} : vector<8x8xbf16>, vector<8x32xbf16>, vector<8x32xf32> -> vector<8x32xf32>
    %222 = arith.addf %201, %221 : vector<8x32xf32>
    %223 = vector.extract_strided_slice %31 {offsets = [8, 0], sizes = [8, 8], strides = [1, 1]} : vector<16x8xf32> to vector<8x8xf32>
    %cst_143 = arith.constant 0.353553385 : f32
    %224 = vector.broadcast %cst_143 : f32 to vector<8x8xf32>
    %225 = arith.mulf %223, %224 : vector<8x8xf32>
    %226 = vector.extract_strided_slice %38 {offsets = [8, 0], sizes = [8, 8], strides = [1, 1]} : vector<16x8xf32> to vector<8x8xf32>
    %227 = vector.extract_strided_slice %45 {offsets = [8, 0], sizes = [8, 8], strides = [1, 1]} : vector<16x8xf32> to vector<8x8xf32>
    %cst_144 = arith.constant dense<0.000000e+00> : vector<8x8xf32>
    %228 = tpu.matmul %225, %226, %cst_144 {dimension_numbers = #tpu.dot_dimension_numbers<[1], [1], [0], [0], [0, 0, 1, 0], [], []>} : vector<8x8xf32>, vector<8x8xf32>, vector<8x8xf32> -> vector<8x8xf32>
    %cst_145 = arith.constant dense<0xFF800000> : vector<8xf32>
    %229 = vector.multi_reduction <maximumf>, %228, %cst_145 [1] : vector<8x8xf32> to vector<8xf32>
    %230 = vector.shape_cast %229 : vector<8xf32> to vector<8x1xf32>
    %231 = vector.broadcast %230 : vector<8x1xf32> to vector<8x8xf32>
    %232 = arith.subf %228, %231 : vector<8x8xf32>
    %233 = math.exp %232 : vector<8x8xf32>
    %cst_146 = arith.constant dense<0.000000e+00> : vector<8xf32>
    %234 = vector.multi_reduction <add>, %233, %cst_146 [1] : vector<8x8xf32> to vector<8xf32>
    %235 = vector.shape_cast %234 : vector<8xf32> to vector<8x1xf32>
    %236 = vector.broadcast %235 : vector<8x1xf32> to vector<8x8xf32>
    %237 = arith.divf %233, %236 : vector<8x8xf32>
    %cst_147 = arith.constant dense<0.000000e+00> : vector<8x8xf32>
    %238 = tpu.matmul %237, %227, %cst_147 {dimension_numbers = #tpu.dot_dimension_numbers<[1], [0], [0], [1], [0, 0, 1, 1], [], []>} : vector<8x8xf32>, vector<8x8xf32>, vector<8x8xf32> -> vector<8x8xf32>
    %239 = arith.truncf %238 : vector<8x8xf32> to vector<8x8xbf16>
    %c1_148 = arith.constant 1 : index
    %c0_149 = arith.constant 0 : index
    %c0_150 = arith.constant 0 : index
    %240 = vector.load %arg8[%c1_148, %c0_149, %c0_150] : memref<4x8x32xbf16, #tpu.memory_space<vmem>>, vector<1x8x32xbf16>
    %241 = vector.shape_cast %240 : vector<1x8x32xbf16> to vector<8x32xbf16>
    %cst_151 = arith.constant dense<0.000000e+00> : vector<8x32xf32>
    %242 = tpu.matmul %239, %241, %cst_151 {dimension_numbers = #tpu.dot_dimension_numbers<[1], [0], [0], [1], [0, 0, 1, 1], [], []>} : vector<8x8xbf16>, vector<8x32xbf16>, vector<8x32xf32> -> vector<8x32xf32>
    %243 = arith.addf %222, %242 : vector<8x32xf32>
    %244 = vector.extract_strided_slice %52 {offsets = [8, 0], sizes = [8, 8], strides = [1, 1]} : vector<16x8xf32> to vector<8x8xf32>
    %cst_152 = arith.constant 0.353553385 : f32
    %245 = vector.broadcast %cst_152 : f32 to vector<8x8xf32>
    %246 = arith.mulf %244, %245 : vector<8x8xf32>
    %247 = vector.extract_strided_slice %59 {offsets = [8, 0], sizes = [8, 8], strides = [1, 1]} : vector<16x8xf32> to vector<8x8xf32>
    %248 = vector.extract_strided_slice %66 {offsets = [8, 0], sizes = [8, 8], strides = [1, 1]} : vector<16x8xf32> to vector<8x8xf32>
    %cst_153 = arith.constant dense<0.000000e+00> : vector<8x8xf32>
    %249 = tpu.matmul %246, %247, %cst_153 {dimension_numbers = #tpu.dot_dimension_numbers<[1], [1], [0], [0], [0, 0, 1, 0], [], []>} : vector<8x8xf32>, vector<8x8xf32>, vector<8x8xf32> -> vector<8x8xf32>
    %cst_154 = arith.constant dense<0xFF800000> : vector<8xf32>
    %250 = vector.multi_reduction <maximumf>, %249, %cst_154 [1] : vector<8x8xf32> to vector<8xf32>
    %251 = vector.shape_cast %250 : vector<8xf32> to vector<8x1xf32>
    %252 = vector.broadcast %251 : vector<8x1xf32> to vector<8x8xf32>
    %253 = arith.subf %249, %252 : vector<8x8xf32>
    %254 = math.exp %253 : vector<8x8xf32>
    %cst_155 = arith.constant dense<0.000000e+00> : vector<8xf32>
    %255 = vector.multi_reduction <add>, %254, %cst_155 [1] : vector<8x8xf32> to vector<8xf32>
    %256 = vector.shape_cast %255 : vector<8xf32> to vector<8x1xf32>
    %257 = vector.broadcast %256 : vector<8x1xf32> to vector<8x8xf32>
    %258 = arith.divf %254, %257 : vector<8x8xf32>
    %cst_156 = arith.constant dense<0.000000e+00> : vector<8x8xf32>
    %259 = tpu.matmul %258, %248, %cst_156 {dimension_numbers = #tpu.dot_dimension_numbers<[1], [0], [0], [1], [0, 0, 1, 1], [], []>} : vector<8x8xf32>, vector<8x8xf32>, vector<8x8xf32> -> vector<8x8xf32>
    %260 = arith.truncf %259 : vector<8x8xf32> to vector<8x8xbf16>
    %c2_157 = arith.constant 2 : index
    %c0_158 = arith.constant 0 : index
    %c0_159 = arith.constant 0 : index
    %261 = vector.load %arg8[%c2_157, %c0_158, %c0_159] : memref<4x8x32xbf16, #tpu.memory_space<vmem>>, vector<1x8x32xbf16>
    %262 = vector.shape_cast %261 : vector<1x8x32xbf16> to vector<8x32xbf16>
    %cst_160 = arith.constant dense<0.000000e+00> : vector<8x32xf32>
    %263 = tpu.matmul %260, %262, %cst_160 {dimension_numbers = #tpu.dot_dimension_numbers<[1], [0], [0], [1], [0, 0, 1, 1], [], []>} : vector<8x8xbf16>, vector<8x32xbf16>, vector<8x32xf32> -> vector<8x32xf32>
    %264 = arith.addf %243, %263 : vector<8x32xf32>
    %265 = vector.extract_strided_slice %73 {offsets = [8, 0], sizes = [8, 8], strides = [1, 1]} : vector<16x8xf32> to vector<8x8xf32>
    %cst_161 = arith.constant 0.353553385 : f32
    %266 = vector.broadcast %cst_161 : f32 to vector<8x8xf32>
    %267 = arith.mulf %265, %266 : vector<8x8xf32>
    %268 = vector.extract_strided_slice %80 {offsets = [8, 0], sizes = [8, 8], strides = [1, 1]} : vector<16x8xf32> to vector<8x8xf32>
    %269 = vector.extract_strided_slice %87 {offsets = [8, 0], sizes = [8, 8], strides = [1, 1]} : vector<16x8xf32> to vector<8x8xf32>
    %cst_162 = arith.constant dense<0.000000e+00> : vector<8x8xf32>
    %270 = tpu.matmul %267, %268, %cst_162 {dimension_numbers = #tpu.dot_dimension_numbers<[1], [1], [0], [0], [0, 0, 1, 0], [], []>} : vector<8x8xf32>, vector<8x8xf32>, vector<8x8xf32> -> vector<8x8xf32>
    %cst_163 = arith.constant dense<0xFF800000> : vector<8xf32>
    %271 = vector.multi_reduction <maximumf>, %270, %cst_163 [1] : vector<8x8xf32> to vector<8xf32>
    %272 = vector.shape_cast %271 : vector<8xf32> to vector<8x1xf32>
    %273 = vector.broadcast %272 : vector<8x1xf32> to vector<8x8xf32>
    %274 = arith.subf %270, %273 : vector<8x8xf32>
    %275 = math.exp %274 : vector<8x8xf32>
    %cst_164 = arith.constant dense<0.000000e+00> : vector<8xf32>
    %276 = vector.multi_reduction <add>, %275, %cst_164 [1] : vector<8x8xf32> to vector<8xf32>
    %277 = vector.shape_cast %276 : vector<8xf32> to vector<8x1xf32>
    %278 = vector.broadcast %277 : vector<8x1xf32> to vector<8x8xf32>
    %279 = arith.divf %275, %278 : vector<8x8xf32>
    %cst_165 = arith.constant dense<0.000000e+00> : vector<8x8xf32>
    %280 = tpu.matmul %279, %269, %cst_165 {dimension_numbers = #tpu.dot_dimension_numbers<[1], [0], [0], [1], [0, 0, 1, 1], [], []>} : vector<8x8xf32>, vector<8x8xf32>, vector<8x8xf32> -> vector<8x8xf32>
    %281 = arith.truncf %280 : vector<8x8xf32> to vector<8x8xbf16>
    %c3_166 = arith.constant 3 : index
    %c0_167 = arith.constant 0 : index
    %c0_168 = arith.constant 0 : index
    %282 = vector.load %arg8[%c3_166, %c0_167, %c0_168] : memref<4x8x32xbf16, #tpu.memory_space<vmem>>, vector<1x8x32xbf16>
    %283 = vector.shape_cast %282 : vector<1x8x32xbf16> to vector<8x32xbf16>
    %cst_169 = arith.constant dense<0.000000e+00> : vector<8x32xf32>
    %284 = tpu.matmul %281, %283, %cst_169 {dimension_numbers = #tpu.dot_dimension_numbers<[1], [0], [0], [1], [0, 0, 1, 1], [], []>} : vector<8x8xbf16>, vector<8x32xbf16>, vector<8x32xf32> -> vector<8x32xf32>
    %285 = arith.addf %264, %284 : vector<8x32xf32>
    %286 = vector.broadcast %90 : vector<1x32xf32> to vector<8x32xf32>
    %287 = arith.addf %285, %286 : vector<8x32xf32>
    %288 = vector.extract_strided_slice %0 {offsets = [8, 0], sizes = [8, 32], strides = [1, 1]} : vector<16x32xf32> to vector<8x32xf32>
    %289 = arith.addf %287, %288 : vector<8x32xf32>
    %cst_170 = arith.constant dense<0.000000e+00> : vector<8xf32>
    %290 = vector.multi_reduction <add>, %289, %cst_170 [1] : vector<8x32xf32> to vector<8xf32>
    %291 = vector.shape_cast %290 : vector<8xf32> to vector<8x1xf32>
    %cst_171 = arith.constant 3.200000e+01 : f32
    %292 = vector.broadcast %cst_171 : f32 to vector<8x1xf32>
    %293 = arith.divf %291, %292 : vector<8x1xf32>
    %294 = vector.broadcast %293 : vector<8x1xf32> to vector<8x32xf32>
    %295 = arith.subf %289, %294 : vector<8x32xf32>
    %296 = arith.mulf %295, %295 : vector<8x32xf32>
    %cst_172 = arith.constant dense<0.000000e+00> : vector<8xf32>
    %297 = vector.multi_reduction <add>, %296, %cst_172 [1] : vector<8x32xf32> to vector<8xf32>
    %298 = vector.shape_cast %297 : vector<8xf32> to vector<8x1xf32>
    %cst_173 = arith.constant 3.200000e+01 : f32
    %299 = vector.broadcast %cst_173 : f32 to vector<8x1xf32>
    %300 = arith.divf %298, %299 : vector<8x1xf32>
    %cst_174 = arith.constant 9.99999974E-6 : f32
    %301 = vector.broadcast %cst_174 : f32 to vector<8x1xf32>
    %302 = arith.addf %300, %301 : vector<8x1xf32>
    %303 = math.rsqrt %302 : vector<8x1xf32>
    %304 = vector.broadcast %303 : vector<8x1xf32> to vector<8x32xf32>
    %305 = arith.mulf %295, %304 : vector<8x32xf32>
    %306 = vector.broadcast %88 : vector<1x32xf32> to vector<8x32xf32>
    %307 = arith.mulf %305, %306 : vector<8x32xf32>
    %308 = vector.broadcast %89 : vector<1x32xf32> to vector<8x32xf32>
    %309 = arith.addf %307, %308 : vector<8x32xf32>
    %c8 = arith.constant 8 : index
    %c0_175 = arith.constant 0 : index
    %310 = vector.load %arg12[%c8, %c0_175] : memref<16x32xf32, #tpu.memory_space<vmem>>, vector<8x32xf32>
    tpu.vector_store %arg12[%c8, %c0_175], %309 {strides = array<i32>} : memref<16x32xf32, #tpu.memory_space<vmem>>, vector<8x32xf32>,
    return
  }
}

module attributes {stable_mosaic.version = 11 : i64} {
  func.func @_ffn_addln_kernel(%arg0: memref<16x32xf32, #tpu.memory_space<vmem>>, %arg1: memref<32x2048xbf16, #tpu.memory_space<vmem>>, %arg2: memref<1x2048xf32, #tpu.memory_space<vmem>>, %arg3: memref<2048x32xbf16, #tpu.memory_space<vmem>>, %arg4: memref<1x32xf32, #tpu.memory_space<vmem>>, %arg5: memref<1x32xf32, #tpu.memory_space<vmem>>, %arg6: memref<1x32xf32, #tpu.memory_space<vmem>>, %arg7: memref<16x32xf32, #tpu.memory_space<vmem>>) attributes {dimension_semantics = [], scalar_prefetch = 0 : i64, scratch_operands = 0 : i64, tpu.core_type = #tpu.core_type<tc>} {
    %c0 = arith.constant 0 : index
    %c0_0 = arith.constant 0 : index
    %0 = vector.load %arg0[%c0, %c0_0] : memref<16x32xf32, #tpu.memory_space<vmem>>, vector<16x32xf32>
    %1 = arith.truncf %0 : vector<16x32xf32> to vector<16x32xbf16>
    %c0_1 = arith.constant 0 : index
    %c0_2 = arith.constant 0 : index
    %2 = vector.load %arg1[%c0_1, %c0_2] : memref<32x2048xbf16, #tpu.memory_space<vmem>>, vector<32x2048xbf16>
    %cst = arith.constant dense<0.000000e+00> : vector<16x2048xf32>
    %3 = tpu.matmul %1, %2, %cst {dimension_numbers = #tpu.dot_dimension_numbers<[1], [0], [0], [1], [0, 0, 1, 1], [], []>} : vector<16x32xbf16>, vector<32x2048xbf16>, vector<16x2048xf32> -> vector<16x2048xf32>
    %c0_3 = arith.constant 0 : index
    %c0_4 = arith.constant 0 : index
    %4 = vector.load %arg2[%c0_3, %c0_4] : memref<1x2048xf32, #tpu.memory_space<vmem>>, vector<1x2048xf32>
    %5 = vector.broadcast %4 : vector<1x2048xf32> to vector<16x2048xf32>
    %6 = arith.addf %3, %5 : vector<16x2048xf32>
    %cst_5 = arith.constant 0.000000e+00 : f32
    %7 = vector.broadcast %cst_5 : f32 to vector<16x2048xf32>
    %8 = arith.maximumf %6, %7 : vector<16x2048xf32>
    %9 = arith.truncf %8 : vector<16x2048xf32> to vector<16x2048xbf16>
    %c0_6 = arith.constant 0 : index
    %c0_7 = arith.constant 0 : index
    %10 = vector.load %arg3[%c0_6, %c0_7] : memref<2048x32xbf16, #tpu.memory_space<vmem>>, vector<2048x32xbf16>
    %cst_8 = arith.constant dense<0.000000e+00> : vector<16x32xf32>
    %11 = tpu.matmul %9, %10, %cst_8 {dimension_numbers = #tpu.dot_dimension_numbers<[1], [0], [0], [1], [0, 0, 1, 1], [], []>} : vector<16x2048xbf16>, vector<2048x32xbf16>, vector<16x32xf32> -> vector<16x32xf32>
    %c0_9 = arith.constant 0 : index
    %c0_10 = arith.constant 0 : index
    %12 = vector.load %arg4[%c0_9, %c0_10] : memref<1x32xf32, #tpu.memory_space<vmem>>, vector<1x32xf32>
    %13 = vector.broadcast %12 : vector<1x32xf32> to vector<16x32xf32>
    %14 = arith.addf %11, %13 : vector<16x32xf32>
    %15 = arith.addf %14, %0 : vector<16x32xf32>
    %c0_11 = arith.constant 0 : index
    %c0_12 = arith.constant 0 : index
    %16 = vector.load %arg5[%c0_11, %c0_12] : memref<1x32xf32, #tpu.memory_space<vmem>>, vector<1x32xf32>
    %c0_13 = arith.constant 0 : index
    %c0_14 = arith.constant 0 : index
    %17 = vector.load %arg6[%c0_13, %c0_14] : memref<1x32xf32, #tpu.memory_space<vmem>>, vector<1x32xf32>
    %cst_15 = arith.constant dense<0.000000e+00> : vector<16xf32>
    %18 = vector.multi_reduction <add>, %15, %cst_15 [1] : vector<16x32xf32> to vector<16xf32>
    %19 = vector.shape_cast %18 : vector<16xf32> to vector<16x1xf32>
    %cst_16 = arith.constant 3.200000e+01 : f32
    %20 = vector.broadcast %cst_16 : f32 to vector<16x1xf32>
    %21 = arith.divf %19, %20 : vector<16x1xf32>
    %22 = vector.broadcast %21 : vector<16x1xf32> to vector<16x32xf32>
    %23 = arith.subf %15, %22 : vector<16x32xf32>
    %24 = arith.mulf %23, %23 : vector<16x32xf32>
    %cst_17 = arith.constant dense<0.000000e+00> : vector<16xf32>
    %25 = vector.multi_reduction <add>, %24, %cst_17 [1] : vector<16x32xf32> to vector<16xf32>
    %26 = vector.shape_cast %25 : vector<16xf32> to vector<16x1xf32>
    %cst_18 = arith.constant 3.200000e+01 : f32
    %27 = vector.broadcast %cst_18 : f32 to vector<16x1xf32>
    %28 = arith.divf %26, %27 : vector<16x1xf32>
    %cst_19 = arith.constant 9.99999974E-6 : f32
    %29 = vector.broadcast %cst_19 : f32 to vector<16x1xf32>
    %30 = arith.addf %28, %29 : vector<16x1xf32>
    %31 = math.rsqrt %30 : vector<16x1xf32>
    %32 = vector.broadcast %31 : vector<16x1xf32> to vector<16x32xf32>
    %33 = arith.mulf %23, %32 : vector<16x32xf32>
    %34 = vector.broadcast %16 : vector<1x32xf32> to vector<16x32xf32>
    %35 = arith.mulf %33, %34 : vector<16x32xf32>
    %36 = vector.broadcast %17 : vector<1x32xf32> to vector<16x32xf32>
    %37 = arith.addf %35, %36 : vector<16x32xf32>
    %c0_20 = arith.constant 0 : index
    %c0_21 = arith.constant 0 : index
    %38 = vector.load %arg7[%c0_20, %c0_21] : memref<16x32xf32, #tpu.memory_space<vmem>>, vector<16x32xf32>
    tpu.vector_store %arg7[%c0_20, %c0_21], %37 {strides = array<i32>} : memref<16x32xf32, #tpu.memory_space<vmem>>, vector<16x32xf32>,
    return
  }
}

module attributes {stable_mosaic.version = 11 : i64} {
  func.func @_ln_kernel(%arg0: memref<16x32xf32, #tpu.memory_space<vmem>>, %arg1: memref<1x32xf32, #tpu.memory_space<vmem>>, %arg2: memref<1x32xf32, #tpu.memory_space<vmem>>, %arg3: memref<16x32xf32, #tpu.memory_space<vmem>>) attributes {dimension_semantics = [], scalar_prefetch = 0 : i64, scratch_operands = 0 : i64, tpu.core_type = #tpu.core_type<tc>} {
    %c0 = arith.constant 0 : index
    %c0_0 = arith.constant 0 : index
    %0 = vector.load %arg0[%c0, %c0_0] : memref<16x32xf32, #tpu.memory_space<vmem>>, vector<16x32xf32>
    %c0_1 = arith.constant 0 : index
    %c0_2 = arith.constant 0 : index
    %1 = vector.load %arg1[%c0_1, %c0_2] : memref<1x32xf32, #tpu.memory_space<vmem>>, vector<1x32xf32>
    %c0_3 = arith.constant 0 : index
    %c0_4 = arith.constant 0 : index
    %2 = vector.load %arg2[%c0_3, %c0_4] : memref<1x32xf32, #tpu.memory_space<vmem>>, vector<1x32xf32>
    %cst = arith.constant dense<0.000000e+00> : vector<16xf32>
    %3 = vector.multi_reduction <add>, %0, %cst [1] : vector<16x32xf32> to vector<16xf32>
    %4 = vector.shape_cast %3 : vector<16xf32> to vector<16x1xf32>
    %cst_5 = arith.constant 3.200000e+01 : f32
    %5 = vector.broadcast %cst_5 : f32 to vector<16x1xf32>
    %6 = arith.divf %4, %5 : vector<16x1xf32>
    %7 = vector.broadcast %6 : vector<16x1xf32> to vector<16x32xf32>
    %8 = arith.subf %0, %7 : vector<16x32xf32>
    %9 = arith.mulf %8, %8 : vector<16x32xf32>
    %cst_6 = arith.constant dense<0.000000e+00> : vector<16xf32>
    %10 = vector.multi_reduction <add>, %9, %cst_6 [1] : vector<16x32xf32> to vector<16xf32>
    %11 = vector.shape_cast %10 : vector<16xf32> to vector<16x1xf32>
    %cst_7 = arith.constant 3.200000e+01 : f32
    %12 = vector.broadcast %cst_7 : f32 to vector<16x1xf32>
    %13 = arith.divf %11, %12 : vector<16x1xf32>
    %cst_8 = arith.constant 9.99999974E-6 : f32
    %14 = vector.broadcast %cst_8 : f32 to vector<16x1xf32>
    %15 = arith.addf %13, %14 : vector<16x1xf32>
    %16 = math.rsqrt %15 : vector<16x1xf32>
    %17 = vector.broadcast %16 : vector<16x1xf32> to vector<16x32xf32>
    %18 = arith.mulf %8, %17 : vector<16x32xf32>
    %19 = vector.broadcast %1 : vector<1x32xf32> to vector<16x32xf32>
    %20 = arith.mulf %18, %19 : vector<16x32xf32>
    %21 = vector.broadcast %2 : vector<1x32xf32> to vector<16x32xf32>
    %22 = arith.addf %20, %21 : vector<16x32xf32>
    %c0_9 = arith.constant 0 : index
    %c0_10 = arith.constant 0 : index
    %23 = vector.load %arg3[%c0_9, %c0_10] : memref<16x32xf32, #tpu.memory_space<vmem>>, vector<16x32xf32>
    tpu.vector_store %arg3[%c0_9, %c0_10], %22 {strides = array<i32>} : memref<16x32xf32, #tpu.memory_space<vmem>>, vector<16x32xf32>,
    return
  }
}

module attributes {stable_mosaic.version = 11 : i64} {
  func.func @_ln_fc_kernel(%arg0: memref<16x32xf32, #tpu.memory_space<vmem>>, %arg1: memref<1x32xf32, #tpu.memory_space<vmem>>, %arg2: memref<1x32xf32, #tpu.memory_space<vmem>>, %arg3: memref<32x32xbf16, #tpu.memory_space<vmem>>, %arg4: memref<1x32xf32, #tpu.memory_space<vmem>>, %arg5: memref<16x32xf32, #tpu.memory_space<vmem>>) attributes {dimension_semantics = [], scalar_prefetch = 0 : i64, scratch_operands = 0 : i64, tpu.core_type = #tpu.core_type<tc>} {
    %c0 = arith.constant 0 : index
    %c0_0 = arith.constant 0 : index
    %0 = vector.load %arg0[%c0, %c0_0] : memref<16x32xf32, #tpu.memory_space<vmem>>, vector<16x32xf32>
    %c0_1 = arith.constant 0 : index
    %c0_2 = arith.constant 0 : index
    %1 = vector.load %arg1[%c0_1, %c0_2] : memref<1x32xf32, #tpu.memory_space<vmem>>, vector<1x32xf32>
    %c0_3 = arith.constant 0 : index
    %c0_4 = arith.constant 0 : index
    %2 = vector.load %arg2[%c0_3, %c0_4] : memref<1x32xf32, #tpu.memory_space<vmem>>, vector<1x32xf32>
    %cst = arith.constant dense<0.000000e+00> : vector<16xf32>
    %3 = vector.multi_reduction <add>, %0, %cst [1] : vector<16x32xf32> to vector<16xf32>
    %4 = vector.shape_cast %3 : vector<16xf32> to vector<16x1xf32>
    %cst_5 = arith.constant 3.200000e+01 : f32
    %5 = vector.broadcast %cst_5 : f32 to vector<16x1xf32>
    %6 = arith.divf %4, %5 : vector<16x1xf32>
    %7 = vector.broadcast %6 : vector<16x1xf32> to vector<16x32xf32>
    %8 = arith.subf %0, %7 : vector<16x32xf32>
    %9 = arith.mulf %8, %8 : vector<16x32xf32>
    %cst_6 = arith.constant dense<0.000000e+00> : vector<16xf32>
    %10 = vector.multi_reduction <add>, %9, %cst_6 [1] : vector<16x32xf32> to vector<16xf32>
    %11 = vector.shape_cast %10 : vector<16xf32> to vector<16x1xf32>
    %cst_7 = arith.constant 3.200000e+01 : f32
    %12 = vector.broadcast %cst_7 : f32 to vector<16x1xf32>
    %13 = arith.divf %11, %12 : vector<16x1xf32>
    %cst_8 = arith.constant 9.99999974E-6 : f32
    %14 = vector.broadcast %cst_8 : f32 to vector<16x1xf32>
    %15 = arith.addf %13, %14 : vector<16x1xf32>
    %16 = math.rsqrt %15 : vector<16x1xf32>
    %17 = vector.broadcast %16 : vector<16x1xf32> to vector<16x32xf32>
    %18 = arith.mulf %8, %17 : vector<16x32xf32>
    %19 = vector.broadcast %1 : vector<1x32xf32> to vector<16x32xf32>
    %20 = arith.mulf %18, %19 : vector<16x32xf32>
    %21 = vector.broadcast %2 : vector<1x32xf32> to vector<16x32xf32>
    %22 = arith.addf %20, %21 : vector<16x32xf32>
    %23 = arith.truncf %22 : vector<16x32xf32> to vector<16x32xbf16>
    %c0_9 = arith.constant 0 : index
    %c0_10 = arith.constant 0 : index
    %24 = vector.load %arg3[%c0_9, %c0_10] : memref<32x32xbf16, #tpu.memory_space<vmem>>, vector<32x32xbf16>
    %cst_11 = arith.constant dense<0.000000e+00> : vector<16x32xf32>
    %25 = tpu.matmul %23, %24, %cst_11 {dimension_numbers = #tpu.dot_dimension_numbers<[1], [0], [0], [1], [0, 0, 1, 1], [], []>} : vector<16x32xbf16>, vector<32x32xbf16>, vector<16x32xf32> -> vector<16x32xf32>
    %c0_12 = arith.constant 0 : index
    %c0_13 = arith.constant 0 : index
    %26 = vector.load %arg4[%c0_12, %c0_13] : memref<1x32xf32, #tpu.memory_space<vmem>>, vector<1x32xf32>
    %27 = vector.broadcast %26 : vector<1x32xf32> to vector<16x32xf32>
    %28 = arith.addf %25, %27 : vector<16x32xf32>
    %c0_14 = arith.constant 0 : index
    %c0_15 = arith.constant 0 : index
    %29 = vector.load %arg5[%c0_14, %c0_15] : memref<16x32xf32, #tpu.memory_space<vmem>>, vector<16x32xf32>
    tpu.vector_store %arg5[%c0_14, %c0_15], %28 {strides = array<i32>} : memref<16x32xf32, #tpu.memory_space<vmem>>, vector<16x32xf32>,
    return
  }
}

</mosaic_0001>

<bundles_post_ra>
// kernel: simple_transformer_forward.16
= control target key start
LH: loop header
LB: loop body
LE: loop exit
PB: predicated region body
PF: predicated region fallthrough
CT: control target
= control target key end

     0   :  { %vm18_vm0 = vcmask 261120   ;;  %s118_s0 = inlined_call_operand.vmem [shape: f32[16,32], index: 0, kind: input, shape index: {}]   ;;  %s119_s1 = inlined_call_operand.vmem [shape: f32[1,32], index: 1, kind: input, shape index: {}]   ;;  %s120_s2 = inlined_call_operand.vmem [shape: f32[1,32], index: 2, kind: input, shape index: {}]   ;;  %s121_s3 = inlined_call_operand.vmem [shape: f32[16,32], index: 3, kind: output, shape index: {}]  }
   0x1   :  { %v14_v0 = vld [vmem:[%s118_s0] sm:$0xff]  ;;  %v15_v1 = vld [vmem:[%s118_s0 + $0x8] sm:$0xff] }
   0x2   :  { %v19_v2 = vsel %vm18_vm0, %v14_v0, 0.0  ;;  %v22_v3 = vsel %vm18_vm0, %v15_v1, 0.0  ;;  %v68_v21 = vld [vmem:[%s119_s1] ss:$0 sm:$0xff] }
   0x3   :  { %20 = vadd.xlane.f32.xlu0 %v19_v2  ;;  %v69_v23 = vld [vmem:[%s120_s2] ss:$0 sm:$0xff] }
   0x7   :  { %23 = vadd.xlane.f32.xlu0 %v22_v3 }
  0x90   :  { %v21_v4 = vpop.xlane.xlu0 %20 }
  0x91   :  { %v26_v5 = vmul.f32 0.03125, %v21_v4 }
  0x93   :  { %v28_v6 = vsub.f32 %v14_v0, %v26_v5 }
  0x94   :  { %v24_v7 = vpop.xlane.xlu0 %23 }
  0x95   :  { %v27_v8 = vmul.f32 0.03125, %v24_v7  ;;  %v30_v9 = vmul.f32 %v28_v6, %v28_v6 }
  0x97   :  { %v29_v10 = vsub.f32 %v15_v1, %v27_v8  ;;  %v32_v11 = vsel %vm18_vm0, %v30_v9, 0.0 }
  0x98   :  { %33 = vadd.xlane.f32.xlu1 %v32_v11 }
  0x99   :  { %v31_v12 = vmul.f32 %v29_v10, %v29_v10 }
  0x9b   :  { %v35_v13 = vsel %vm18_vm0, %v31_v12, 0.0 }
  0x9c   :  { %36 = vadd.xlane.f32.xlu1 %v35_v13 }
 0x125   :  { %v34_v14 = vpop.xlane.xlu1 %33 }
 0x126   :  { %v38_v15 = vmul.f32 0.03125, %v34_v14 }
 0x128   :  { %v40_v16 = vadd.f32 1e-05, %v38_v15 }
 0x129   :  { %v37_v17 = vpop.xlane.xlu1 %36 }
 0x12a   :  { %70 = vrsqrt.f32 %v40_v16  ;;  %v39_v18 = vmul.f32 0.03125, %v37_v17 }
 0x12c   :  { %v41_v19 = vadd.f32 1e-05, %v39_v18 }
 0x12e   :  { %72 = vrsqrt.f32 %v41_v19 }
 0x134   :  { %v71_v20 = vpop.eup %70 }
 0x135   :  { %v44_v22 = vmul.f32 %v71_v20, %v28_v6 }
 0x137   :  { %v52_v24 = vmul.f32 %v68_v21, %v44_v22 }
 0x138   :  { %v73_v25 = vpop.eup %72 }
 0x139   :  { %v60_v26 = vadd.f32 %v69_v23, %v52_v24  ;;  %v45_v27 = vmul.f32 %v73_v25, %v29_v10 }
 0x13b   :  { %62 = vst.msk [vmem:[%s121_s3] sm:$0xff] %vm18_vm0, %v60_v26  ;;  %v53_v28 = vmul.f32 %v68_v21, %v45_v27 }
 0x13d   :  { %v61_v29 = vadd.f32 %v69_v23, %v53_v28 }
 0x13f   :  { %63 = vst.msk [vmem:[%s121_s3 + $0x8] sm:$0xff] %vm18_vm0, %v61_v29 }

// kernel: simple_transformer_forward.23
= control target key start
LH: loop header
LB: loop body
LE: loop exit
PB: predicated region body
PF: predicated region fallthrough
CT: control target
= control target key end

     0   :  { %vm26_vm0 = vcmask 261120   ;;  %s283_s0 = inlined_call_operand.vmem [shape: f32[16,32], index: 0, kind: input, shape index: {}]   ;;  %s284_s1 = inlined_call_operand.vmem [shape: f32[1,32], index: 1, kind: input, shape index: {}]   ;;  %s285_s2 = inlined_call_operand.vmem [shape: f32[1,32], index: 2, kind: input, shape index: {}]   ;;  %s286_s3 = inlined_call_operand.vmem [shape: bf16[32,32], index: 3, kind: input, shape index: {}]   ;;  %s287_s4 = inlined_call_operand.vmem [shape: f32[1,32], index: 4, kind: input, shape index: {}]   ;;  %s288_s5 = inlined_call_operand.hbm [shape: f32[16,32], index: 5, kind: output, shape index: {}]  }
   0x1   :  { %v22_v0 = vld [vmem:[%s283_s0] sm:$0xff]  ;;  %v23_v1 = vld [vmem:[%s283_s0 + $0x8] sm:$0xff] }
   0x2   :  { %v27_v2 = vsel %vm26_vm0, %v22_v0, 0.0 }
   0x3   :  { %28 = vadd.xlane.f32.xlu0 %v27_v2 }
   0x4   :  { %10 = vsyncpa [#allocation3], 0  ;;  %v30_v3 = vsel %vm26_vm0, %v23_v1, 0.0  ;;  %v178_v14 = vld [vmem:[%s286_s3] sm:$0xff]   ;;  %v208_v15 = vmov 0.0   ;;  %v179_v16 = vld [vmem:[%s286_s3 + $0x8] sm:$0xff]  }
   0x5   :  { %165 = vmatprep.subr.bf16.mxu0 %v208_v15  ;;  %vm209_vm1 = vmmov 0   ;;  %v156_v25 = vld [vmem:[%s284_s1] ss:$0 sm:$0xff]  ;;  %s210_s30 = smov [#allocation2]  }
   0x6   :  { %166 = vmatpush3.bf16.msra.mxu0 %v178_v14  ;;  %169 = vmatprep.mubr.msk.bf16.mxu0 %vm209_vm1, %v208_v15  ;;  %v157_v29 = vld [vmem:[%s285_s2] ss:$0 sm:$0xff]  ;;  %s145_s6 = sshll.u32 %s210_s30, 4  ;;  %s146_s6 = int_to_ptr.vmem [resolvable:$true] %s145_s6 }
   0x7   :  { %31 = vadd.xlane.f32.xlu0 %v30_v3  ;;  %167 = vmatprep.subr.bf16.mxu0 %v208_v15  ;;  %v158_v34 = vld [vmem:[%s287_s4] ss:$0 sm:$0xff]  ;;  %s184_s1 = scalar_lea.vmem %s146_s6, 256  ;;  %p189_p1 = scmp.lt.s32.totalorder %s146_s6, %s146_s6 }
   0x8   :  { %p185_p0 = scmp.ne.s32.totalorder %s146_s6, %s184_s1  ;;  %p190_p2 = scmp.lt.s32.totalorder %s184_s1, %s184_s1 }
   0xa   :  { %168 = vmatpush3.bf16.msra.mxu0 %v179_v16  ;;  %p191_p3 = por %p190_p2, %p189_p1 }
   0xc   :  { %p192_p4 = pnand %p191_p3, %p185_p0 }
  0x90   :  { %v29_v4 = vpop.xlane.xlu0 %28 }
  0x91   :  { %v34_v5 = vmul.f32 0.03125, %v29_v4 }
  0x93   :  { %v36_v6 = vsub.f32 %v22_v0, %v34_v5 }
  0x94   :  { %v32_v7 = vpop.xlane.xlu0 %31 }
  0x95   :  { %v35_v8 = vmul.f32 0.03125, %v32_v7  ;;  %v38_v9 = vmul.f32 %v36_v6, %v36_v6 }
  0x97   :  { %v37_v10 = vsub.f32 %v23_v1, %v35_v8  ;;  %v40_v11 = vsel %vm26_vm0, %v38_v9, 0.0 }
  0x98   :  { %41 = vadd.xlane.f32.xlu1 %v40_v11 }
  0x99   :  { %v39_v12 = vmul.f32 %v37_v10, %v37_v10 }
  0x9b   :  { %v43_v13 = vsel %vm26_vm0, %v39_v12, 0.0 }
  0x9c   :  { %44 = vadd.xlane.f32.xlu1 %v43_v13 }
 0x125   :  { %v42_v17 = vpop.xlane.xlu1 %41 }
 0x126   :  { %v46_v18 = vmul.f32 0.03125, %v42_v17 }
 0x128   :  { %v48_v19 = vadd.f32 1e-05, %v46_v18 }
 0x129   :  { %v45_v20 = vpop.xlane.xlu1 %44 }
 0x12a   :  { %180 = vrsqrt.f32 %v48_v19  ;;  %v47_v21 = vmul.f32 0.03125, %v45_v20 }
 0x12c   :  { %v49_v22 = vadd.f32 1e-05, %v47_v21 }
 0x12e   :  { %182 = vrsqrt.f32 %v49_v22 }
 0x134   :  { %v181_v23 = vpop.eup %180 }
 0x135   :  { %v52_v24 = vmul.f32 %v181_v23, %v36_v6 }
 0x137   :  { %v60_v28 = vmul.f32 %v156_v25, %v52_v24 }
 0x138   :  { %v183_v26 = vpop.eup %182 }
 0x139   :  { %v53_v27 = vmul.f32 %v183_v26, %v37_v10  ;;  %v68_v31 = vadd.f32 %v157_v29, %v60_v28 }
 0x13b   :  { %v61_v30 = vmul.f32 %v156_v25, %v53_v27 }
 0x13d   :  { %v69_v32 = vadd.f32 %v157_v29, %v61_v30 }
 0x13f   :  { %v70_v33 = vpack.c.bf16 %v69_v32, %v68_v31 }
 0x141   :  { %170 = vmatmul.mubr.msk.bf16.vlgmr.msra.gmra.mrb[0].mxu0 %vm26_vm0, %v70_v33 }
 0x214   :  { %v131_v35 = vpop.f32.mrb[0].mxu0 }
 0x215   :  { %v132_v36 = vadd.f32 %v158_v34, %v131_v35  ;;  %v171_v37 = vpop.f32.mrb[1].mxu0 }
 0x216   :  { %v134_v38 = vpop.f32.mrb[2].mxu0 }
 0x217   :  { %138 = vst.msk [vmem:[#allocation2] sm:$0xff] %vm26_vm0, %v132_v36  ;;  %v135_v39 = vadd.f32 %v158_v34, %v134_v38  ;;  %v172_v40 = vpop.f32.mrb[3].mxu0 }
 0x219   :  { %139 = vst.msk [vmem:[#allocation2 + $0x8] sm:$0xff] %vm26_vm0, %v135_v39 }
 0x21a   :  { %195 = shalt.err (!%p192_p4)
}
 0x21b   :  { %s196_s7 = scalar_lea.hbm %s288_s5, 256 }
 0x21c   :  { %p197_p5 = scmp.ne.s32.totalorder %s288_s5, %s196_s7  ;;  %p200_p6 = scmp.lt.u32.totalorder %s196_s7, %s288_s5 }
 0x21e   :  { %p202_p7 = pnand %p200_p6, %p197_p5 }
 0x220   :  { %205 = shalt.err (!%p202_p7)
}
 0x221   :  { %s211_s12 = smov 128   ;;  %s212_s13 = smov 8  }
 0x222   :  { %151 = dma.vmem_to_hbm [thread:$0]  %s146_s6, 256, %s288_s5, [#allocation3], %s211_s12, %s211_s12, %s212_s13  }
 0x223   :  { %206 = dma.done.wait [#allocation3], 256  }
 0x224   :  { %207 = vsyncadd [#allocation3], 4294967040 }
 0x225   :  { %155 = vsyncpa [#allocation3], 1 }

// kernel: simple_transformer_forward.12
= control target key start
LH: loop header
LB: loop body
LE: loop exit
PB: predicated region body
PF: predicated region fallthrough
CT: control target
= control target key end

     0   :  { %v3089_v0 = vmov 0.0   ;;  %vm3090_vm0 = vmmov 0   ;;  %vm71_vm1 = vcmask 261120   ;;  %vm845_vm2 = vcmask 64512   ;;  %s3605_s2 = inlined_call_operand.vmem [shape: bf16[4,32,8], index: 2, kind: input, shape index: {}]   ;;  %s3606_s3 = inlined_call_operand.vmem [shape: bf16[4,32,8], index: 3, kind: input, shape index: {}]   ;;  %s3607_s0 = inlined_call_operand.vmem [shape: f32[16,32], index: 0, kind: input, shape index: {}, may-alias: {0,1}]   ;;  %s3608_s1 = inlined_call_operand.vmem [shape: f32[16,32], index: 1, kind: input, shape index: {}, may-alias: {0,1}]   ;;  %s3609_s4 = inlined_call_operand.vmem [shape: bf16[4,32,8], index: 4, kind: input, shape index: {}]   ;;  %s3610_s5 = inlined_call_operand.vmem [shape: f32[4,1,8], index: 5, kind: input, shape index: {}]   ;;  %s3611_s6 = inlined_call_operand.vmem [shape: f32[4,1,8], index: 6, kind: input, shape index: {}]   ;;  %s3612_s7 = inlined_call_operand.vmem [shape: f32[4,1,8], index: 7, kind: input, shape index: {}]   ;;  %s3613_s8 = inlined_call_operand.vmem [shape: bf16[4,8,32], index: 8, kind: input, shape index: {}]   ;;  %s3614_s9 = inlined_call_operand.vmem [shape: f32[1,32], index: 9, kind: input, shape index: {}]   ;;  %s3615_s10 = inlined_call_operand.vmem [shape: f32[1,32], index: 10, kind: input, shape index: {}]   ;;  %s3616_s11 = inlined_call_operand.vmem [shape: f32[1,32], index: 11, kind: input, shape index: {}]   ;;  %s3617_s12 = inlined_call_operand.vmem [shape: f32[16,32], index: 12, kind: output, shape index: {}]  }
   0x1   :  { %2802 = vmatprep.subr.bf16.mxu0 %v3089_v0  ;;  %2810 = vmatprep.subr.bf16.mxu1 %v3089_v0  ;;  %v3028_v1 = vld [vmem:[%s3605_s2] sm:$0xff]   ;;  %v3030_v3 = vld [vmem:[%s3605_s2 + $0x8] sm:$0xff]   ;;  %v3035_v12 = vld [vmem:[%s3605_s2 + $0x10] sm:$0xff]   ;;  %vm1175_vm3 = vcmask 1043456  }
   0x2   :  { %v3029_v2 = vld [vmem:[%s3606_s3] sm:$0xff]   ;;  %2806 = vmatprep.mubr.msk.bf16.mxu0 %vm3090_vm0, %v3089_v0  ;;  %2814 = vmatprep.mubr.msk.bf16.mxu1 %vm3090_vm0, %v3089_v0  ;;  %v3031_v4 = vld [vmem:[%s3606_s3 + $0x8] sm:$0xff]   ;;  %v3037_v14 = vld [vmem:[%s3605_s2 + $0x18] sm:$0xff]  }
   0x3   :  { %2803 = vmatpush3.bf16.msra.mxu0 %v3028_v1  ;;  %2811 = vmatpush3.bf16.msra.mxu1 %v3029_v2  ;;  %v3179_v5 = vld [vmem:[%s3607_s0] sm:$0xff]  ;;  %v43_v6 = vld [vmem:[%s3607_s0 + $0x8] sm:$0xff]  ;;  %v3034_v15 = vld [vmem:[%s3606_s3 + $0x10] sm:$0xff]  }
   0x4   :  { %2804 = vmatprep.subr.bf16.mxu0 %v3089_v0  ;;  %2812 = vmatprep.subr.bf16.mxu1 %v3089_v0  ;;  %v45_v7 = vld [vmem:[%s3608_s1] sm:$0xff]  ;;  %v3188_v8 = vpack.c.bf16 %v43_v6, %v3179_v5  ;;  %v46_v9 = vld [vmem:[%s3608_s1 + $0x8] sm:$0xff]  ;;  %v3038_v16 = vld [vmem:[%s3609_s4 + $0x10] sm:$0xff]  }
   0x5   :  { %v3193_v10 = vpack.c.bf16 %v46_v9, %v45_v7  ;;  %v3032_v11 = vld [vmem:[%s3609_s4] sm:$0xff]   ;;  %v3033_v13 = vld [vmem:[%s3609_s4 + $0x8] sm:$0xff]   ;;  %v3036_v17 = vld [vmem:[%s3606_s3 + $0x18] sm:$0xff]  }
   0x6   :  { %v3039_v18 = vld [vmem:[%s3609_s4 + $0x18] sm:$0xff]   ;;  %v3044_v19 = vld [vmem:[%s3605_s2 + $0x20] sm:$0xff]   ;;  %v3046_v21 = vld [vmem:[%s3605_s2 + $0x28] sm:$0xff]  }
   0x7   :  { %2805 = vmatpush3.bf16.msra.mxu0 %v3030_v3  ;;  %2813 = vmatpush3.bf16.msra.mxu1 %v3031_v4  ;;  %v3040_v20 = vld [vmem:[%s3606_s3 + $0x20] sm:$0xff]   ;;  %v3041_v22 = vld [vmem:[%s3606_s3 + $0x28] sm:$0xff]   ;;  %v3042_v24 = vld [vmem:[%s3605_s2 + $0x30] sm:$0xff]  }
   0x8   :  { %2818 = vmatprep.subr.bf16.mxu0 %v3089_v0  ;;  %2826 = vmatprep.subr.bf16.mxu1 %v3089_v0  ;;  %v3048_v23 = vld [vmem:[%s3609_s4 + $0x20] sm:$0xff]   ;;  %v3043_v25 = vld [vmem:[%s3605_s2 + $0x38] sm:$0xff]   ;;  %v3045_v26 = vld [vmem:[%s3609_s4 + $0x30] sm:$0xff]  }
   0x9   :  { %v3047_v27 = vld [vmem:[%s3609_s4 + $0x38] sm:$0xff]   ;;  %v3049_v28 = vld [vmem:[%s3609_s4 + $0x28] sm:$0xff]   ;;  %v3050_v29 = vld [vmem:[%s3606_s3 + $0x30] sm:$0xff]  }
   0xa   :  { %2807 = vmatmul.mubr.msk.bf16.vlgmr.msra.gmra.mrb[0].mxu0 %vm71_vm1, %v3188_v8  ;;  %2815 = vmatmul.mubr.msk.bf16.vlgmr.msra.gmra.mrb[0].mxu1 %vm71_vm1, %v3193_v10  ;;  %v3051_v30 = vld [vmem:[%s3606_s3 + $0x38] sm:$0xff]   ;;  %v2584_v31 = vld [vmem:[%s3610_s5] ss:$0 sm:$0xff]  ;;  %v2601_v51 = vld [vmem:[%s3610_s5 + $0x1] ss:$0 sm:$0xff] }
   0xb   :  { %2819 = vmatpush3.bf16.msra.mxu0 %v3032_v11  ;;  %2822 = vmatprep.mubr.msk.bf16.mxu0 %vm3090_vm0, %v3089_v0  ;;  %v2588_v32 = vld [vmem:[%s3611_s6] ss:$0 sm:$0xff]  ;;  %v2610_v59 = vld [vmem:[%s3611_s6 + $0x1] ss:$0 sm:$0xff] }
   0xc   :  { %2820 = vmatprep.subr.bf16.mxu0 %v3089_v0  ;;  %2827 = vmatpush3.bf16.msra.mxu1 %v3035_v12  ;;  %v2592_v46 = vld [vmem:[%s3612_s7] ss:$0 sm:$0xff]  ;;  %v2619_v62 = vld [vmem:[%s3612_s7 + $0x1] ss:$0 sm:$0xff] }
   0xd   :  { %2830 = vmatprep.mubr.msk.bf16.mxu1 %vm3090_vm0, %v3089_v0  ;;  %2828 = vmatprep.subr.bf16.mxu1 %v3089_v0 }
   0xf   :  { %2821 = vmatpush3.bf16.msra.mxu0 %v3033_v13  ;;  %v3371_v13 = vld [vmem:[%s3610_s5 + $0x2] ss:$0 sm:$0xff] }
  0x10   :  { %2834 = vmatprep.subr.bf16.mxu0 %v3089_v0  ;;  %2829 = vmatpush3.bf16.msra.mxu1 %v3037_v14 }
  0x11   :  { %2842 = vmatprep.subr.bf16.mxu1 %v3089_v0 }
  0x12   :  { %2823 = vmatmul.mubr.msk.bf16.vlgmr.msra.gmra.mrb[4].mxu0 %vm71_vm1, %v3193_v10 }
  0x13   :  { %2835 = vmatpush3.bf16.msra.mxu0 %v3034_v15  ;;  %2838 = vmatprep.mubr.msk.bf16.mxu0 %vm3090_vm0, %v3089_v0 }
  0x14   :  { %2836 = vmatprep.subr.bf16.mxu0 %v3089_v0  ;;  %2831 = vmatmul.mubr.msk.bf16.vlgmr.msra.gmra.mrb[4].mxu1 %vm71_vm1, %v3188_v8 }
  0x15   :  { %2843 = vmatpush3.bf16.msra.mxu1 %v3038_v16  ;;  %2846 = vmatprep.mubr.msk.bf16.mxu1 %vm3090_vm0, %v3089_v0  ;;  %v3378_v16 = vld [vmem:[%s3611_s6 + $0x2] ss:$0 sm:$0xff] }
  0x16   :  { %2844 = vmatprep.subr.bf16.mxu1 %v3089_v0 }
  0x17   :  { %2837 = vmatpush3.bf16.msra.mxu0 %v3036_v17 }
  0x18   :  { %2850 = vmatprep.subr.bf16.mxu0 %v3089_v0 }
  0x19   :  { %2845 = vmatpush3.bf16.msra.mxu1 %v3039_v18 }
  0x1a   :  { %2839 = vmatmul.mubr.msk.bf16.vlgmr.msra.gmra.mrb[8].mxu0 %vm71_vm1, %v3193_v10  ;;  %2858 = vmatprep.subr.bf16.mxu1 %v3089_v0 }
  0x1b   :  { %2851 = vmatpush3.bf16.msra.mxu0 %v3044_v19  ;;  %2854 = vmatprep.mubr.msk.bf16.mxu0 %vm3090_vm0, %v3089_v0 }
  0x1c   :  { %2847 = vmatmul.mubr.msk.bf16.vlgmr.msra.gmra.mrb[8].mxu1 %vm71_vm1, %v3193_v10  ;;  %2852 = vmatprep.subr.bf16.mxu0 %v3089_v0 }
  0x1d   :  { %2859 = vmatpush3.bf16.msra.mxu1 %v3040_v20  ;;  %2862 = vmatprep.mubr.msk.bf16.mxu1 %vm3090_vm0, %v3089_v0 }
  0x1e   :  { %2860 = vmatprep.subr.bf16.mxu1 %v3089_v0 }
  0x1f   :  { %2853 = vmatpush3.bf16.msra.mxu0 %v3046_v21 }
  0x20   :  { %2866 = vmatprep.subr.bf16.mxu0 %v3089_v0 }
  0x21   :  { %2861 = vmatpush3.bf16.msra.mxu1 %v3041_v22 }
  0x22   :  { %2874 = vmatprep.subr.bf16.mxu1 %v3089_v0  ;;  %2855 = vmatmul.mubr.msk.bf16.vlgmr.msra.gmra.mrb[12].mxu0 %vm71_vm1, %v3188_v8 }
  0x23   :  { %2867 = vmatpush3.bf16.msra.mxu0 %v3048_v23  ;;  %2870 = vmatprep.mubr.msk.bf16.mxu0 %vm3090_vm0, %v3089_v0 }
  0x24   :  { %2863 = vmatmul.mubr.msk.bf16.vlgmr.msra.gmra.mrb[12].mxu1 %vm71_vm1, %v3193_v10  ;;  %2868 = vmatprep.subr.bf16.mxu0 %v3089_v0 }
  0x25   :  { %2875 = vmatpush3.bf16.msra.mxu1 %v3042_v24  ;;  %2878 = vmatprep.mubr.msk.bf16.mxu1 %vm3090_vm0, %v3089_v0 }
  0x26   :  { %2876 = vmatprep.subr.bf16.mxu1 %v3089_v0 }
  0x27   :  { %2869 = vmatpush3.bf16.msra.mxu0 %v3049_v28 }
  0x28   :  { %2882 = vmatprep.subr.bf16.mxu0 %v3089_v0 }
  0x29   :  { %2877 = vmatpush3.bf16.msra.mxu1 %v3043_v25  ;;  %v3391_v25 = vld [vmem:[%s3610_s5 + $0x3] ss:$0 sm:$0xff] }
  0x2a   :  { %2890 = vmatprep.subr.bf16.mxu1 %v3089_v0  ;;  %2871 = vmatmul.mubr.msk.bf16.vlgmr.msra.gmra.mrb[16].mxu0 %vm71_vm1, %v3193_v10 }
  0x2b   :  { %2883 = vmatpush3.bf16.msra.mxu0 %v3050_v29  ;;  %2886 = vmatprep.mubr.msk.bf16.mxu0 %vm3090_vm0, %v3089_v0 }
  0x2c   :  { %2879 = vmatmul.mubr.msk.bf16.vlgmr.msra.gmra.mrb[16].mxu1 %vm71_vm1, %v3188_v8  ;;  %2884 = vmatprep.subr.bf16.mxu0 %v3089_v0 }
  0x2d   :  { %2891 = vmatpush3.bf16.msra.mxu1 %v3045_v26  ;;  %2894 = vmatprep.mubr.msk.bf16.mxu1 %vm3090_vm0, %v3089_v0 }
  0x2e   :  { %2892 = vmatprep.subr.bf16.mxu1 %v3089_v0 }
  0x2f   :  { %2885 = vmatpush3.bf16.msra.mxu0 %v3051_v30 }
  0x30   :  { %2908 = vmatprep.subr.mxu0 %v3089_v0 }
  0x31   :  { %2893 = vmatpush3.bf16.msra.mxu1 %v3047_v27 }
  0x32   :  { %2898 = vmatprep.subr.mxu1 %v3089_v0  ;;  %2887 = vmatmul.mubr.msk.bf16.vlgmr.msra.gmra.mrb[20].mxu0 %vm71_vm1, %v3193_v10 }
  0x33   :  { %2910 = vmatprep.mubr.msk.f32.mxu0 %vm3090_vm0, %v3089_v0 }
  0x34   :  { %2895 = vmatmul.mubr.msk.bf16.vlgmr.msra.gmra.mrb[20].mxu1 %vm71_vm1, %v3193_v10 }
  0x35   :  { %2900 = vmatprep.mubr.msk.f32.mxu1 %vm3090_vm0, %v3089_v0 }
  0xdd   :  { %v109_v33 = vpop.f32.mrb[0].mxu0  ;;  %v176_v35 = vpop.f32.mrb[0].mxu1 }
  0xde   :  { %v110_v34 = vadd.f32 %v2584_v31, %v109_v33  ;;  %v2808_v36 = vpop.f32.mrb[1].mxu0  ;;  %v177_v37 = vadd.f32 %v2588_v32, %v176_v35  ;;  %v2816_v39 = vpop.f32.mrb[1].mxu1 }
  0xdf   :  { %v112_v38 = vpop.f32.mrb[2].mxu0  ;;  %v179_v43 = vpop.f32.mrb[2].mxu1 }
  0xe0   :  { %v844_v40 = vmul.f32 0.35355338, %v110_v34  ;;  %v3331_v41 = vadd.f32 %v2584_v31, %v112_v38  ;;  %v2809_v42 = vpop.f32.mrb[3].mxu0  ;;  %2899 = vmatpush3.xpose.msk.msra.mxu1 %vm845_vm2, %v177_v37  ;;  %v3334_v44 = vadd.f32 %v2588_v32, %v179_v43  ;;  %v2817_v45 = vpop.f32.mrb[3].mxu1  ;;  %v2673_v31 = vld [vmem:[%s3612_s7 + $0x3] ss:$0 sm:$0xff] }
  0xe1   :  { %2903 = vmatprep.subr.mxu1 %v3089_v0  ;;  %v2646_v38 = vld [vmem:[%s3612_s7 + $0x2] ss:$0 sm:$0xff] }
  0xe3   :  { %2901 = vmatmul.mubr.msk.f32.vlgmr.msra.gmra.mrb[24].mxu1 %vm845_vm2, %v844_v40 }
  0xe4   :  { %2905 = vmatprep.mubr.msk.f32.mxu1 %vm3090_vm0, %v3089_v0 }
  0xe5   :  { %v240_v47 = vpop.f32.mrb[4].mxu0 }
  0xe6   :  { %v241_v48 = vadd.f32 %v2592_v46, %v240_v47  ;;  %v2824_v49 = vpop.f32.mrb[5].mxu0  ;;  %v3413_v47 = vld [vmem:[%s3611_s6 + $0x3] ss:$0 sm:$0xff] }
  0xe7   :  { %v243_v50 = vpop.f32.mrb[6].mxu0  ;;  %v306_v52 = vpop.f32.mrb[4].mxu1 }
  0xe8   :  { %v3346_v53 = vadd.f32 %v2592_v46, %v243_v50  ;;  %v2825_v54 = vpop.f32.mrb[7].mxu0  ;;  %2904 = vmatpush3.msra.mxu1 %v241_v48  ;;  %v2832_v55 = vpop.f32.mrb[5].mxu1  ;;  %v307_v60 = vadd.f32 %v2601_v51, %v306_v52 }
  0xe9   :  { %v309_v56 = vpop.f32.mrb[6].mxu1  ;;  %2913 = vmatprep.subr.mxu1 %v3089_v0 }
  0xea   :  { %v3349_v57 = vadd.f32 %v2601_v51, %v309_v56  ;;  %v2833_v58 = vpop.f32.mrb[7].mxu1  ;;  %v1008_v2 = vmul.f32 0.35355338, %v307_v60 }
  0xed   :  { %v372_v61 = vpop.f32.mrb[8].mxu0 }
  0xee   :  { %v373_v63 = vadd.f32 %v2610_v59, %v372_v61  ;;  %v2840_v1 = vpop.f32.mrb[9].mxu0 }
  0xef   :  { %v375_v3 = vpop.f32.mrb[10].mxu0  ;;  %v438_v4 = vpop.f32.mrb[8].mxu1 }
  0xf0   :  { %v3357_v6 = vadd.f32 %v2610_v59, %v375_v3  ;;  %v2841_v7 = vpop.f32.mrb[11].mxu0  ;;  %2909 = vmatpush3.xpose.msk.msra.mxu0 %vm845_vm2, %v373_v63  ;;  %v3360_v8 = vadd.f32 %v2619_v62, %v438_v4  ;;  %v2848_v9 = vpop.f32.mrb[9].mxu1 }
  0xf1   :  { %v441_v10 = vpop.f32.mrb[10].mxu1  ;;  %2918 = vmatprep.subr.bf16.mxu0 %v3089_v0 }
  0xf2   :  { %v3363_v11 = vadd.f32 %v2619_v62, %v441_v10  ;;  %v2849_v12 = vpop.f32.mrb[11].mxu1 }
  0xf3   :  { %2911 = vmatmul.mubr.msk.f32.vlgmr.msra.gmra.mrb[24].mxu0 %vm845_vm2, %v1008_v2 }
  0xf4   :  { %2920 = vmatprep.mubr.msk.bf16.mxu0 %vm3090_vm0, %v3089_v0 }
  0xf5   :  { %v3373_v14 = vpop.f32.mrb[12].mxu0 }
  0xf6   :  { %v2856_v15 = vpop.f32.mrb[13].mxu0 }
  0xf7   :  { %v3380_v17 = vpop.f32.mrb[12].mxu1  ;;  %v507_v18 = vpop.f32.mrb[14].mxu0 }
  0xf8   :  { %v2864_v19 = vpop.f32.mrb[13].mxu1  ;;  %v3383_v20 = vadd.f32 %v3371_v13, %v507_v18  ;;  %v2857_v21 = vpop.f32.mrb[15].mxu0 }
  0xf9   :  { %v573_v22 = vpop.f32.mrb[14].mxu1  ;;  %v1007_v21 = vld [vmem:[%s3613_s8] sm:$0xf] }
  0xfa   :  { %v3386_v23 = vadd.f32 %v3378_v16, %v573_v22  ;;  %v2865_v24 = vpop.f32.mrb[15].mxu1 }
  0xfd   :  { %v636_v39 = vpop.f32.mrb[16].mxu0 }
  0xfe   :  { %v637_v40 = vadd.f32 %v2646_v38, %v636_v39  ;;  %v2872_v42 = vpop.f32.mrb[17].mxu0  ;;  %v505_v39 = vadd.f32 %v3371_v13, %v3373_v14 }
  0xff   :  { %v3393_v26 = vpop.f32.mrb[16].mxu1  ;;  %v639_v43 = vpop.f32.mrb[18].mxu0 }
 0x100   :  { %v2880_v27 = vpop.f32.mrb[17].mxu1  ;;  %v3408_v45 = vadd.f32 %v2646_v38, %v639_v43  ;;  %v2873_v46 = vpop.f32.mrb[19].mxu0  ;;  %v571_v38 = vadd.f32 %v3378_v16, %v3380_v17 }
 0x101   :  { %v705_v28 = vpop.f32.mrb[18].mxu1  ;;  %v1223_v27 = vsel %vm1175_vm3, %v1007_v21, 0 }
 0x102   :  { %v3396_v29 = vadd.f32 %v3391_v25, %v705_v28  ;;  %v2881_v30 = vpop.f32.mrb[19].mxu1 }
 0x105   :  { %v3415_v48 = vpop.f32.mrb[20].mxu0 }
 0x106   :  { %v2888_v49 = vpop.f32.mrb[21].mxu0 }
 0x107   :  { %v834_v32 = vpop.f32.mrb[20].mxu1  ;;  %v771_v50 = vpop.f32.mrb[22].mxu0 }
 0x108   :  { %v3401_v33 = vadd.f32 %v2673_v31, %v834_v32  ;;  %v2896_v34 = vpop.f32.mrb[21].mxu1  ;;  %v3418_v51 = vadd.f32 %v3413_v47, %v771_v50  ;;  %v2889_v52 = vpop.f32.mrb[23].mxu0 }
 0x109   :  { %v837_v35 = vpop.f32.mrb[22].mxu1 }
 0x10a   :  { %v3403_v36 = vadd.f32 %v2673_v31, %v837_v35  ;;  %v2897_v37 = vpop.f32.mrb[23].mxu1 }
 0x1b6   :  { %v918_v54 = vpop.f32.mrb[24].mxu1 }
 0x1b7   :  { %v2902_v55 = vpop.f32.mrb[25].mxu1  ;;  %v922_v56 = vsel %vm845_vm2, %v918_v54, -inf }
 0x1b8   :  { %923 = vmax.xlane.f32.xlu0 %v922_v56 }
 0x1c6   :  { %v1081_v58 = vpop.f32.mrb[24].mxu0 }
 0x1c7   :  { %v1085_v59 = vsel %vm845_vm2, %v1081_v58, -inf  ;;  %v2912_v60 = vpop.f32.mrb[25].mxu0 }
 0x1c8   :  { %1086 = vmax.xlane.f32.xlu0 %v1085_v59 }
 0x245   :  { %v924_v61 = vpop.xlane.xlu0 %923 }
 0x246   :  { %v925_v62 = vsub.f32 %v918_v54, %v924_v61 }
 0x248   :  { %v926_v63 = vmul.f32 1.442695, %v925_v62 }
 0x24a   :  { %3052 = vpow2.f32 %v926_v63 }
 0x254   :  { %v3053_v1 = vpop.eup %3052 }
 0x255   :  { %v1087_v2 = vpop.xlane.xlu0 %1086  ;;  %v928_v4 = vsel %vm845_vm2, %v3053_v1, 0.0 }
 0x256   :  { %v1088_v3 = vsub.f32 %v1081_v58, %v1087_v2  ;;  %929 = vadd.xlane.f32.xlu1 %v928_v4 }
 0x258   :  { %v1089_v7 = vmul.f32 1.442695, %v1088_v3  ;;  %v769_v3 = vadd.f32 %v3413_v47, %v3415_v48 }
 0x25a   :  { %3054 = vpow2.f32 %v1089_v7 }
 0x264   :  { %v3055_v9 = vpop.eup %3054 }
 0x265   :  { %v1091_v10 = vsel %vm845_vm2, %v3055_v9, 0.0 }
 0x266   :  { %1092 = vadd.xlane.f32.xlu1 %v1091_v10 }
 0x2e3   :  { %v930_v12 = vpop.xlane.xlu1 %929 }
 0x2e4   :  { %3056 = vrcp.f32 %v930_v12 }
 0x2ee   :  { %v3057_v15 = vpop.eup %3056 }
 0x2ef   :  { %v932_v18 = vmul.f32 %v3057_v15, %v3053_v1  ;;  %v703_v1 = vadd.f32 %v3391_v25, %v3393_v26  ;;  %v2689_v25 = vld [vmem:[%s3613_s8 + $0x8] sm:$0xf] }
 0x2f0   :  { %v1433_v26 = vsel %vm1175_vm3, %v2689_v25, 0 }
 0x2f1   :  { %2906 = vmatmul.mubr.msk.f32.vlgmr.msra.gmra.mrb[26].mxu1 %vm845_vm2, %v932_v18  ;;  %v1476_v4 = vmul.f32 0.35355338, %v703_v1 }
 0x2f2   :  { %2914 = vmatpush3.msra.mxu1 %v3360_v8  ;;  %2915 = vmatprep.mubr.msk.f32.mxu1 %vm3090_vm0, %v3089_v0  ;;  %v2683_v8 = vld [vmem:[%s3613_s8 + $0x4] sm:$0xf] }
 0x2f3   :  { %v1093_v19 = vpop.xlane.xlu1 %1092  ;;  %2924 = vmatprep.subr.bf16.mxu1 %v3089_v0  ;;  %v1177_v28 = vsel %vm1175_vm3, %v2683_v8, 0 }
 0x2f4   :  { %3058 = vrcp.f32 %v1093_v19  ;;  %2919 = vmatpush3.bf16.msra.mxu0 %v1177_v28 }
 0x2f5   :  { %2930 = vmatprep.subr.mxu0 %v3089_v0 }
 0x2fe   :  { %v3059_v22 = vpop.eup %3058 }
 0x2ff   :  { %v1095_v24 = vmul.f32 %v3059_v22, %v3055_v9  ;;  %v2694_v22 = vld [vmem:[%s3613_s8 + $0xc] sm:$0xf] }
 0x301   :  { %2916 = vmatmul.mubr.msk.f32.vlgmr.msra.gmra.mrb[28].mxu1 %vm845_vm2, %v1095_v24  ;;  %v1644_v24 = vsel %vm1175_vm3, %v2694_v22, 0 }
 0x302   :  { %2925 = vmatpush3.bf16.msra.mxu1 %v1223_v27  ;;  %2926 = vmatprep.mubr.msk.bf16.mxu1 %vm3090_vm0, %v3089_v0 }
 0x303   :  { %2935 = vmatprep.subr.mxu1 %v3089_v0 }
 0x3c4   :  { %v1002_v30 = vpop.f32.mrb[26].mxu1 }
 0x3c5   :  { %v1006_v31 = vpack.c.bf16 %v1002_v30, %v1002_v30  ;;  %v2907_v32 = vpop.f32.mrb[27].mxu1 }
 0x3c7   :  { %2927 = vmatmul.mubr.msk.bf16.vlgmr.msra.gmra.mrb[32].mxu1 %vm845_vm2, %v1006_v31 }
 0x3c8   :  { %2936 = vmatpush3.msra.mxu1 %v637_v40  ;;  %2937 = vmatprep.mubr.msk.f32.mxu1 %vm3090_vm0, %v3089_v0  ;;  %v1265_v40 = vmul.f32 0.35355338, %v505_v39 }
 0x3c9   :  { %2946 = vmatprep.subr.mxu1 %v3089_v0 }
 0x3d4   :  { %v1165_v34 = vpop.f32.mrb[28].mxu1 }
 0x3d5   :  { %v1169_v35 = vpack.c.bf16 %v1165_v34, %v1165_v34  ;;  %v2917_v37 = vpop.f32.mrb[29].mxu1 }
 0x3d6   :  { %v1724_v37 = vmul.f32 0.35355338, %v3331_v41 }
 0x3d7   :  { %2921 = vmatmul.mubr.msk.bf16.vlgmr.msra.gmra.mrb[28].mxu0 %vm845_vm2, %v1169_v35 }
 0x3d8   :  { %2931 = vmatpush3.xpose.msk.msra.mxu0 %vm845_vm2, %v571_v38  ;;  %2932 = vmatprep.mubr.msk.f32.mxu0 %vm3090_vm0, %v3089_v0 }
 0x3d9   :  { %2940 = vmatprep.subr.bf16.mxu0 %v3089_v0 }
 0x3df   :  { %2933 = vmatmul.mubr.msk.f32.vlgmr.msra.gmra.mrb[26].mxu0 %vm845_vm2, %v1265_v40 }
 0x3e0   :  { %2942 = vmatprep.mubr.msk.bf16.mxu0 %vm3090_vm0, %v3089_v0  ;;  %2941 = vmatpush3.bf16.msra.mxu0 %v1433_v26  ;;  %v1886_v26 = vld [vmem:[%s3613_s8] sm:$0xf] }
 0x3e1   :  { %2956 = vmatprep.subr.bf16.mxu0 %v3089_v0 }
 0x49a   :  { %v1259_v42 = vpop.f32.mrb[32].mxu1 }
 0x49b   :  { %v2928_v16 = vpop.f32.mrb[33].mxu1 }
 0x49c   :  { %v1262_v17 = vpop.f32.mrb[34].mxu1 }
 0x49d   :  { %v2929_v43 = vpop.f32.mrb[35].mxu1 }
 0x4aa   :  { %v1213_v46 = vpop.f32.mrb[28].mxu0 }
 0x4ab   :  { %v1260_v49 = vadd.f32 %v1259_v42, %v1213_v46  ;;  %v2922_v50 = vpop.f32.mrb[29].mxu0  ;;  %v1887_v42 = vmul.f32 0.35355338, %v3349_v57 }
 0x4ac   :  { %v1216_v52 = vpop.f32.mrb[30].mxu0 }
 0x4ad   :  { %v2923_v54 = vpop.f32.mrb[31].mxu0 }
 0x4b2   :  { %v1338_v55 = vpop.f32.mrb[26].mxu0 }
 0x4b3   :  { %v2934_v56 = vpop.f32.mrb[27].mxu0  ;;  %v1342_v13 = vsel %vm845_vm2, %v1338_v55, -inf }
 0x4b4   :  { %1343 = vmax.xlane.f32.xlu0 %v1342_v13 }
 0x541   :  { %v1344_v14 = vpop.xlane.xlu0 %1343 }
 0x542   :  { %v1345_v58 = vsub.f32 %v1338_v55, %v1344_v14 }
 0x544   :  { %v1346_v59 = vmul.f32 1.442695, %v1345_v58 }
 0x546   :  { %3060 = vpow2.f32 %v1346_v59 }
 0x550   :  { %v3061_v60 = vpop.eup %3060 }
 0x551   :  { %v1348_v61 = vsel %vm845_vm2, %v3061_v60, 0.0 }
 0x552   :  { %1349 = vadd.xlane.f32.xlu1 %v1348_v61 }
 0x5df   :  { %v1350_v62 = vpop.xlane.xlu1 %1349 }
 0x5e0   :  { %3062 = vrcp.f32 %v1350_v62 }
 0x5ea   :  { %v3063_v63 = vpop.eup %3062 }
 0x5eb   :  { %v1352_v2 = vmul.f32 %v3063_v63, %v3061_v60 }
 0x5ed   :  { %2938 = vmatmul.mubr.msk.f32.vlgmr.msra.gmra.mrb[30].mxu1 %vm845_vm2, %v1352_v2  ;;  %v2705_v2 = vld [vmem:[%s3613_s8 + $0x4] sm:$0xf] }
 0x5ee   :  { %2947 = vmatpush3.xpose.msk.msra.mxu1 %vm845_vm2, %v769_v3  ;;  %2948 = vmatprep.mubr.msk.f32.mxu1 %vm3090_vm0, %v3089_v0  ;;  %v2054_v3 = vsel %vm1175_vm3, %v2705_v2, 0 }
 0x5ef   :  { %2951 = vmatprep.subr.mxu1 %v3089_v0 }
 0x5f1   :  { %2949 = vmatmul.mubr.msk.f32.vlgmr.msra.gmra.mrb[36].mxu1 %vm845_vm2, %v1476_v4 }
 0x5f2   :  { %2952 = vmatpush3.msra.mxu1 %v3401_v33  ;;  %2953 = vmatprep.mubr.msk.f32.mxu1 %vm3090_vm0, %v3089_v0 }
 0x5f3   :  { %2962 = vmatprep.subr.mxu1 %v3089_v0 }
 0x6c0   :  { %v1422_v47 = vpop.f32.mrb[30].mxu1 }
 0x6c1   :  { %v1426_v48 = vpack.c.bf16 %v1422_v47, %v1422_v47  ;;  %v2939_v7 = vpop.f32.mrb[31].mxu1 }
 0x6c2   :  { %v2100_v7 = vsel %vm1175_vm3, %v1886_v26, 0 }
 0x6c3   :  { %2943 = vmatmul.mubr.msk.bf16.vlgmr.msra.gmra.mrb[32].mxu0 %vm845_vm2, %v1426_v48 }
 0x6c4   :  { %v1549_v33 = vpop.f32.mrb[36].mxu1  ;;  %2958 = vmatprep.mubr.msk.bf16.mxu0 %vm3090_vm0, %v3089_v0  ;;  %2957 = vmatpush3.bf16.msra.mxu0 %v1644_v24 }
 0x6c5   :  { %v2950_v9 = vpop.f32.mrb[37].mxu1  ;;  %v1553_v10 = vsel %vm845_vm2, %v1549_v33, -inf  ;;  %2972 = vmatprep.subr.mxu0 %v3089_v0 }
 0x6c6   :  { %1554 = vmax.xlane.f32.xlu0 %v1553_v10 }
 0x753   :  { %v1555_v12 = vpop.xlane.xlu0 %1554 }
 0x754   :  { %v1556_v15 = vsub.f32 %v1549_v33, %v1555_v12 }
 0x756   :  { %v1557_v18 = vmul.f32 1.442695, %v1556_v15 }
 0x758   :  { %3064 = vpow2.f32 %v1557_v18 }
 0x762   :  { %v3065_v19 = vpop.eup %3064 }
 0x763   :  { %v1559_v21 = vsel %vm845_vm2, %v3065_v19, 0.0 }
 0x764   :  { %1560 = vadd.xlane.f32.xlu1 %v1559_v21  ;;  %v2142_v21 = vmul.f32 0.35355338, %v3383_v20 }
 0x796   :  { %v1469_v27 = vpop.f32.mrb[32].mxu0 }
 0x797   :  { %v1475_v8 = vadd.f32 %v1469_v27, %v1260_v49  ;;  %v2944_v28 = vpop.f32.mrb[33].mxu0 }
 0x798   :  { %v1472_v30 = vpop.f32.mrb[34].mxu0 }
 0x799   :  { %v2945_v31 = vpop.f32.mrb[35].mxu0 }
 0x7f1   :  { %v1561_v32 = vpop.xlane.xlu1 %1560 }
 0x7f2   :  { %3066 = vrcp.f32 %v1561_v32 }
 0x7fc   :  { %v3067_v34 = vpop.eup %3066 }
 0x7fd   :  { %v1563_v35 = vmul.f32 %v3067_v34, %v3065_v19 }
 0x7ff   :  { %2954 = vmatmul.mubr.msk.f32.vlgmr.msra.gmra.mrb[38].mxu1 %vm845_vm2, %v1563_v35 }
 0x800   :  { %2963 = vmatpush3.xpose.msk.msra.mxu1 %vm845_vm2, %v3334_v44  ;;  %2964 = vmatprep.mubr.msk.f32.mxu1 %vm3090_vm0, %v3089_v0 }
 0x801   :  { %2967 = vmatprep.subr.mxu1 %v3089_v0 }
 0x803   :  { %2965 = vmatmul.mubr.msk.f32.vlgmr.msra.gmra.mrb[40].mxu1 %vm845_vm2, %v1724_v37 }
 0x804   :  { %2968 = vmatpush3.msra.mxu1 %v3346_v53  ;;  %2969 = vmatprep.mubr.msk.f32.mxu1 %vm3090_vm0, %v3089_v0 }
 0x805   :  { %2977 = vmatprep.subr.mxu1 %v3089_v0 }
 0x8d2   :  { %v1633_v38 = vpop.f32.mrb[38].mxu1 }
 0x8d3   :  { %v1637_v39 = vpack.c.bf16 %v1633_v38, %v1633_v38  ;;  %v2955_v40 = vpop.f32.mrb[39].mxu1 }
 0x8d5   :  { %2959 = vmatmul.mubr.msk.bf16.vlgmr.msra.gmra.mrb[36].mxu0 %vm845_vm2, %v1637_v39 }
 0x8d6   :  { %2973 = vmatpush3.xpose.msk.msra.mxu0 %vm845_vm2, %v3357_v6  ;;  %v1797_v41 = vpop.f32.mrb[40].mxu1  ;;  %2974 = vmatprep.mubr.msk.f32.mxu0 %vm3090_vm0, %v3089_v0 }
 0x8d7   :  { %v2966_v44 = vpop.f32.mrb[41].mxu1  ;;  %v1801_v53 = vsel %vm845_vm2, %v1797_v41, -inf  ;;  %2982 = vmatprep.subr.bf16.mxu0 %v3089_v0 }
 0x8d8   :  { %1802 = vmax.xlane.f32.xlu0 %v1801_v53  ;;  %v2711_v44 = vld [vmem:[%s3613_s8 + $0x8] sm:$0xf] }
 0x8dd   :  { %2975 = vmatmul.mubr.msk.f32.vlgmr.msra.gmra.mrb[40].mxu0 %vm845_vm2, %v1887_v42 }
 0x8de   :  { %2984 = vmatprep.mubr.msk.bf16.mxu0 %vm3090_vm0, %v3089_v0  ;;  %2983 = vmatpush3.bf16.msra.mxu0 %v2054_v3 }
 0x8df   :  { %2994 = vmatprep.subr.mxu0 %v3089_v0 }
 0x965   :  { %v1803_v16 = vpop.xlane.xlu0 %1802 }
 0x966   :  { %v1804_v17 = vsub.f32 %v1797_v41, %v1803_v16  ;;  %v2352_v41 = vmul.f32 0.35355338, %v3396_v29  ;;  %v2696_v29 = vld [vmem:[%s3614_s9] ss:$0 sm:$0xff] }
 0x968   :  { %v1805_v6 = vmul.f32 1.442695, %v1804_v17 }
 0x96a   :  { %3068 = vpow2.f32 %v1805_v6 }
 0x974   :  { %v3069_v43 = vpop.eup %3068 }
 0x975   :  { %v1807_v46 = vsel %vm845_vm2, %v3069_v43, 0.0 }
 0x976   :  { %1808 = vadd.xlane.f32.xlu0 %v1807_v46 }
 0x9a8   :  { %v1680_v49 = vpop.f32.mrb[36].mxu0 }
 0x9a9   :  { %v3513_v50 = vadd.f32 %v1680_v49, %v1475_v8  ;;  %v2960_v52 = vpop.f32.mrb[37].mxu0 }
 0x9aa   :  { %v1683_v54 = vpop.f32.mrb[38].mxu0 }
 0x9ab   :  { %v2961_v55 = vpop.f32.mrb[39].mxu0  ;;  %v1693_v42 = vadd.f32 %v2696_v29, %v3513_v50 }
 0x9ad   :  { %v1694_v46 = vadd.f32 %v1693_v42, %v3179_v5 }
 0x9af   :  { %v1695_v49 = vsel %vm71_vm1, %v1694_v46, 0.0 }
 0x9b0   :  { %v1960_v57 = vpop.f32.mrb[40].mxu0 }
 0x9b1   :  { %v2976_v56 = vpop.f32.mrb[41].mxu0  ;;  %v1964_v13 = vsel %vm845_vm2, %v1960_v57, -inf }
 0x9b2   :  { %1965 = vmax.xlane.f32.xlu1 %v1964_v13 }
 0xa03   :  { %v1809_v14 = vpop.xlane.xlu0 %1808 }
 0xa04   :  { %3070 = vrcp.f32 %v1809_v14 }
 0xa0e   :  { %v3071_v58 = vpop.eup %3070 }
 0xa0f   :  { %v1811_v59 = vmul.f32 %v3071_v58, %v3069_v43 }
 0xa11   :  { %2970 = vmatmul.mubr.msk.f32.vlgmr.msra.gmra.mrb[42].mxu1 %vm845_vm2, %v1811_v59 }
 0xa12   :  { %2978 = vmatpush3.msra.mxu1 %v3363_v11  ;;  %2979 = vmatprep.mubr.msk.f32.mxu1 %vm3090_vm0, %v3089_v0 }
 0xa13   :  { %2988 = vmatprep.subr.bf16.mxu1 %v3089_v0 }
 0xa3f   :  { %v1966_v60 = vpop.xlane.xlu1 %1965 }
 0xa40   :  { %v1967_v61 = vsub.f32 %v1960_v57, %v1966_v60 }
 0xa42   :  { %v1968_v62 = vmul.f32 1.442695, %v1967_v61 }
 0xa44   :  { %3072 = vpow2.f32 %v1968_v62 }
 0xa4e   :  { %v3073_v63 = vpop.eup %3072 }
 0xa4f   :  { %v1970_v1 = vsel %vm845_vm2, %v3073_v63, 0.0 }
 0xa50   :  { %1971 = vadd.xlane.f32.xlu1 %v1970_v1 }
 0xadd   :  { %v1972_v11 = vpop.xlane.xlu1 %1971 }
 0xade   :  { %3074 = vrcp.f32 %v1972_v11 }
 0xae4   :  { %v1881_v4 = vpop.f32.mrb[42].mxu1 }
 0xae5   :  { %v2971_v25 = vpop.f32.mrb[43].mxu1  ;;  %v1885_v33 = vpack.c.bf16 %v1881_v4, %v1881_v4  ;;  %v2697_v4 = vld [vmem:[%s3615_s10] ss:$0 sm:$0xff] }
 0xae8   :  { %v3075_v47 = vpop.eup %3074 }
 0xae9   :  { %v1974_v48 = vmul.f32 %v3075_v47, %v3073_v63  ;;  %v2698_v47 = vld [vmem:[%s3616_s11] ss:$0 sm:$0xff] }
 0xaeb   :  { %2980 = vmatmul.mubr.msk.f32.vlgmr.msra.gmra.mrb[44].mxu1 %vm845_vm2, %v1974_v48 }
 0xaec   :  { %2989 = vmatpush3.bf16.msra.mxu1 %v2100_v7  ;;  %2990 = vmatprep.mubr.msk.bf16.mxu1 %vm3090_vm0, %v3089_v0 }
 0xaed   :  { %2999 = vmatprep.subr.mxu1 %v3089_v0 }
 0xaef   :  { %2991 = vmatmul.mubr.msk.bf16.vlgmr.msra.gmra.mrb[48].mxu1 %vm845_vm2, %v1885_v33 }
 0xaf0   :  { %3000 = vmatpush3.msra.mxu1 %v3408_v45  ;;  %3001 = vmatprep.mubr.msk.f32.mxu1 %vm3090_vm0, %v3089_v0 }
 0xaf1   :  { %3010 = vmatprep.subr.mxu1 %v3089_v0 }
 0xbbe   :  { %v2044_v9 = vpop.f32.mrb[44].mxu1 }
 0xbbf   :  { %v2048_v10 = vpack.c.bf16 %v2044_v9, %v2044_v9  ;;  %v2981_v12 = vpop.f32.mrb[45].mxu1  ;;  %v2716_v9 = vld [vmem:[%s3613_s8 + $0xc] sm:$0xf] }
 0xbc1   :  { %2985 = vmatmul.mubr.msk.bf16.vlgmr.msra.gmra.mrb[44].mxu0 %vm845_vm2, %v2048_v10  ;;  %v2519_v10 = vsel %vm1175_vm3, %v2716_v9, 0 }
 0xbc2   :  { %2995 = vmatpush3.xpose.msk.msra.mxu0 %vm845_vm2, %v3386_v23  ;;  %v2136_v15 = vpop.f32.mrb[48].mxu1  ;;  %2996 = vmatprep.mubr.msk.f32.mxu0 %vm3090_vm0, %v3089_v0 }
 0xbc3   :  { %v2992_v18 = vpop.f32.mrb[49].mxu1  ;;  %3004 = vmatprep.subr.bf16.mxu0 %v3089_v0 }
 0xbc4   :  { %v2139_v45 = vpop.f32.mrb[50].mxu1 }
 0xbc5   :  { %v2993_v19 = vpop.f32.mrb[51].mxu1 }
 0xbc9   :  { %2997 = vmatmul.mubr.msk.f32.vlgmr.msra.gmra.mrb[42].mxu0 %vm845_vm2, %v2142_v21 }
 0xbca   :  { %3006 = vmatprep.mubr.msk.bf16.mxu0 %vm3090_vm0, %v3089_v0 }
 0xc94   :  { %v2090_v22 = vpop.f32.mrb[44].mxu0 }
 0xc95   :  { %v2137_v24 = vadd.f32 %v2136_v15, %v2090_v22  ;;  %v2986_v27 = vpop.f32.mrb[45].mxu0 }
 0xc96   :  { %v2093_v23 = vpop.f32.mrb[46].mxu0 }
 0xc97   :  { %v2987_v8 = vpop.f32.mrb[47].mxu0  ;;  %v3088_v23 = vld [vmem:[%s3607_s0 + $0x8] sm:$0xff] }
 0xc9c   :  { %v2215_v28 = vpop.f32.mrb[42].mxu0 }
 0xc9d   :  { %v2998_v30 = vpop.f32.mrb[43].mxu0  ;;  %v2219_v31 = vsel %vm845_vm2, %v2215_v28, -inf }
 0xc9e   :  { %2220 = vmax.xlane.f32.xlu0 %v2219_v31 }
 0xd2b   :  { %v2221_v32 = vpop.xlane.xlu0 %2220 }
 0xd2c   :  { %v2222_v34 = vsub.f32 %v2215_v28, %v2221_v32 }
 0xd2e   :  { %v2223_v35 = vmul.f32 1.442695, %v2222_v34 }
 0xd30   :  { %3076 = vpow2.f32 %v2223_v35 }
 0xd3a   :  { %v3077_v20 = vpop.eup %3076 }
 0xd3b   :  { %v2225_v37 = vsel %vm845_vm2, %v3077_v20, 0.0 }
 0xd3c   :  { %2226 = vadd.xlane.f32.xlu1 %v2225_v37 }
 0xdc9   :  { %v2227_v38 = vpop.xlane.xlu1 %2226 }
 0xdca   :  { %3078 = vrcp.f32 %v2227_v38 }
 0xdd4   :  { %v3079_v39 = vpop.eup %3078 }
 0xdd5   :  { %v2229_v40 = vmul.f32 %v3079_v39, %v3077_v20 }
 0xdd7   :  { %3002 = vmatmul.mubr.msk.f32.vlgmr.msra.gmra.mrb[46].mxu1 %vm845_vm2, %v2229_v40 }
 0xdd8   :  { %3011 = vmatpush3.xpose.msk.msra.mxu1 %vm845_vm2, %v3418_v51  ;;  %3012 = vmatprep.mubr.msk.f32.mxu1 %vm3090_vm0, %v3089_v0  ;;  %v2309_v51 = vsel %vm1175_vm3, %v2711_v44, 0 }
 0xdd9   :  { %3015 = vmatprep.subr.mxu1 %v3089_v0  ;;  %3005 = vmatpush3.bf16.msra.mxu0 %v2309_v51 }
 0xdda   :  { %3020 = vmatprep.subr.bf16.mxu0 %v3089_v0 }
 0xddb   :  { %3013 = vmatmul.mubr.msk.f32.vlgmr.msra.gmra.mrb[52].mxu1 %vm845_vm2, %v2352_v41 }
 0xddc   :  { %3016 = vmatpush3.msra.mxu1 %v3403_v36  ;;  %3017 = vmatprep.mubr.msk.f32.mxu1 %vm3090_vm0, %v3089_v0 }
 0xeaa   :  { %v2299_v53 = vpop.f32.mrb[46].mxu1 }
 0xeab   :  { %v2303_v36 = vpack.c.bf16 %v2299_v53, %v2299_v53  ;;  %v3003_v16 = vpop.f32.mrb[47].mxu1 }
 0xead   :  { %3007 = vmatmul.mubr.msk.bf16.vlgmr.msra.gmra.mrb[48].mxu0 %vm845_vm2, %v2303_v36 }
 0xeae   :  { %v2425_v17 = vpop.f32.mrb[52].mxu1  ;;  %3022 = vmatprep.mubr.msk.bf16.mxu0 %vm3090_vm0, %v3089_v0  ;;  %3021 = vmatpush3.bf16.msra.mxu0 %v2519_v10 }
 0xeaf   :  { %v3014_v6 = vpop.f32.mrb[53].mxu1  ;;  %v2429_v43 = vsel %vm845_vm2, %v2425_v17, -inf }
 0xeb0   :  { %2430 = vmax.xlane.f32.xlu0 %v2429_v43 }
 0xeb4   :  { %1696 = vadd.xlane.f32.xlu0 %v1695_v49 }
 0xf3d   :  { %v2431_v52 = vpop.xlane.xlu0 %2430 }
 0xf3e   :  { %v2432_v54 = vsub.f32 %v2425_v17, %v2431_v52 }
 0xf40   :  { %v2433_v50 = vmul.f32 1.442695, %v2432_v54 }
 0xf41   :  { %v1697_v55 = vpop.xlane.xlu0 %1696 }
 0xf42   :  { %3080 = vpow2.f32 %v2433_v50  ;;  %v1699_v57 = vmul.f32 0.03125, %v1697_v55 }
 0xf44   :  { %v1700_v56 = vsub.f32 %v1694_v46, %v1699_v57 }
 0xf46   :  { %v1701_v13 = vmul.f32 %v1700_v56, %v1700_v56 }
 0xf48   :  { %v1702_v14 = vsel %vm71_vm1, %v1701_v13, 0.0 }
 0xf49   :  { %1703 = vadd.xlane.f32.xlu0 %v1702_v14 }
 0xf4c   :  { %v3081_v0 = vpop.eup %3080 }
 0xf4d   :  { %v2435_v58 = vsel %vm845_vm2, %v3081_v0, 0.0 }
 0xf4e   :  { %2436 = vadd.xlane.f32.xlu1 %v2435_v58 }
 0xf80   :  { %v2345_v5 = vpop.f32.mrb[48].mxu0 }
 0xf81   :  { %v2351_v59 = vadd.f32 %v2345_v5, %v2137_v24  ;;  %v3008_v60 = vpop.f32.mrb[49].mxu0 }
 0xf82   :  { %v2348_v61 = vpop.f32.mrb[50].mxu0 }
 0xf83   :  { %v3009_v62 = vpop.f32.mrb[51].mxu0 }
 0xfd6   :  { %v1704_v63 = vpop.xlane.xlu0 %1703 }
 0xfd7   :  { %v1705_v1 = vmul.f32 0.03125, %v1704_v63 }
 0xfd9   :  { %v1706_v2 = vadd.f32 1e-05, %v1705_v1 }
 0xfdb   :  { %3082 = vrsqrt.f32 %v1706_v2  ;;  %v2437_v3 = vpop.xlane.xlu1 %2436 }
 0xfdc   :  { %3084 = vrcp.f32 %v2437_v3 }
 0xfe5   :  { %v3083_v11 = vpop.eup %3082 }
 0xfe6   :  { %v3085_v25 = vpop.eup %3084  ;;  %v1708_v26 = vmul.f32 %v3083_v11, %v1700_v56 }
 0xfe7   :  { %v2439_v48 = vmul.f32 %v3085_v25, %v3081_v0 }
 0xfe8   :  { %v1715_v7 = vmul.f32 %v2697_v4, %v1708_v26 }
 0xfe9   :  { %3018 = vmatmul.mubr.msk.f32.vlgmr.msra.gmra.mrb[54].mxu1 %vm845_vm2, %v2439_v48 }
 0xfea   :  { %v1722_v33 = vadd.f32 %v2698_v47, %v1715_v7 }
 0xfec   :  { %1723 = vst.msk [vmem:[%s3617_s12] sm:$0xff] %vm71_vm1, %v1722_v33 }
0x10bc   :  { %v2509_v12 = vpop.f32.mrb[54].mxu1 }
0x10bd   :  { %v2513_v15 = vpack.c.bf16 %v2509_v12, %v2509_v12  ;;  %v3019_v18 = vpop.f32.mrb[55].mxu1 }
0x10bf   :  { %3023 = vmatmul.mubr.msk.bf16.vlgmr.msra.gmra.mrb[52].mxu0 %vm845_vm2, %v2513_v15 }
0x1192   :  { %v2555_v45 = vpop.f32.mrb[52].mxu0 }
0x1193   :  { %v2561_v19 = vadd.f32 %v2555_v45, %v2351_v59  ;;  %v3024_v21 = vpop.f32.mrb[53].mxu0 }
0x1194   :  { %v2558_v22 = vpop.f32.mrb[54].mxu0 }
0x1195   :  { %v2562_v24 = vadd.f32 %v2696_v29, %v2561_v19  ;;  %v3025_v27 = vpop.f32.mrb[55].mxu0 }
0x1197   :  { %v2563_v8 = vadd.f32 %v3088_v23, %v2562_v24 }
0x1199   :  { %v2564_v28 = vsel %vm71_vm1, %v2563_v8, 0.0 }
0x119a   :  { %2565 = vadd.xlane.f32.xlu1 %v2564_v28 }
0x1227   :  { %v2566_v30 = vpop.xlane.xlu1 %2565 }
0x1228   :  { %v2567_v31 = vmul.f32 0.03125, %v2566_v30 }
0x122a   :  { %v2568_v32 = vsub.f32 %v2563_v8, %v2567_v31 }
0x122c   :  { %v2569_v34 = vmul.f32 %v2568_v32, %v2568_v32 }
0x122e   :  { %v2570_v35 = vsel %vm71_vm1, %v2569_v34, 0.0 }
0x122f   :  { %2571 = vadd.xlane.f32.xlu1 %v2570_v35 }
0x12bc   :  { %v2572_v20 = vpop.xlane.xlu1 %2571 }
0x12bd   :  { %v2573_v37 = vmul.f32 0.03125, %v2572_v20 }
0x12bf   :  { %v2574_v38 = vadd.f32 1e-05, %v2573_v37 }
0x12c1   :  { %3086 = vrsqrt.f32 %v2574_v38 }
0x12cb   :  { %v3087_v39 = vpop.eup %3086 }
0x12cc   :  { %v2576_v40 = vmul.f32 %v3087_v39, %v2568_v32 }
0x12ce   :  { %v2577_v41 = vmul.f32 %v2697_v4, %v2576_v40 }
0x12d0   :  { %v2578_v44 = vadd.f32 %v2698_v47, %v2577_v41 }
0x12d2   :  { %2579 = vst.msk [vmem:[%s3617_s12 + $0x8] sm:$0xff] %vm71_vm1, %v2578_v44 }

// kernel: simple_transformer_forward.13
= control target key start
LH: loop header
LB: loop body
LE: loop exit
PB: predicated region body
PF: predicated region fallthrough
CT: control target
= control target key end

     0   :  { %v2596_v3 = vmov 0   ;;  %vm306_vm0 = vcmask 261120   ;;  %s3264_s1 = inlined_call_operand.vmem [shape: bf16[32,2048], index: 1, kind: input, shape index: {}]   ;;  %s3265_s0 = inlined_call_operand.vmem [shape: f32[16,32], index: 0, kind: input, shape index: {}]   ;;  %s3266_s3 = inlined_call_operand.vmem [shape: bf16[2048,32], index: 3, kind: input, shape index: {}]   ;;  %s3267_s2 = inlined_call_operand.vmem [shape: f32[1,2048], index: 2, kind: input, shape index: {}]   ;;  %s3268_s4 = inlined_call_operand.vmem [shape: f32[1,32], index: 4, kind: input, shape index: {}]   ;;  %s3269_s5 = inlined_call_operand.vmem [shape: f32[1,32], index: 5, kind: input, shape index: {}]   ;;  %s3270_s6 = inlined_call_operand.vmem [shape: f32[1,32], index: 6, kind: input, shape index: {}]   ;;  %s3271_s7 = inlined_call_operand.vmem [shape: f32[16,32], index: 7, kind: output, shape index: {}]  }
   0x1   :  { %v30_v0 = vld [vmem:[%s3264_s1] sm:$0xff]  ;;  %v31_v2 = vld [vmem:[%s3264_s1 + $0x8] sm:$0xff]  ;;  %342 = vmatprep.mubr.bf16.mxu0 %v2596_v3  ;;  %385 = vmatprep.mubr.bf16.mxu1 %v2596_v3  ;;  %v32_v16 = vld [vmem:[%s3264_s1 + $0x10] sm:$0xff] }
   0x2   :  { %v38_v1 = vld [vmem:[%s3264_s1 + $0x40] sm:$0xff]  ;;  %v39_v5 = vld [vmem:[%s3264_s1 + $0x48] sm:$0xff]  ;;  %v40_v17 = vld [vmem:[%s3264_s1 + $0x50] sm:$0xff] }
   0x3   :  { %v2115_v4 = vcombine.high %v30_v0, %v38_v1  ;;  %v2114_v6 = vcombine.low %v30_v0, %v38_v1  ;;  %v46_v7 = vld [vmem:[%s3264_s1 + $0x80] sm:$0xff]  ;;  %v2117_v9 = vcombine.high %v31_v2, %v39_v5  ;;  %v2116_v10 = vcombine.low %v31_v2, %v39_v5  ;;  %v47_v12 = vld [vmem:[%s3264_s1 + $0x88] sm:$0xff]  ;;  %v33_v20 = vld [vmem:[%s3264_s1 + $0x18] sm:$0xff] }
   0x4   :  { %v54_v8 = vld [vmem:[%s3264_s1 + $0xc0] sm:$0xff]  ;;  %v55_v13 = vld [vmem:[%s3264_s1 + $0xc8] sm:$0xff]  ;;  %v41_v21 = vld [vmem:[%s3264_s1 + $0x58] sm:$0xff]  ;;  %v2119_v23 = vcombine.high %v32_v16, %v40_v17  ;;  %v2118_v30 = vcombine.low %v32_v16, %v40_v17 }
   0x5   :  { %v2131_v11 = vcombine.high %v46_v7, %v54_v8  ;;  %310 = vmatprep.subr.bf16.mxu0 %v2115_v4  ;;  %v2133_v14 = vcombine.high %v47_v12, %v55_v13  ;;  %v27_v15 = vld [vmem:[%s3265_s0] sm:$0xff]  ;;  %353 = vmatprep.subr.bf16.mxu1 %v2117_v9  ;;  %v2130_v18 = vcombine.low %v46_v7, %v54_v8  ;;  %v28_v19 = vld [vmem:[%s3265_s0 + $0x8] sm:$0xff]  ;;  %v48_v25 = vld [vmem:[%s3264_s1 + $0x90] sm:$0xff] }
   0x6   :  { %311 = vmatpush1.bf16.msra.mxu0 %v2114_v6  ;;  %354 = vmatpush1.bf16.msra.mxu1 %v2116_v10  ;;  %v2132_v22 = vcombine.low %v47_v12, %v55_v13  ;;  %v2121_v24 = vcombine.high %v33_v20, %v41_v21  ;;  %v56_v26 = vld [vmem:[%s3264_s1 + $0xd0] sm:$0xff]  ;;  %v2687_v27 = vpack.c.bf16 %v28_v19, %v27_v15  ;;  %v49_v28 = vld [vmem:[%s3264_s1 + $0x98] sm:$0xff]  ;;  %v34_v34 = vld [vmem:[%s3264_s1 + $0x20] sm:$0xff] }
   0x7   :  { %312 = vmatprep.subr.bf16.mxu0 %v2131_v11  ;;  %355 = vmatprep.subr.bf16.mxu1 %v2133_v14  ;;  %v57_v29 = vld [vmem:[%s3264_s1 + $0xd8] sm:$0xff]  ;;  %v2120_v31 = vcombine.low %v33_v20, %v41_v21  ;;  %v2135_v32 = vcombine.high %v48_v25, %v56_v26  ;;  %v42_v35 = vld [vmem:[%s3264_s1 + $0x60] sm:$0xff]  ;;  %v35_v36 = vld [vmem:[%s3264_s1 + $0x28] sm:$0xff]  ;;  %v2134_v38 = vcombine.low %v48_v25, %v56_v26 }
   0x8   :  { %v2137_v33 = vcombine.high %v49_v28, %v57_v29  ;;  %v43_v37 = vld [vmem:[%s3264_s1 + $0x68] sm:$0xff]  ;;  %v50_v39 = vld [vmem:[%s3264_s1 + $0xa0] sm:$0xff]  ;;  %v2136_v40 = vcombine.low %v49_v28, %v57_v29  ;;  %v2123_v41 = vcombine.high %v34_v34, %v42_v35  ;;  %v2122_v46 = vcombine.low %v34_v34, %v42_v35  ;;  %v36_v47 = vld [vmem:[%s3264_s1 + $0x30] sm:$0xff] }
   0x9   :  { %v58_v42 = vld [vmem:[%s3264_s1 + $0xe0] sm:$0xff]  ;;  %v2125_v43 = vcombine.high %v35_v36, %v43_v37  ;;  %v51_v44 = vld [vmem:[%s3264_s1 + $0xa8] sm:$0xff]  ;;  %v2124_v48 = vcombine.low %v35_v36, %v43_v37  ;;  %v44_v50 = vld [vmem:[%s3264_s1 + $0x70] sm:$0xff] }
   0xa   :  { %313 = vmatpush1.bf16.msra.mxu0 %v2130_v18  ;;  %356 = vmatpush1.bf16.msra.mxu1 %v2132_v22  ;;  %v59_v45 = vld [vmem:[%s3264_s1 + $0xe8] sm:$0xff]  ;;  %v2139_v49 = vcombine.high %v50_v39, %v58_v42  ;;  %v37_v52 = vld [vmem:[%s3264_s1 + $0x38] sm:$0xff]  ;;  %v2138_v54 = vcombine.low %v50_v39, %v58_v42  ;;  %v52_v55 = vld [vmem:[%s3264_s1 + $0xb0] sm:$0xff]  ;;  %v2127_v57 = vcombine.high %v36_v47, %v44_v50 }
   0xb   :  { %396 = vmatprep.subr.bf16.mxu0 %v2119_v23  ;;  %439 = vmatprep.subr.bf16.mxu1 %v2121_v24  ;;  %v2141_v51 = vcombine.high %v51_v44, %v59_v45  ;;  %v45_v53 = vld [vmem:[%s3264_s1 + $0x78] sm:$0xff]  ;;  %v2140_v56 = vcombine.low %v51_v44, %v59_v45  ;;  %v60_v58 = vld [vmem:[%s3264_s1 + $0xf0] sm:$0xff]  ;;  %v2126_v62 = vcombine.low %v36_v47, %v44_v50  ;;  %v2462_v4 = vld [vmem:[%s3266_s3 + $0x40] sm:$0xff]  }
   0xc   :  { %v2129_v59 = vcombine.high %v37_v52, %v45_v53  ;;  %v53_v60 = vld [vmem:[%s3264_s1 + $0xb8] sm:$0xff]  ;;  %v2128_v63 = vcombine.low %v37_v52, %v45_v53  ;;  %v2143_v0 = vcombine.high %v52_v55, %v60_v58  ;;  %v2142_v2 = vcombine.low %v52_v55, %v60_v58  ;;  %v2463_v6 = vld [vmem:[%s3266_s3 + $0xc0] sm:$0xff]   ;;  %v2466_v9 = vld [vmem:[%s3266_s3 + $0x48] sm:$0xff]  }
   0xd   :  { %2146 = vmatmul.mubr.msk.bf16.vlgmr.msra.gmra.mrb[0].mxu0 %vm306_vm0, %v2687_v27  ;;  %2147 = vmatmul.mubr.msk.bf16.vlgmr.msra.gmra.mrb[0].mxu1 %vm306_vm0, %v2687_v27  ;;  %v61_v61 = vld [vmem:[%s3264_s1 + $0xf8] sm:$0xff]  ;;  %v2464_v7 = vld [vmem:[%s3266_s3] sm:$0xff]   ;;  %v2467_v10 = vld [vmem:[%s3266_s3 + $0xc8] sm:$0xff]  }
   0xe   :  { %397 = vmatpush1.bf16.msra.mxu0 %v2118_v30  ;;  %440 = vmatpush1.bf16.msra.mxu1 %v2120_v31  ;;  %v2145_v1 = vcombine.high %v53_v60, %v61_v61  ;;  %v2144_v5 = vcombine.low %v53_v60, %v61_v61  ;;  %v2465_v8 = vld [vmem:[%s3266_s3 + $0x80] sm:$0xff]   ;;  %v2469_v11 = vld [vmem:[%s3266_s3 + $0x88] sm:$0xff]   ;;  %v2470_v12 = vld [vmem:[%s3266_s3 + $0x50] sm:$0xff]  }
   0xf   :  { %398 = vmatprep.subr.bf16.mxu0 %v2135_v32  ;;  %441 = vmatprep.subr.bf16.mxu1 %v2137_v33  ;;  %v2471_v13 = vld [vmem:[%s3266_s3 + $0xd0] sm:$0xff]   ;;  %v2474_v16 = vld [vmem:[%s3266_s3 + $0x58] sm:$0xff]   ;;  %v2478_v20 = vld [vmem:[%s3266_s3 + $0x60] sm:$0xff]  }
  0x10   :  { %428 = vmatprep.mubr.bf16.mxu0 %v2596_v3  ;;  %471 = vmatprep.mubr.bf16.mxu1 %v2596_v3  ;;  %v2472_v14 = vld [vmem:[%s3266_s3 + $0x10] sm:$0xff]   ;;  %v2475_v17 = vld [vmem:[%s3266_s3 + $0xd8] sm:$0xff]   ;;  %v2479_v21 = vld [vmem:[%s3266_s3 + $0xe0] sm:$0xff]  }
  0x11   :  { %v2473_v15 = vld [vmem:[%s3266_s3 + $0x90] sm:$0xff]   ;;  %v2476_v18 = vld [vmem:[%s3266_s3 + $0x18] sm:$0xff]   ;;  %v2480_v22 = vld [vmem:[%s3266_s3 + $0x20] sm:$0xff]  }
  0x12   :  { %399 = vmatpush1.bf16.msra.mxu0 %v2134_v38  ;;  %442 = vmatpush1.bf16.msra.mxu1 %v2136_v40  ;;  %v2477_v19 = vld [vmem:[%s3266_s3 + $0x98] sm:$0xff]   ;;  %v2481_v23 = vld [vmem:[%s3266_s3 + $0xa0] sm:$0xff]   ;;  %v2482_v24 = vld [vmem:[%s3266_s3 + $0x68] sm:$0xff]   ;;  %v66_v38 = vlaneseq }
  0x13   :  { %482 = vmatprep.subr.bf16.mxu0 %v2123_v41  ;;  %525 = vmatprep.subr.bf16.mxu1 %v2125_v43  ;;  %v2483_v25 = vld [vmem:[%s3266_s3 + $0xe8] sm:$0xff]   ;;  %v2486_v28 = vld [vmem:[%s3266_s3 + $0x70] sm:$0xff]   ;;  %v2490_v32 = vld [vmem:[%s3266_s3 + $0x78] sm:$0xff]  }
  0x14   :  { %v2484_v26 = vld [vmem:[%s3266_s3 + $0x28] sm:$0xff]   ;;  %v2487_v29 = vld [vmem:[%s3266_s3 + $0xf0] sm:$0xff]   ;;  %v2491_v33 = vld [vmem:[%s3266_s3 + $0xf8] sm:$0xff]   ;;  %v2867_v39 = vshrl.u32 %v66_v38, 7 }
  0x15   :  { %2148 = vmatmul.mubr.msk.bf16.vlgmr.msra.gmra.mrb[4].mxu0 %vm306_vm0, %v2687_v27  ;;  %2149 = vmatmul.mubr.msk.bf16.vlgmr.msra.gmra.mrb[4].mxu1 %vm306_vm0, %v2687_v27  ;;  %v2488_v30 = vld [vmem:[%s3266_s3 + $0x30] sm:$0xff]   ;;  %v2492_v34 = vld [vmem:[%s3266_s3 + $0x38] sm:$0xff]   ;;  %v2494_v36 = vld [vmem:[%s3266_s3 + $0x140] sm:$0xff]  }
  0x16   :  { %483 = vmatpush1.bf16.msra.mxu0 %v2122_v46  ;;  %526 = vmatpush1.bf16.msra.mxu1 %v2124_v48  ;;  %v2489_v31 = vld [vmem:[%s3266_s3 + $0xb0] sm:$0xff]   ;;  %v2493_v35 = vld [vmem:[%s3266_s3 + $0xb8] sm:$0xff]   ;;  %v2495_v37 = vld [vmem:[%s3266_s3 + $0x1c0] sm:$0xff]   ;;  %v68_v40 = vsub.s32 0, %v2867_v39  ;;  %v76_v42 = vsub.s32 2, %v2867_v39  ;;  %v72_v43 = vsub.s32 1, %v2867_v39 }
  0x17   :  { %484 = vmatprep.subr.bf16.mxu0 %v2139_v49  ;;  %527 = vmatprep.subr.bf16.mxu1 %v2141_v51  ;;  %v62_v41 = vld [vmem:[%s3267_s2] sm:$0xff]  ;;  %v80_v44 = vsub.s32 3, %v2867_v39  ;;  %v84_v49 = vsub.s32 4, %v2867_v39  ;;  %v88_v51 = vsub.s32 5, %v2867_v39 }
  0x18   :  { %514 = vmatprep.mubr.bf16.mxu0 %v2596_v3  ;;  %557 = vmatprep.mubr.bf16.mxu1 %v2596_v3  ;;  %v69_v45 = vrot.slane %v62_v41, %v68_v40  ;;  %v77_v46 = vrot.slane %v62_v41, %v76_v42  ;;  %v73_v47 = vrot.slane %v62_v41, %v72_v43 }
  0x19   :  { %v81_v48 = vrot.slane %v62_v41, %v80_v44 }
  0x1a   :  { %485 = vmatpush1.bf16.msra.mxu0 %v2138_v54  ;;  %528 = vmatpush1.bf16.msra.mxu1 %v2140_v56 }
  0x1b   :  { %568 = vmatprep.subr.bf16.mxu0 %v2127_v57  ;;  %611 = vmatprep.subr.bf16.mxu1 %v2129_v59  ;;  %v92_v59 = vsub.s32 6, %v2867_v39 }
  0x1d   :  { %2150 = vmatmul.mubr.msk.bf16.vlgmr.msra.gmra.mrb[8].mxu0 %vm306_vm0, %v2687_v27  ;;  %2151 = vmatmul.mubr.msk.bf16.vlgmr.msra.gmra.mrb[8].mxu1 %vm306_vm0, %v2687_v27 }
  0x1e   :  { %569 = vmatpush1.bf16.msra.mxu0 %v2126_v62  ;;  %612 = vmatpush1.bf16.msra.mxu1 %v2128_v63 }
  0x1f   :  { %570 = vmatprep.subr.bf16.mxu0 %v2143_v0  ;;  %613 = vmatprep.subr.bf16.mxu1 %v2145_v1  ;;  %v85_v0 = vrot.slane %v62_v41, %v84_v49  ;;  %v96_v1 = vsub.s32 7, %v2867_v39  ;;  %v2514_v39 = vld [vmem:[%s3266_s3 + $0x168] sm:$0xff]  }
  0x20   :  { %600 = vmatprep.mubr.bf16.mxu0 %v2596_v3  ;;  %643 = vmatprep.mubr.bf16.mxu1 %v2596_v3  ;;  %v2468_v3 = vld [vmem:[%s3266_s3 + $0x8] sm:$0xff]  }
  0x22   :  { %571 = vmatpush1.bf16.msra.mxu0 %v2142_v2  ;;  %614 = vmatpush1.bf16.msra.mxu1 %v2144_v5 }
  0x23   :  { %2285 = vmatprep.subr.bf16.mxu0 %v2462_v4  ;;  %2307 = vmatprep.subr.bf16.mxu1 %v2463_v6 }
  0x25   :  { %2152 = vmatmul.mubr.msk.bf16.vlgmr.msra.gmra.mrb[12].mxu0 %vm306_vm0, %v2687_v27  ;;  %2153 = vmatmul.mubr.msk.bf16.vlgmr.msra.gmra.mrb[12].mxu1 %vm306_vm0, %v2687_v27  ;;  %v2485_v27 = vld [vmem:[%s3266_s3 + $0xa8] sm:$0xff]  }
  0x26   :  { %2286 = vmatpush3.bf16.msra.mxu0 %v2464_v7  ;;  %2308 = vmatpush3.bf16.msra.mxu1 %v2465_v8  ;;  %v89_v7 = vrot.slane %v62_v41, %v88_v51 }
  0x27   :  { %2287 = vmatprep.subr.bf16.mxu0 %v2466_v9  ;;  %2309 = vmatprep.subr.bf16.mxu1 %v2467_v10 }
  0x2a   :  { %2288 = vmatpush3.bf16.msra.mxu0 %v2468_v3  ;;  %2310 = vmatpush3.bf16.msra.mxu1 %v2469_v11 }
  0x2b   :  { %2289 = vmatprep.subr.bf16.mxu0 %v2470_v12  ;;  %2311 = vmatprep.subr.bf16.mxu1 %v2471_v13 }
  0x2e   :  { %2290 = vmatpush3.bf16.msra.mxu0 %v2472_v14  ;;  %2312 = vmatpush3.bf16.msra.mxu1 %v2473_v15  ;;  %v93_v14 = vrot.slane %v62_v41, %v92_v59 }
  0x2f   :  { %2291 = vmatprep.subr.bf16.mxu0 %v2474_v16  ;;  %2313 = vmatprep.subr.bf16.mxu1 %v2475_v17  ;;  %v97_v17 = vrot.slane %v62_v41, %v96_v1  ;;  %v2500_v41 = vld [vmem:[%s3266_s3 + $0x108] sm:$0xff]  }
  0x32   :  { %2292 = vmatpush3.bf16.msra.mxu0 %v2476_v18  ;;  %2314 = vmatpush3.bf16.msra.mxu1 %v2477_v19 }
  0x33   :  { %2293 = vmatprep.subr.bf16.mxu0 %v2478_v20  ;;  %2315 = vmatprep.subr.bf16.mxu1 %v2479_v21  ;;  %v2496_v20 = vld [vmem:[%s3266_s3 + $0x100] sm:$0xff]  }
  0x36   :  { %2294 = vmatpush3.bf16.msra.mxu0 %v2480_v22  ;;  %2316 = vmatpush3.bf16.msra.mxu1 %v2481_v23  ;;  %v2497_v23 = vld [vmem:[%s3266_s3 + $0x180] sm:$0xff]  }
  0x37   :  { %2295 = vmatprep.subr.bf16.mxu0 %v2482_v24  ;;  %2317 = vmatprep.subr.bf16.mxu1 %v2483_v25  ;;  %v2498_v24 = vld [vmem:[%s3266_s3 + $0x148] sm:$0xff]  }
  0x3a   :  { %2296 = vmatpush3.bf16.msra.mxu0 %v2484_v26  ;;  %2318 = vmatpush3.bf16.msra.mxu1 %v2485_v27 }
  0x3b   :  { %2297 = vmatprep.subr.bf16.mxu0 %v2486_v28  ;;  %2319 = vmatprep.subr.bf16.mxu1 %v2487_v29  ;;  %v2499_v28 = vld [vmem:[%s3266_s3 + $0x1c8] sm:$0xff]  }
  0x3e   :  { %2298 = vmatpush3.bf16.msra.mxu0 %v2488_v30  ;;  %2320 = vmatpush3.bf16.msra.mxu1 %v2489_v31 }
  0x3f   :  { %2299 = vmatprep.subr.bf16.mxu0 %v2490_v32  ;;  %2321 = vmatprep.subr.bf16.mxu1 %v2491_v33  ;;  %v2911_v33 = vld [vmem:[%s3267_s2 + $0x8] sm:$0xff] }
  0x42   :  { %2300 = vmatpush3.bf16.msra.mxu0 %v2492_v34  ;;  %2322 = vmatpush3.bf16.msra.mxu1 %v2493_v35 }
  0x43   :  { %2329 = vmatprep.subr.bf16.mxu0 %v2494_v36  ;;  %2351 = vmatprep.subr.bf16.mxu1 %v2495_v37 }
  0xe0   :  { %v344_v50 = vpop.f32.mrb[0].mxu0  ;;  %v387_v53 = vpop.f32.mrb[0].mxu1 }
  0xe1   :  { %v345_v52 = vadd.f32 %v344_v50, %v69_v45  ;;  %v346_v54 = vpop.f32.mrb[1].mxu0  ;;  %v388_v55 = vadd.f32 %v387_v53, %v77_v46  ;;  %v389_v57 = vpop.f32.mrb[1].mxu1  ;;  %v2502_v53 = vld [vmem:[%s3266_s3 + $0x150] sm:$0xff]  }
  0xe2   :  { %v347_v56 = vadd.f32 %v346_v54, %v73_v47  ;;  %v348_v58 = vpop.f32.mrb[2].mxu0  ;;  %v390_v60 = vadd.f32 %v389_v57, %v81_v48  ;;  %v391_v62 = vpop.f32.mrb[2].mxu1  ;;  %v101_v57 = vrot.slane %v2911_v33, %v68_v40  ;;  %v113_v40 = vrot.slane %v2911_v33, %v80_v44 }
  0xe3   :  { %v349_v61 = vadd.f32 %v348_v58, %v69_v45  ;;  %v350_v63 = vpop.f32.mrb[3].mxu0  ;;  %v656_v2 = vmax.f32 %v388_v55, 0.0  ;;  %v392_v4 = vadd.f32 %v391_v62, %v77_v46  ;;  %v393_v6 = vpop.f32.mrb[3].mxu1  ;;  %v654_v8 = vmax.f32 %v345_v52, 0.0  ;;  %v2501_v52 = vld [vmem:[%s3266_s3 + $0x188] sm:$0xff]   ;;  %v2503_v58 = vld [vmem:[%s3266_s3 + $0x1d0] sm:$0xff]  }
  0xe4   :  { %v351_v5 = vadd.f32 %v350_v63, %v73_v47  ;;  %v657_v9 = vmax.f32 %v390_v60, 0.0  ;;  %v394_v3 = vadd.f32 %v393_v6, %v81_v48  ;;  %v655_v11 = vmax.f32 %v347_v56, 0.0 }
  0xe5   :  { %v670_v10 = vmax.f32 %v349_v61, 0.0  ;;  %v672_v12 = vmax.f32 %v392_v4, 0.0  ;;  %v105_v62 = vrot.slane %v2911_v33, %v72_v43  ;;  %v109_v63 = vrot.slane %v2911_v33, %v76_v42  ;;  %v2504_v4 = vld [vmem:[%s3266_s3 + $0x110] sm:$0xff]  }
  0xe6   :  { %v671_v13 = vmax.f32 %v351_v5, 0.0  ;;  %v673_v16 = vmax.f32 %v394_v3, 0.0  ;;  %v2505_v42 = vld [vmem:[%s3266_s3 + $0x190] sm:$0xff]   ;;  %v2507_v3 = vld [vmem:[%s3266_s3 + $0x1d8] sm:$0xff]  }
  0xe7   :  { %v686_v15 = vpack.c.bf16 %v670_v10, %v654_v8  ;;  %v688_v18 = vpack.c.bf16 %v672_v12, %v656_v2 }
  0xe8   :  { %v687_v19 = vpack.c.bf16 %v671_v13, %v655_v11  ;;  %v430_v21 = vpop.f32.mrb[4].mxu0  ;;  %v689_v22 = vpack.c.bf16 %v673_v16, %v657_v9  ;;  %v473_v27 = vpop.f32.mrb[4].mxu1 }
  0xe9   :  { %v431_v25 = vadd.f32 %v430_v21, %v85_v0  ;;  %v432_v26 = vpop.f32.mrb[5].mxu0  ;;  %v474_v31 = vadd.f32 %v473_v27, %v93_v14  ;;  %v475_v32 = vpop.f32.mrb[5].mxu1  ;;  %v2510_v27 = vld [vmem:[%s3266_s3 + $0x160] sm:$0xff]  }
  0xea   :  { %1765 = vmatprep.mubr.bf16.mxu0 %v687_v19  ;;  %v433_v29 = vadd.f32 %v432_v26, %v89_v7  ;;  %v434_v30 = vpop.f32.mrb[6].mxu0  ;;  %1806 = vmatprep.mubr.bf16.mxu1 %v689_v22  ;;  %v476_v37 = vadd.f32 %v475_v32, %v97_v17  ;;  %v477_v38 = vpop.f32.mrb[6].mxu1  ;;  %v2509_v26 = vld [vmem:[%s3266_s3 + $0x198] sm:$0xff]   ;;  %v2511_v32 = vld [vmem:[%s3266_s3 + $0x1e0] sm:$0xff]  }
  0xeb   :  { %1766 = vmatmul.mubr.bf16.vlgmr.msra.gmra.mrb[16].mxu0 %v686_v15  ;;  %v658_v34 = vmax.f32 %v431_v25, 0.0  ;;  %v435_v35 = vadd.f32 %v434_v30, %v85_v0  ;;  %v436_v36 = vpop.f32.mrb[7].mxu0  ;;  %1807 = vmatmul.mubr.bf16.vlgmr.msra.gmra.mrb[16].mxu1 %v688_v18  ;;  %v660_v46 = vmax.f32 %v474_v31, 0.0  ;;  %v478_v48 = vadd.f32 %v477_v38, %v93_v14  ;;  %v479_v50 = vpop.f32.mrb[7].mxu1 }
  0xec   :  { %2330 = vmatpush3.bf16.msra.mxu0 %v2496_v20  ;;  %v659_v45 = vmax.f32 %v433_v29, 0.0  ;;  %v437_v47 = vadd.f32 %v436_v36, %v89_v7  ;;  %2352 = vmatpush3.bf16.msra.mxu1 %v2497_v23  ;;  %v661_v55 = vmax.f32 %v476_v37, 0.0  ;;  %v480_v56 = vadd.f32 %v479_v50, %v97_v17  ;;  %v2506_v7 = vld [vmem:[%s3266_s3 + $0x158] sm:$0xff]  }
  0xed   :  { %2331 = vmatprep.subr.bf16.mxu0 %v2498_v24  ;;  %v674_v54 = vmax.f32 %v435_v35, 0.0  ;;  %2353 = vmatprep.subr.bf16.mxu1 %v2499_v28  ;;  %v676_v61 = vmax.f32 %v478_v48, 0.0  ;;  %v2508_v20 = vld [vmem:[%s3266_s3 + $0x118] sm:$0xff]   ;;  %v117_v31 = vrot.slane %v2911_v33, %v84_v49  ;;  %v121_v36 = vrot.slane %v2911_v33, %v88_v51 }
  0xee   :  { %v675_v60 = vmax.f32 %v437_v47, 0.0  ;;  %v677_v2 = vmax.f32 %v480_v56, 0.0  ;;  %v125_v37 = vrot.slane %v2911_v33, %v92_v59  ;;  %v129_v49 = vrot.slane %v2911_v33, %v96_v1  ;;  %v2513_v59 = vld [vmem:[%s3266_s3 + $0x1a0] sm:$0xff]  }
  0xef   :  { %v2934_v0 = vpack.c.bf16 %v674_v54, %v658_v34  ;;  %v2942_v6 = vpack.c.bf16 %v676_v61, %v660_v46 }
  0xf0   :  { %2332 = vmatpush3.bf16.msra.mxu0 %v2500_v41  ;;  %v691_v5 = vpack.c.bf16 %v675_v60, %v659_v45  ;;  %v516_v43 = vpop.f32.mrb[8].mxu0  ;;  %2354 = vmatpush3.bf16.msra.mxu1 %v2501_v52  ;;  %v693_v44 = vpack.c.bf16 %v677_v2, %v661_v55  ;;  %v559_v10 = vpop.f32.mrb[8].mxu1  ;;  %v2512_v45 = vld [vmem:[%s3266_s3 + $0x120] sm:$0xff]   ;;  %v2515_v52 = vld [vmem:[%s3266_s3 + $0x1e8] sm:$0xff]  }
  0xf1   :  { %2333 = vmatprep.subr.bf16.mxu0 %v2502_v53  ;;  %v517_v8 = vadd.f32 %v516_v43, %v101_v57  ;;  %v518_v9 = vpop.f32.mrb[9].mxu0  ;;  %2355 = vmatprep.subr.bf16.mxu1 %v2503_v58  ;;  %v560_v13 = vadd.f32 %v559_v10, %v109_v63  ;;  %v561_v14 = vpop.f32.mrb[9].mxu1  ;;  %v2519_v10 = vld [vmem:[%s3266_s3 + $0x1f0] sm:$0xff]  }
  0xf2   :  { %1847 = vmatprep.mubr.bf16.mxu0 %v691_v5  ;;  %v519_v11 = vadd.f32 %v518_v9, %v105_v62  ;;  %v520_v12 = vpop.f32.mrb[10].mxu0  ;;  %1888 = vmatprep.mubr.bf16.mxu1 %v693_v44  ;;  %v562_v18 = vadd.f32 %v561_v14, %v113_v40  ;;  %v563_v19 = vpop.f32.mrb[10].mxu1  ;;  %v2520_v14 = vld [vmem:[%s3266_s3 + $0x130] sm:$0xff]  }
  0xf3   :  { %v662_v15 = vmax.f32 %v517_v8, 0.0  ;;  %v521_v16 = vadd.f32 %v520_v12, %v101_v57  ;;  %v522_v17 = vpop.f32.mrb[11].mxu0  ;;  %v664_v22 = vmax.f32 %v560_v13, 0.0  ;;  %v564_v24 = vadd.f32 %v563_v19, %v109_v63  ;;  %v565_v25 = vpop.f32.mrb[11].mxu1  ;;  %v2516_v63 = vld [vmem:[%s3266_s3 + $0x128] sm:$0xff]  }
  0xf4   :  { %2334 = vmatpush3.bf16.msra.mxu0 %v2504_v4  ;;  %v663_v21 = vmax.f32 %v519_v11, 0.0  ;;  %v523_v23 = vadd.f32 %v522_v17, %v105_v62  ;;  %2356 = vmatpush3.bf16.msra.mxu1 %v2505_v42  ;;  %v665_v29 = vmax.f32 %v562_v18, 0.0  ;;  %v566_v30 = vadd.f32 %v565_v25, %v113_v40  ;;  %v2517_v42 = vld [vmem:[%s3266_s3 + $0x1a8] sm:$0xff]   ;;  %v2521_v17 = vld [vmem:[%s3266_s3 + $0x1b0] sm:$0xff]   ;;  %v2522_v18 = vld [vmem:[%s3266_s3 + $0x178] sm:$0xff]  }
  0xf5   :  { %2335 = vmatprep.subr.bf16.mxu0 %v2506_v7  ;;  %v678_v28 = vmax.f32 %v521_v16, 0.0  ;;  %2357 = vmatprep.subr.bf16.mxu1 %v2507_v3  ;;  %v680_v35 = vmax.f32 %v564_v24, 0.0  ;;  %v2518_v7 = vld [vmem:[%s3266_s3 + $0x170] sm:$0xff]   ;;  %v2527_v24 = vld [vmem:[%s3266_s3 + $0x2c0] sm:$0xff]  }
  0xf6   :  { %v679_v34 = vmax.f32 %v523_v23, 0.0  ;;  %v681_v41 = vmax.f32 %v566_v30, 0.0  ;;  %v2526_v23 = vld [vmem:[%s3266_s3 + $0x240] sm:$0xff]   ;;  %v2533_v30 = vld [vmem:[%s3266_s3 + $0x288] sm:$0xff]  }
  0xf7   :  { %v2974_v38 = vpack.c.bf16 %v678_v28, %v662_v15  ;;  %v2984_v47 = vpack.c.bf16 %v680_v35, %v664_v22  ;;  %v2525_v22 = vld [vmem:[%s3266_s3 + $0x1b8] sm:$0xff]   ;;  %v2528_v25 = vld [vmem:[%s3266_s3 + $0x200] sm:$0xff]   ;;  %v2531_v28 = vld [vmem:[%s3266_s3 + $0x2c8] sm:$0xff]  }
  0xf8   :  { %2336 = vmatpush3.bf16.msra.mxu0 %v2508_v20  ;;  %v2982_v46 = vpack.c.bf16 %v679_v34, %v663_v21  ;;  %v602_v51 = vpop.f32.mrb[12].mxu0  ;;  %2358 = vmatpush3.bf16.msra.mxu1 %v2509_v26  ;;  %v2992_v1 = vpack.c.bf16 %v681_v41, %v665_v29  ;;  %v645_v50 = vpop.f32.mrb[12].mxu1  ;;  %v2523_v20 = vld [vmem:[%s3266_s3 + $0x1f8] sm:$0xff]   ;;  %v2529_v26 = vld [vmem:[%s3266_s3 + $0x280] sm:$0xff]   ;;  %v2532_v29 = vld [vmem:[%s3266_s3 + $0x208] sm:$0xff]  }
  0xf9   :  { %2337 = vmatprep.subr.bf16.mxu0 %v2510_v27  ;;  %v603_v33 = vadd.f32 %v602_v51, %v117_v31  ;;  %v604_v48 = vpop.f32.mrb[13].mxu0  ;;  %2359 = vmatprep.subr.bf16.mxu1 %v2511_v32  ;;  %v646_v55 = vadd.f32 %v645_v50, %v125_v37  ;;  %v647_v56 = vpop.f32.mrb[13].mxu1  ;;  %v2524_v21 = vld [vmem:[%s3266_s3 + $0x138] sm:$0xff]   ;;  %v2530_v27 = vld [vmem:[%s3266_s3 + $0x248] sm:$0xff]   ;;  %v2537_v32 = vld [vmem:[%s3266_s3 + $0x290] sm:$0xff]  }
  0xfa   :  { %v605_v53 = vadd.f32 %v604_v48, %v121_v36  ;;  %v606_v54 = vpop.f32.mrb[14].mxu0  ;;  %v648_v61 = vadd.f32 %v647_v56, %v129_v49  ;;  %v649_v62 = vpop.f32.mrb[14].mxu1  ;;  %v2538_v34 = vld [vmem:[%s3266_s3 + $0x258] sm:$0xff]   ;;  %v2542_v41 = vld [vmem:[%s3266_s3 + $0x260] sm:$0xff]   ;;  %v2546_v51 = vld [vmem:[%s3266_s3 + $0x268] sm:$0xff]  }
  0xfb   :  { %v666_v57 = vmax.f32 %v603_v33, 0.0  ;;  %v607_v58 = vadd.f32 %v606_v54, %v117_v31  ;;  %v608_v60 = vpop.f32.mrb[15].mxu0  ;;  %v668_v40 = vmax.f32 %v646_v55, 0.0  ;;  %v650_v5 = vadd.f32 %v649_v62, %v125_v37  ;;  %v651_v43 = vpop.f32.mrb[15].mxu1  ;;  %v2534_v31 = vld [vmem:[%s3266_s3 + $0x250] sm:$0xff]   ;;  %v2539_v35 = vld [vmem:[%s3266_s3 + $0x2d8] sm:$0xff]  }
  0xfc   :  { %2338 = vmatpush3.bf16.msra.mxu0 %v2512_v45  ;;  %v667_v2 = vmax.f32 %v605_v53, 0.0  ;;  %v609_v4 = vadd.f32 %v608_v60, %v121_v36  ;;  %2360 = vmatpush3.bf16.msra.mxu1 %v2513_v59  ;;  %v669_v8 = vmax.f32 %v648_v61, 0.0  ;;  %v652_v9 = vadd.f32 %v651_v43, %v129_v49  ;;  %v2540_v36 = vld [vmem:[%s3266_s3 + $0x218] sm:$0xff]   ;;  %v2543_v49 = vld [vmem:[%s3266_s3 + $0x2e0] sm:$0xff]   ;;  %v2547_v59 = vld [vmem:[%s3266_s3 + $0x2e8] sm:$0xff]  }
  0xfd   :  { %2339 = vmatprep.subr.bf16.mxu0 %v2514_v39  ;;  %v682_v44 = vmax.f32 %v607_v58, 0.0  ;;  %2361 = vmatprep.subr.bf16.mxu1 %v2515_v52  ;;  %v684_v11 = vmax.f32 %v650_v5, 0.0  ;;  %v2541_v37 = vld [vmem:[%s3266_s3 + $0x298] sm:$0xff]   ;;  %v2544_v45 = vld [vmem:[%s3266_s3 + $0x220] sm:$0xff]   ;;  %v2548_v39 = vld [vmem:[%s3266_s3 + $0x228] sm:$0xff]  }
  0xfe   :  { %v683_v3 = vmax.f32 %v609_v4, 0.0  ;;  %v685_v13 = vmax.f32 %v652_v9, 0.0  ;;  %v2550_v33 = vld [vmem:[%s3266_s3 + $0x270] sm:$0xff]   ;;  %v2554_v53 = vld [vmem:[%s3266_s3 + $0x278] sm:$0xff]   ;;  %v2559_v58 = vld [vmem:[%s3266_s3 + $0x3c0] sm:$0xff]  }
  0xff   :  { %v3009_v12 = vpack.c.bf16 %v682_v44, %v666_v57  ;;  %v3016_v16 = vpack.c.bf16 %v684_v11, %v668_v40  ;;  %v2551_v48 = vld [vmem:[%s3266_s3 + $0x2f0] sm:$0xff]   ;;  %v2555_v54 = vld [vmem:[%s3266_s3 + $0x2f8] sm:$0xff]   ;;  %v2558_v57 = vld [vmem:[%s3266_s3 + $0x340] sm:$0xff]  }
 0x100   :  { %2340 = vmatpush3.bf16.msra.mxu0 %v2516_v63  ;;  %v3014_v15 = vpack.c.bf16 %v683_v3, %v667_v2  ;;  %2362 = vmatpush3.bf16.msra.mxu1 %v2517_v42  ;;  %v3024_v19 = vpack.c.bf16 %v685_v13, %v669_v8  ;;  %v2552_v50 = vld [vmem:[%s3266_s3 + $0x230] sm:$0xff]   ;;  %v2556_v55 = vld [vmem:[%s3266_s3 + $0x238] sm:$0xff]   ;;  %v2560_v60 = vld [vmem:[%s3266_s3 + $0x300] sm:$0xff]  }
 0x101   :  { %2341 = vmatprep.subr.bf16.mxu0 %v2518_v7  ;;  %2363 = vmatprep.subr.bf16.mxu1 %v2519_v10  ;;  %v2553_v52 = vld [vmem:[%s3266_s3 + $0x2b0] sm:$0xff]   ;;  %v2557_v56 = vld [vmem:[%s3266_s3 + $0x2b8] sm:$0xff]   ;;  %v2561_v61 = vld [vmem:[%s3266_s3 + $0x380] sm:$0xff]  }
 0x102   :  { %v2562_v62 = vld [vmem:[%s3266_s3 + $0x348] sm:$0xff]   ;;  %v2566_v4 = vld [vmem:[%s3266_s3 + $0x350] sm:$0xff]   ;;  %v2570_v43 = vld [vmem:[%s3266_s3 + $0x358] sm:$0xff]  }
 0x103   :  { %v2563_v63 = vld [vmem:[%s3266_s3 + $0x3c8] sm:$0xff]   ;;  %v2569_v5 = vld [vmem:[%s3266_s3 + $0x390] sm:$0xff]   ;;  %v2571_v42 = vld [vmem:[%s3266_s3 + $0x3d8] sm:$0xff]  }
 0x104   :  { %2342 = vmatpush3.bf16.msra.mxu0 %v2520_v14  ;;  %2364 = vmatpush3.bf16.msra.mxu1 %v2521_v17  ;;  %v2564_v2 = vld [vmem:[%s3266_s3 + $0x308] sm:$0xff]   ;;  %v2572_v7 = vld [vmem:[%s3266_s3 + $0x318] sm:$0xff]   ;;  %v2574_v8 = vld [vmem:[%s3266_s3 + $0x360] sm:$0xff]  }
 0x105   :  { %2343 = vmatprep.subr.bf16.mxu0 %v2522_v18  ;;  %2365 = vmatprep.subr.bf16.mxu1 %v2523_v20  ;;  %v2565_v40 = vld [vmem:[%s3266_s3 + $0x388] sm:$0xff]   ;;  %v2573_v44 = vld [vmem:[%s3266_s3 + $0x398] sm:$0xff]   ;;  %v2575_v9 = vld [vmem:[%s3266_s3 + $0x3e0] sm:$0xff]  }
 0x106   :  { %v2576_v10 = vld [vmem:[%s3266_s3 + $0x320] sm:$0xff]   ;;  %v2578_v11 = vld [vmem:[%s3266_s3 + $0x368] sm:$0xff]   ;;  %v2582_v17 = vld [vmem:[%s3266_s3 + $0x370] sm:$0xff]  }
 0x107   :  { %v2577_v3 = vld [vmem:[%s3266_s3 + $0x3a0] sm:$0xff]   ;;  %v2579_v13 = vld [vmem:[%s3266_s3 + $0x3e8] sm:$0xff]   ;;  %v2583_v18 = vld [vmem:[%s3266_s3 + $0x3f0] sm:$0xff]  }
 0x108   :  { %2344 = vmatpush3.bf16.msra.mxu0 %v2524_v21  ;;  %2366 = vmatpush3.bf16.msra.mxu1 %v2525_v22  ;;  %v2580_v14 = vld [vmem:[%s3266_s3 + $0x328] sm:$0xff]   ;;  %v2585_v20 = vld [vmem:[%s3266_s3 + $0x3b0] sm:$0xff]   ;;  %v2586_v21 = vld [vmem:[%s3266_s3 + $0x378] sm:$0xff]  }
 0x109   :  { %2373 = vmatprep.subr.bf16.mxu0 %v2526_v23  ;;  %2395 = vmatprep.subr.bf16.mxu1 %v2527_v24  ;;  %v2587_v22 = vld [vmem:[%s3266_s3 + $0x3f8] sm:$0xff]  }
 0x10a   :  { %v2588_v23 = vld [vmem:[%s3266_s3 + $0x338] sm:$0xff]  }
 0x10b   :  { %1848 = vmatmul.mubr.bf16.vlgmr.msra.gmra.mrb[20].mxu0 %v2934_v0  ;;  %1889 = vmatmul.mubr.bf16.vlgmr.msra.gmra.mrb[20].mxu1 %v2942_v6  ;;  %v2535_v0 = vld [vmem:[%s3266_s3 + $0x2d0] sm:$0xff]   ;;  %v2589_v24 = vld [vmem:[%s3266_s3 + $0x3b8] sm:$0xff]  }
 0x10c   :  { %2374 = vmatpush3.bf16.msra.mxu0 %v2528_v25  ;;  %2396 = vmatpush3.bf16.msra.mxu1 %v2529_v26  ;;  %v2536_v6 = vld [vmem:[%s3266_s3 + $0x210] sm:$0xff]  }
 0x10d   :  { %2375 = vmatprep.subr.bf16.mxu0 %v2530_v27  ;;  %2397 = vmatprep.subr.bf16.mxu1 %v2531_v28  ;;  %v2154_v27 = vld [vmem:[%s3268_s4] ss:$0 sm:$0xff] }
 0x10e   :  { %1929 = vmatprep.mubr.bf16.mxu0 %v2982_v46  ;;  %1970 = vmatprep.mubr.bf16.mxu1 %v2992_v1  ;;  %v2545_v46 = vld [vmem:[%s3266_s3 + $0x2a0] sm:$0xff]   ;;  %v2549_v1 = vld [vmem:[%s3266_s3 + $0x2a8] sm:$0xff]  }
 0x110   :  { %2376 = vmatpush3.bf16.msra.mxu0 %v2532_v29  ;;  %2398 = vmatpush3.bf16.msra.mxu1 %v2533_v30 }
 0x111   :  { %2377 = vmatprep.subr.bf16.mxu0 %v2534_v31  ;;  %2399 = vmatprep.subr.bf16.mxu1 %v2535_v0 }
 0x114   :  { %2378 = vmatpush3.bf16.msra.mxu0 %v2536_v6  ;;  %2400 = vmatpush3.bf16.msra.mxu1 %v2537_v32 }
 0x115   :  { %2379 = vmatprep.subr.bf16.mxu0 %v2538_v34  ;;  %2401 = vmatprep.subr.bf16.mxu1 %v2539_v35 }
 0x118   :  { %2380 = vmatpush3.bf16.msra.mxu0 %v2540_v36  ;;  %2402 = vmatpush3.bf16.msra.mxu1 %v2541_v37 }
 0x119   :  { %2381 = vmatprep.subr.bf16.mxu0 %v2542_v41  ;;  %2403 = vmatprep.subr.bf16.mxu1 %v2543_v49 }
 0x11c   :  { %2382 = vmatpush3.bf16.msra.mxu0 %v2544_v45  ;;  %2404 = vmatpush3.bf16.msra.mxu1 %v2545_v46 }
 0x11d   :  { %2383 = vmatprep.subr.bf16.mxu0 %v2546_v51  ;;  %2405 = vmatprep.subr.bf16.mxu1 %v2547_v59 }
 0x120   :  { %2384 = vmatpush3.bf16.msra.mxu0 %v2548_v39  ;;  %2406 = vmatpush3.bf16.msra.mxu1 %v2549_v1 }
 0x121   :  { %2385 = vmatprep.subr.bf16.mxu0 %v2550_v33  ;;  %2407 = vmatprep.subr.bf16.mxu1 %v2551_v48 }
 0x124   :  { %2386 = vmatpush3.bf16.msra.mxu0 %v2552_v50  ;;  %2408 = vmatpush3.bf16.msra.mxu1 %v2553_v52 }
 0x125   :  { %2387 = vmatprep.subr.bf16.mxu0 %v2554_v53  ;;  %2409 = vmatprep.subr.bf16.mxu1 %v2555_v54 }
 0x128   :  { %2388 = vmatpush3.bf16.msra.mxu0 %v2556_v55  ;;  %2410 = vmatpush3.bf16.msra.mxu1 %v2557_v56 }
 0x129   :  { %2417 = vmatprep.subr.bf16.mxu0 %v2558_v57  ;;  %2439 = vmatprep.subr.bf16.mxu1 %v2559_v58 }
 0x12b   :  { %1930 = vmatmul.mubr.bf16.vlgmr.msra.gmra.mrb[24].mxu0 %v2974_v38  ;;  %1971 = vmatmul.mubr.bf16.vlgmr.msra.gmra.mrb[24].mxu1 %v2984_v47  ;;  %v2567_v38 = vld [vmem:[%s3266_s3 + $0x3d0] sm:$0xff]  }
 0x12c   :  { %2418 = vmatpush3.bf16.msra.mxu0 %v2560_v60  ;;  %2440 = vmatpush3.bf16.msra.mxu1 %v2561_v61  ;;  %v2568_v47 = vld [vmem:[%s3266_s3 + $0x310] sm:$0xff]  }
 0x12d   :  { %2419 = vmatprep.subr.bf16.mxu0 %v2562_v62  ;;  %2441 = vmatprep.subr.bf16.mxu1 %v2563_v63 }
 0x12e   :  { %2011 = vmatprep.mubr.bf16.mxu0 %v3014_v15  ;;  %2052 = vmatprep.mubr.bf16.mxu1 %v3024_v19  ;;  %v2581_v15 = vld [vmem:[%s3266_s3 + $0x3a8] sm:$0xff]   ;;  %v2584_v19 = vld [vmem:[%s3266_s3 + $0x330] sm:$0xff]  }
 0x130   :  { %2420 = vmatpush3.bf16.msra.mxu0 %v2564_v2  ;;  %2442 = vmatpush3.bf16.msra.mxu1 %v2565_v40 }
 0x131   :  { %2421 = vmatprep.subr.bf16.mxu0 %v2566_v4  ;;  %2443 = vmatprep.subr.bf16.mxu1 %v2567_v38 }
 0x134   :  { %2422 = vmatpush3.bf16.msra.mxu0 %v2568_v47  ;;  %2444 = vmatpush3.bf16.msra.mxu1 %v2569_v5 }
 0x135   :  { %2423 = vmatprep.subr.bf16.mxu0 %v2570_v43  ;;  %2445 = vmatprep.subr.bf16.mxu1 %v2571_v42 }
 0x138   :  { %2424 = vmatpush3.bf16.msra.mxu0 %v2572_v7  ;;  %2446 = vmatpush3.bf16.msra.mxu1 %v2573_v44 }
 0x139   :  { %2425 = vmatprep.subr.bf16.mxu0 %v2574_v8  ;;  %2447 = vmatprep.subr.bf16.mxu1 %v2575_v9 }
 0x13c   :  { %2426 = vmatpush3.bf16.msra.mxu0 %v2576_v10  ;;  %2448 = vmatpush3.bf16.msra.mxu1 %v2577_v3 }
 0x13d   :  { %2427 = vmatprep.subr.bf16.mxu0 %v2578_v11  ;;  %2449 = vmatprep.subr.bf16.mxu1 %v2579_v13 }
 0x140   :  { %2428 = vmatpush3.bf16.msra.mxu0 %v2580_v14  ;;  %2450 = vmatpush3.bf16.msra.mxu1 %v2581_v15 }
 0x141   :  { %2429 = vmatprep.subr.bf16.mxu0 %v2582_v17  ;;  %2451 = vmatprep.subr.bf16.mxu1 %v2583_v18 }
 0x144   :  { %2430 = vmatpush3.bf16.msra.mxu0 %v2584_v19  ;;  %2452 = vmatpush3.bf16.msra.mxu1 %v2585_v20 }
 0x145   :  { %2431 = vmatprep.subr.bf16.mxu0 %v2586_v21  ;;  %2453 = vmatprep.subr.bf16.mxu1 %v2587_v22 }
 0x148   :  { %2432 = vmatpush3.bf16.msra.mxu0 %v2588_v23  ;;  %2454 = vmatpush3.bf16.msra.mxu1 %v2589_v24 }
 0x14b   :  { %2012 = vmatmul.mubr.bf16.vlgmr.msra.gmra.mrb[28].mxu0 %v3009_v12  ;;  %2053 = vmatmul.mubr.bf16.vlgmr.msra.gmra.mrb[28].mxu1 %v3016_v16 }
 0x1be   :  { %v2301_v25 = vpop.f32.mrb[16].mxu0  ;;  %v2323_v26 = vpop.f32.mrb[16].mxu1 }
 0x1bf   :  { %v2302_v28 = vpop.f32.mrb[17].mxu0  ;;  %v2324_v30 = vpop.f32.mrb[17].mxu1 }
 0x1c0   :  { %v2303_v29 = vadd.f32 %v2302_v28, %v2301_v25  ;;  %v2304_v31 = vpop.f32.mrb[18].mxu0  ;;  %v2325_v0 = vadd.f32 %v2324_v30, %v2323_v26  ;;  %v2326_v6 = vpop.f32.mrb[18].mxu1  ;;  %v2594_v26 = vld [vmem:[%s3265_s0] sm:$0xff] }
 0x1c1   :  { %v2305_v32 = vpop.f32.mrb[19].mxu0  ;;  %v2327_v36 = vpop.f32.mrb[19].mxu1 }
 0x1c2   :  { %v1768_v34 = vadd.f32 %v2303_v29, %v2154_v27  ;;  %v2306_v35 = vadd.f32 %v2305_v32, %v2304_v31  ;;  %v2328_v37 = vadd.f32 %v2327_v36, %v2326_v6  ;;  %v2595_v29 = vld [vmem:[%s3265_s0 + $0x8] sm:$0xff] }
 0x1c4   :  { %v1809_v12 = vadd.f32 %v2325_v0, %v1768_v34  ;;  %v1771_v41 = vadd.f32 %v2306_v35, %v2154_v27 }
 0x1c6   :  { %v1812_v16 = vadd.f32 %v2328_v37, %v1771_v41 }
 0x1de   :  { %v2345_v49 = vpop.f32.mrb[20].mxu0  ;;  %v2367_v45 = vpop.f32.mrb[20].mxu1 }
 0x1df   :  { %v2346_v46 = vpop.f32.mrb[21].mxu0  ;;  %v2368_v59 = vpop.f32.mrb[21].mxu1 }
 0x1e0   :  { %v2347_v51 = vadd.f32 %v2346_v46, %v2345_v49  ;;  %v2348_v39 = vpop.f32.mrb[22].mxu0  ;;  %v2369_v1 = vadd.f32 %v2368_v59, %v2367_v45  ;;  %v2370_v33 = vpop.f32.mrb[22].mxu1 }
 0x1e1   :  { %v2349_v48 = vpop.f32.mrb[23].mxu0  ;;  %v2371_v53 = vpop.f32.mrb[23].mxu1 }
 0x1e2   :  { %v1850_v50 = vadd.f32 %v2347_v51, %v1809_v12  ;;  %v2350_v52 = vadd.f32 %v2349_v48, %v2348_v39  ;;  %v2372_v54 = vadd.f32 %v2371_v53, %v2370_v33  ;;  %v2283_v33 = vld [vmem:[%s3269_s5] ss:$0 sm:$0xff] }
 0x1e4   :  { %v1891_v55 = vadd.f32 %v2369_v1, %v1850_v50  ;;  %v1853_v56 = vadd.f32 %v2350_v52, %v1812_v16  ;;  %v2284_v50 = vld [vmem:[%s3270_s6] ss:$0 sm:$0xff] }
 0x1e6   :  { %v1894_v57 = vadd.f32 %v2372_v54, %v1853_v56 }
 0x1fe   :  { %v2389_v58 = vpop.f32.mrb[24].mxu0  ;;  %v2411_v60 = vpop.f32.mrb[24].mxu1 }
 0x1ff   :  { %v2390_v61 = vpop.f32.mrb[25].mxu0  ;;  %v2412_v63 = vpop.f32.mrb[25].mxu1 }
 0x200   :  { %v2391_v62 = vadd.f32 %v2390_v61, %v2389_v58  ;;  %v2392_v2 = vpop.f32.mrb[26].mxu0  ;;  %v2413_v40 = vadd.f32 %v2412_v63, %v2411_v60  ;;  %v2414_v4 = vpop.f32.mrb[26].mxu1 }
 0x201   :  { %v2393_v38 = vpop.f32.mrb[27].mxu0  ;;  %v2415_v43 = vpop.f32.mrb[27].mxu1 }
 0x202   :  { %v1932_v47 = vadd.f32 %v2391_v62, %v1891_v55  ;;  %v2394_v5 = vadd.f32 %v2393_v38, %v2392_v2  ;;  %v2416_v42 = vadd.f32 %v2415_v43, %v2414_v4 }
 0x204   :  { %v1973_v7 = vadd.f32 %v2413_v40, %v1932_v47  ;;  %v1935_v44 = vadd.f32 %v2394_v5, %v1894_v57 }
 0x206   :  { %v1976_v8 = vadd.f32 %v2416_v42, %v1935_v44 }
 0x21e   :  { %v2433_v9 = vpop.f32.mrb[28].mxu0  ;;  %v2455_v10 = vpop.f32.mrb[28].mxu1 }
 0x21f   :  { %v2434_v3 = vpop.f32.mrb[29].mxu0  ;;  %v2456_v13 = vpop.f32.mrb[29].mxu1 }
 0x220   :  { %v2435_v11 = vadd.f32 %v2434_v3, %v2433_v9  ;;  %v2436_v14 = vpop.f32.mrb[30].mxu0  ;;  %v2457_v15 = vadd.f32 %v2456_v13, %v2455_v10  ;;  %v2458_v17 = vpop.f32.mrb[30].mxu1 }
 0x221   :  { %v2437_v18 = vpop.f32.mrb[31].mxu0  ;;  %v2459_v21 = vpop.f32.mrb[31].mxu1 }
 0x222   :  { %v2014_v19 = vadd.f32 %v2435_v11, %v1973_v7  ;;  %v2438_v20 = vadd.f32 %v2437_v18, %v2436_v14  ;;  %v2460_v22 = vadd.f32 %v2459_v21, %v2458_v17 }
 0x224   :  { %v2055_v23 = vadd.f32 %v2457_v15, %v2014_v19  ;;  %v2017_v24 = vadd.f32 %v2438_v20, %v1976_v8 }
 0x226   :  { %v2058_v25 = vadd.f32 %v2460_v22, %v2017_v24  ;;  %v2061_v27 = vadd.f32 %v2594_v26, %v2055_v23 }
 0x228   :  { %v2065_v28 = vsel %vm306_vm0, %v2061_v27, 0.0  ;;  %v2062_v30 = vadd.f32 %v2595_v29, %v2058_v25 }
 0x229   :  { %2066 = vadd.xlane.f32.xlu0 %v2065_v28 }
 0x22a   :  { %v2068_v31 = vsel %vm306_vm0, %v2062_v30, 0.0 }
 0x22d   :  { %2069 = vadd.xlane.f32.xlu0 %v2068_v31 }
 0x2b6   :  { %v2067_v0 = vpop.xlane.xlu0 %2066 }
 0x2b7   :  { %v2072_v6 = vmul.f32 0.03125, %v2067_v0 }
 0x2b9   :  { %v2074_v32 = vsub.f32 %v2061_v27, %v2072_v6 }
 0x2ba   :  { %v2070_v34 = vpop.xlane.xlu0 %2069 }
 0x2bb   :  { %v2073_v35 = vmul.f32 0.03125, %v2070_v34  ;;  %v2076_v36 = vmul.f32 %v2074_v32, %v2074_v32 }
 0x2bd   :  { %v2075_v37 = vsub.f32 %v2062_v30, %v2073_v35  ;;  %v2078_v12 = vsel %vm306_vm0, %v2076_v36, 0.0 }
 0x2be   :  { %2079 = vadd.xlane.f32.xlu1 %v2078_v12 }
 0x2bf   :  { %v2077_v41 = vmul.f32 %v2075_v37, %v2075_v37 }
 0x2c1   :  { %v2081_v16 = vsel %vm306_vm0, %v2077_v41, 0.0 }
 0x2c2   :  { %2082 = vadd.xlane.f32.xlu1 %v2081_v16 }
 0x34b   :  { %v2080_v49 = vpop.xlane.xlu1 %2079 }
 0x34c   :  { %v2084_v45 = vmul.f32 0.03125, %v2080_v49 }
 0x34e   :  { %v2086_v46 = vadd.f32 1e-05, %v2084_v45 }
 0x34f   :  { %v2083_v51 = vpop.xlane.xlu1 %2082 }
 0x350   :  { %2590 = vrsqrt.f32 %v2086_v46  ;;  %v2085_v59 = vmul.f32 0.03125, %v2083_v51 }
 0x352   :  { %v2087_v39 = vadd.f32 1e-05, %v2085_v59 }
 0x354   :  { %2592 = vrsqrt.f32 %v2087_v39 }
 0x35a   :  { %v2591_v1 = vpop.eup %2590 }
 0x35b   :  { %v2090_v48 = vmul.f32 %v2591_v1, %v2074_v32 }
 0x35d   :  { %v2098_v52 = vmul.f32 %v2283_v33, %v2090_v48 }
 0x35e   :  { %v2593_v53 = vpop.eup %2592 }
 0x35f   :  { %v2106_v54 = vadd.f32 %v2284_v50, %v2098_v52  ;;  %v2091_v55 = vmul.f32 %v2593_v53, %v2075_v37 }
 0x361   :  { %2108 = vst.msk [vmem:[%s3271_s7] sm:$0xff] %vm306_vm0, %v2106_v54  ;;  %v2099_v56 = vmul.f32 %v2283_v33, %v2091_v55 }
 0x363   :  { %v2107_v57 = vadd.f32 %v2284_v50, %v2099_v56 }
 0x365   :  { %2109 = vst.msk [vmem:[%s3271_s7 + $0x8] sm:$0xff] %vm306_vm0, %v2107_v57 }

</bundles_post_ra>
